<compile_context>
chip_gen: v7x
topology: tpu7x:2x2x1
jax: 0.10.0
libtpu: 0.0.40
codegen_flags: <defaults>
</compile_context>

<pallas_src>
import math

import numpy as np
import jax
import jax.numpy as jnp
from jax.experimental import pallas as pl
from jax.experimental.pallas import tpu as pltpu


_VMEM_LIMIT = 48 * 1024 * 1024   # safe on v5e/v6e (128 MiB) and v7x (64 MiB)
_NEG_INF = -1e30                 # finite "masked" value -> no NaN softmax rows


def _round_up(x, m):
    return ((x + m - 1) // m) * m


# --------------------------- in-kernel math helpers -------------------------

def _erf_f32(x):
    # Abramowitz & Stegun 7.1.26 rational approximation, |err| <= 1.5e-7,
    # i.e. at f32 noise level (and far below bf16 activation precision).
    # Uses only VPU/EUP ops that are guaranteed to lower in Mosaic.
    a1, a2, a3, a4, a5 = (0.254829592, -0.284496736, 1.421413741,
                          -1.453152027, 1.061405429)
    p = 0.3275911
    sgn = jnp.where(x < 0.0, -1.0, 1.0)
    ax = jnp.abs(x)
    t = 1.0 / (1.0 + p * ax)
    poly = ((((a5 * t + a4) * t + a3) * t + a2) * t + a1) * t
    return sgn * (1.0 - poly * jnp.exp(-ax * ax))


def _gelu_f32(x):
    # exact (erf-based) GELU, matching torch F.gelu default
    return 0.5 * x * (1.0 + _erf_f32(x * 0.7071067811865476))


# ----------------------------- tiled linear ---------------------------------

def _make_linear_kernel(activation, transpose_rhs):
    def kernel(x_ref, w_ref, b_ref, o_ref, acc_ref):
        @pl.when(pl.program_id(2) == 0)
        def _init():
            acc_ref[...] = jnp.zeros_like(acc_ref)

        x = x_ref[...]
        w = w_ref[...]
        if transpose_rhs:
            acc_ref[...] += jax.lax.dot_general(
                x, w, (((1,), (1,)), ((), ())),
                preferred_element_type=jnp.float32)
        else:
            acc_ref[...] += jnp.dot(x, w, preferred_element_type=jnp.float32)

        @pl.when(pl.program_id(2) == pl.num_programs(2) - 1)
        def _finalize():
            out = acc_ref[...] + b_ref[...]          # bias kept in f32
            if activation == "gelu":
                out = _gelu_f32(out)                  # fused epilogue
            o_ref[...] = out.astype(o_ref.dtype)

    return kernel


def linear_pallas(x, w, b, *, activation=None, transpose_rhs=False,
                  out_dtype=None, tm=256, tn=256, tk=512):
    """out = act(x @ w + b)  (or x @ w.T + b when transpose_rhs)."""
    M, K = x.shape
    if transpose_rhs:
        N = w.shape[0]
    else:
        N = w.shape[1]
    out_dtype = out_dtype if out_dtype is not None else x.dtype

    # Tile = whole dim when small (single block, no alignment constraint),
    # else the default tile with zero padding up to a tile multiple.
    bm = M if M <= tm else tm
    bn = N if N <= tn else tn
    bk = K if K <= tk else tk
    Mp, Np, Kp = _round_up(M, bm), _round_up(N, bn), _round_up(K, bk)

    if (Mp, Kp) != (M, K):
        x = jnp.pad(x, ((0, Mp - M), (0, Kp - K)))
    if transpose_rhs:
        if (Np, Kp) != (N, K):
            w = jnp.pad(w, ((0, Np - N), (0, Kp - K)))
        w_spec = pl.BlockSpec((bn, bk), lambda i, j, k: (j, k))
    else:
        if (Kp, Np) != (K, N):
            w = jnp.pad(w, ((0, Kp - K), (0, Np - N)))
        w_spec = pl.BlockSpec((bk, bn), lambda i, j, k: (k, j))
    b2 = b.reshape(1, N).astype(jnp.float32)
    if Np != N:
        b2 = jnp.pad(b2, ((0, 0), (0, Np - N)))

    out = pl.pallas_call(
        _make_linear_kernel(activation, transpose_rhs),
        out_shape=jax.ShapeDtypeStruct((Mp, Np), out_dtype),
        grid=(Mp // bm, Np // bn, Kp // bk),
        in_specs=[pl.BlockSpec((bm, bk), lambda i, j, k: (i, k)),
                  w_spec,
                  pl.BlockSpec((1, bn), lambda i, j, k: (0, j))],
        out_specs=pl.BlockSpec((bm, bn), lambda i, j, k: (i, j)),
        scratch_shapes=[pltpu.VMEM((bm, bn), jnp.float32)],
        compiler_params=pltpu.CompilerParams(
            dimension_semantics=("parallel", "parallel", "arbitrary"),
            vmem_limit_bytes=_VMEM_LIMIT),
    )(x, w, b2)
    if (Mp, Np) != (M, N):
        out = out[:M, :N]
    return out


# ----------------------------- layer norm -----------------------------------

def _layernorm_kernel(x_ref, g_ref, b_ref, o_ref):
    x = x_ref[...].astype(jnp.float32)        # stats in f32
    mu = jnp.mean(x, axis=-1, keepdims=True)
    xc = x - mu
    var = jnp.mean(xc * xc, axis=-1, keepdims=True)
    y = xc * jax.lax.rsqrt(var + 1e-5) * g_ref[...] + b_ref[...]
    o_ref[...] = y.astype(o_ref.dtype)


def layernorm_pallas(x, g, b, *, out_dtype=None, tm=256):
    M, D = x.shape
    out_dtype = out_dtype if out_dtype is not None else x.dtype
    bm = M if M <= tm else tm
    Mp = _round_up(M, bm)
    if Mp != M:
        x = jnp.pad(x, ((0, Mp - M), (0, 0)))
    out = pl.pallas_call(
        _layernorm_kernel,
        out_shape=jax.ShapeDtypeStruct((Mp, D), out_dtype),
        grid=(Mp // bm,),
        in_specs=[pl.BlockSpec((bm, D), lambda i: (i, 0)),
                  pl.BlockSpec((1, D), lambda i: (0, 0)),
                  pl.BlockSpec((1, D), lambda i: (0, 0))],
        out_specs=pl.BlockSpec((bm, D), lambda i: (i, 0)),
        compiler_params=pltpu.CompilerParams(
            dimension_semantics=("parallel",)),
    )(x, g.reshape(1, D).astype(jnp.float32), b.reshape(1, D).astype(jnp.float32))
    return out if Mp == M else out[:M]


# ----------------------------- attention ------------------------------------

def _attn_kernel(q_ref, k_ref, v_ref, bias_ref, o_ref):
    # Blocks (one batch element, all heads):
    #   q: (1, H, Lq, hd)   k/v: (1, H, Lk, hd)   bias: (1, H, Lq, Lk)
    #   o: (1, H, Lq, hd)
    H = q_ref.shape[1]
    for h in range(H):                       # static unroll: H back-to-back MXU ops
        q = q_ref[0, h]
        k = k_ref[0, h]
        v = v_ref[0, h]
        # QK^T with trans-B dimension numbers (no in-kernel k.T materialisation)
        s = jax.lax.dot_general(q, k, (((1,), (1,)), ((), ())),
                                preferred_element_type=jnp.float32)
        s = s + bias_ref[0, h].astype(jnp.float32)      # mask pre-folded into bias
        m = jnp.max(s, axis=-1, keepdims=True)
        p = jnp.exp(s - m)
        denom = jnp.sum(p, axis=-1, keepdims=True)
        p = p * pl.reciprocal(denom, approx=True)       # EUP slot, VPU stays free
        o = jnp.dot(p.astype(v.dtype), v, preferred_element_type=jnp.float32)
        o_ref[0, h] = o.astype(o_ref.dtype)
    # TODO(synk): store a lane-dense (Lq, H*hd) output slab in one shot once
    # in-kernel head-concat layout is validated on all generations.


def attention_pallas(q, k, v, bias, *, out_dtype=None):
    # q: (B, H, Lq, hd), k/v: (B, H, Lk, hd), bias: (B, H, Lq, Lk) (mask folded)
    B, H, Lq, hd = q.shape
    Lk = k.shape[2]
    out_dtype = out_dtype if out_dtype is not None else q.dtype
    return pl.pallas_call(
        _attn_kernel,
        out_shape=jax.ShapeDtypeStruct((B, H, Lq, hd), out_dtype),
        grid=(B,),
        in_specs=[pl.BlockSpec((1, H, Lq, hd), lambda b: (b, 0, 0, 0)),
                  pl.BlockSpec((1, H, Lk, hd), lambda b: (b, 0, 0, 0)),
                  pl.BlockSpec((1, H, Lk, hd), lambda b: (b, 0, 0, 0)),
                  pl.BlockSpec((1, H, Lq, Lk), lambda b: (b, 0, 0, 0))],
        out_specs=pl.BlockSpec((1, H, Lq, hd), lambda b: (b, 0, 0, 0)),
        compiler_params=pltpu.CompilerParams(
            dimension_semantics=("parallel",),
            vmem_limit_bytes=_VMEM_LIMIT),
    )(q, k, v, bias)


# ----------------------------- model pieces ---------------------------------

def _to_heads(x, H):
    B, L, D = x.shape
    hd = D // H
    return x.reshape(B, L, H, hd).transpose(0, 2, 1, 3)       # (B, H, L, hd)


def _from_heads(x):
    B, H, L, hd = x.shape
    return x.transpose(0, 2, 1, 3).reshape(B, L, H * hd)      # (B, L, D)


def make_query_and_content_mask(sz, pred):
    # mirrors the torch helper exactly (value==0 -> masked); built statically.
    tri = np.triu(np.ones((pred, pred)), 0)
    qmask = np.concatenate([np.ones((pred, sz - pred)), 1 - tri, tri], axis=-1)
    cm = np.concatenate(
        [np.zeros((sz - pred, pred)), np.tril(np.ones((pred, pred)), 0),
         np.zeros((pred, pred))], axis=0)
    cmask = np.concatenate([np.ones((sz + pred, sz - pred)), cm, 1 - cm], axis=-1)
    return jnp.asarray(qmask == 0), jnp.asarray(cmask == 0)   # bool: True = masked


def relative_position_bucket(relative_position, num_buckets, max_distance):
    n = -relative_position
    num_buckets = num_buckets // 2
    ret = (n < 0).astype(jnp.int32) * num_buckets
    n = jnp.abs(n)
    max_exact = num_buckets // 2
    is_small = n < max_exact
    val_if_large = max_exact + (
        jnp.log(jnp.maximum(n, 1).astype(jnp.float32) / max_exact)
        / math.log(max_distance / max_exact) * (num_buckets - max_exact)
    ).astype(jnp.int32)
    val_if_large = jnp.minimum(val_if_large, num_buckets - 1)
    return ret + jnp.where(is_small, n, val_if_large)


def encode_relative_emb(params, positions, cfg):
    # positions: (B, L) -> (B, H, L, L) f32
    H = cfg["num_heads"]
    context = positions[:, :, None]
    memory = positions[:, None, :]
    rel = memory - context
    rp_bucket = relative_position_bucket(
        rel, cfg["num_buckets"], cfg["max_distance"])
    values = params["rel_attn_bias"][rp_bucket]               # (B, L, L, H)
    return jnp.transpose(values, (0, 3, 1, 2))                # (B, H, L, L)


def encoder_layer(lp, c, q, content_bias, query_bias, H):
    B, Lc, D = c.shape
    P = q.shape[1]

    def ln(x, g, b):
        return layernorm_pallas(x.reshape(-1, D), g, b).reshape(x.shape)

    # --- pre-LN + two-stream attention (dropouts are identity in eval) ------
    cn = ln(c, lp["attn_ln_g"], lp["attn_ln_b"])
    qn = ln(q, lp["attn_ln_g"], lp["attn_ln_b"])

    # fused QKV projection of the content stream (Q part pre-scaled)
    qkv = linear_pallas(cn.reshape(B * Lc, D), lp["w_qkv"], lp["b_qkv"])
    qkv = qkv.reshape(B, Lc, 3, D)
    qc, k, v = qkv[:, :, 0], qkv[:, :, 1], qkv[:, :, 2]
    kh, vh = _to_heads(k, H), _to_heads(v, H)

    # query-stream Q projection (pre-scaled), shares K/V with content stream
    qq = linear_pallas(qn.reshape(B * P, D), lp["wq_s"], lp["bq_s"]).reshape(B, P, D)

    c_att = _from_heads(attention_pallas(_to_heads(qc, H), kh, vh, content_bias))
    q_att = _from_heads(attention_pallas(_to_heads(qq, H), kh, vh, query_bias))

    c_att = linear_pallas(c_att.reshape(B * Lc, D), lp["wo"], lp["bo"]).reshape(B, Lc, D)
    q_att = linear_pallas(q_att.reshape(B * P, D), lp["wo"], lp["bo"]).reshape(B, P, D)

    # --- residual + pre-LN FFN (bias+GELU fused into fc1 epilogue) ----------
    def skip_norm_ff(x_att, residual):
        x = x_att + residual
        residual = x
        y = layernorm_pallas(x.reshape(-1, D), lp["final_ln_g"], lp["final_ln_b"])
        y = linear_pallas(y, lp["w1"], lp["b1"], activation="gelu")
        y = linear_pallas(y, lp["w2"], lp["b2"])
        return y.reshape(x.shape) + residual

    return skip_norm_ff(c_att, c), skip_norm_ff(q_att, q)


def mpnet_forward(params, input_ids, positions, pred_size, cfg):
    B, T = input_ids.shape
    D, H, V = cfg["embed_dim"], cfg["num_heads"], cfg["vocab_size"]
    P = pred_size
    Lc = T - P

    # --- encode_emb (embed_scale=None, emb LN deferred, dropout=identity) ---
    tok = params["embed_tokens"][input_ids]                   # (B, T, D) bf16
    pos = params["embed_positions"][positions + 2]
    x = tok + pos

    c = x[:, :Lc]                                             # (B, Lc, D)
    q = x[:, Lc:]                                             # (B, P,  D)

    # --- relative position bias with the attention masks folded in ----------
    bias = encode_relative_emb(params, positions[:, :Lc], cfg)   # (B,H,Lc,Lc) f32
    qbias = bias[:, :, -P:, :]                                   # (B,H,P,Lc)
    qmask, cmask = make_query_and_content_mask(Lc - P, P)
    content_bias = (bias + jnp.where(cmask, _NEG_INF, 0.0)).astype(jnp.bfloat16)
    query_bias = (qbias + jnp.where(qmask, _NEG_INF, 0.0)).astype(jnp.bfloat16)

    for lp in params["layers"]:
        c, q = encoder_layer(lp, c, q, content_bias, query_bias, H)

    # maybe_final_norm (normalize_before=True -> apply emb layer norm on q)
    q2 = layernorm_pallas(q.reshape(B * P, D), params["emb_ln_g"], params["emb_ln_b"])

    # --- LM head: dense(+GELU fused) -> LN -> tied-embedding projection -----
    h = linear_pallas(q2, params["lm_dense_w"], params["lm_dense_b"],
                      activation="gelu")
    h = layernorm_pallas(h, params["lm_ln_g"], params["lm_ln_b"])
    logits = linear_pallas(h, params["embed_tokens"], params["lm_bias"],
                           transpose_rhs=True, out_dtype=jnp.float32, tn=512)
    return logits.reshape(B, P, V)


# ----------------------------- parameters -----------------------------------

def init_params(key, cfg):
    D, H, Fdim = cfg["embed_dim"], cfg["num_heads"], cfg["ffn_dim"]
    V, nb, mp = cfg["vocab_size"], cfg["num_buckets"], cfg["max_positions"]
    keys = iter(jax.random.split(key, 8 * cfg["num_layers"] + 8))

    def nrm(shape):
        return 0.02 * jax.random.normal(next(keys), shape, jnp.float32)

    params = {
        "embed_tokens": nrm((V, D)).at[cfg["pad_idx"]].set(0.0),
        "embed_positions": nrm((mp + 2, D)).at[cfg["pad_idx"]].set(0.0),
        "rel_attn_bias": nrm((nb, H)),
        "emb_ln_g": jnp.ones((D,), jnp.float32),
        "emb_ln_b": jnp.zeros((D,), jnp.float32),
        "lm_dense_w": nrm((D, D)),
        "lm_dense_b": jnp.zeros((D,), jnp.float32),
        "lm_ln_g": jnp.ones((D,), jnp.float32),
        "lm_ln_b": jnp.zeros((D,), jnp.float32),
        "lm_bias": jnp.zeros((V,), jnp.float32),
        "layers": [],
    }
    for _ in range(cfg["num_layers"]):
        lp = {
            "wq": nrm((D, D)), "bq": jnp.zeros((D,), jnp.float32),
            "wk": nrm((D, D)), "bk": jnp.zeros((D,), jnp.float32),
            "wv": nrm((D, D)), "bv": jnp.zeros((D,), jnp.float32),
            "wo": nrm((D, D)), "bo": jnp.zeros((D,), jnp.float32),
            "attn_ln_g": jnp.ones((D,), jnp.float32),
            "attn_ln_b": jnp.zeros((D,), jnp.float32),
            "final_ln_g": jnp.ones((D,), jnp.float32),
            "final_ln_b": jnp.zeros((D,), jnp.float32),
            "w1": nrm((D, Fdim)), "b1": jnp.zeros((Fdim,), jnp.float32),
            "w2": nrm((Fdim, D)), "b2": jnp.zeros((D,), jnp.float32),
        }
        params["layers"].append(lp)
    return params


def prepare_params(params, cfg):
    """Cast weight matrices to bf16, fuse QKV and fold the 1/sqrt(hd) scaling."""
    D, H = cfg["embed_dim"], cfg["num_heads"]
    scaling = (D // H) ** -0.5
    bf = lambda a: a.astype(jnp.bfloat16)

    rt = {
        "embed_tokens": bf(params["embed_tokens"]),
        "embed_positions": bf(params["embed_positions"]),
        "rel_attn_bias": params["rel_attn_bias"],
        "emb_ln_g": params["emb_ln_g"], "emb_ln_b": params["emb_ln_b"],
        "lm_dense_w": bf(params["lm_dense_w"]), "lm_dense_b": params["lm_dense_b"],
        "lm_ln_g": params["lm_ln_g"], "lm_ln_b": params["lm_ln_b"],
        "lm_bias": params["lm_bias"],
        "layers": [],
    }
    for lp in params["layers"]:
        w_qkv = jnp.concatenate([scaling * lp["wq"], lp["wk"], lp["wv"]], axis=1)
        b_qkv = jnp.concatenate([scaling * lp["bq"], lp["bk"], lp["bv"]])
        rt["layers"].append({
            "w_qkv": bf(w_qkv), "b_qkv": b_qkv,
            "wq_s": bf(scaling * lp["wq"]), "bq_s": scaling * lp["bq"],
            "wo": bf(lp["wo"]), "bo": lp["bo"],
            "attn_ln_g": lp["attn_ln_g"], "attn_ln_b": lp["attn_ln_b"],
            "final_ln_g": lp["final_ln_g"], "final_ln_b": lp["final_ln_b"],
            "w1": bf(lp["w1"]), "b1": lp["b1"],
            "w2": bf(lp["w2"]), "b2": lp["b2"],
        })
    return rt


# ----------------------------- main ------------------------------------------

if __name__ == "__main__":
    cfg = dict(
        vocab_size=64,
        embed_dim=32,
        num_heads=4,
        ffn_dim=64,
        num_layers=2,
        num_buckets=32,
        max_distance=128,
        max_positions=64,
        pad_idx=1,
    )
    key = jax.random.PRNGKey(0)
    pkey, ikey = jax.random.split(key)
    params = prepare_params(init_params(pkey, cfg), cfg)

    B, T, pred_size = 2, 16, 4
    input_ids = jax.random.randint(ikey, (B, T), 3, cfg["vocab_size"], dtype=jnp.int32)
    base_pos = jnp.arange(T - pred_size, dtype=jnp.int32)
    positions = jnp.tile(
        jnp.concatenate([base_pos, base_pos[-pred_size:]])[None, :], (B, 1))

    fwd = jax.jit(lambda p, ids, pos: mpnet_forward(p, ids, pos, pred_size, cfg))
    logits = fwd(params, input_ids, positions)
    jax.block_until_ready(logits)
    assert logits.shape == (B, pred_size, cfg["vocab_size"])
    assert bool(jnp.all(jnp.isfinite(logits)))
    print("KERNEL_OK")
</pallas_src>

<mosaic_0001>
module attributes {stable_mosaic.version = 11 : i64} {
  func.func @kernel(%arg0: i32, %arg1: i32, %arg2: i32, %arg3: memref<8x32xbf16, #tpu.memory_space<vmem>>, %arg4: memref<32x32xbf16, #tpu.memory_space<vmem>>, %arg5: memref<1x32xf32, #tpu.memory_space<vmem>>, %arg6: memref<8x32xbf16, #tpu.memory_space<vmem>>, %arg7: memref<8x32xf32, #tpu.memory_space<vmem>>) attributes {dimension_semantics = [#tpu.dimension_semantics<parallel>, #tpu.dimension_semantics<parallel>, #tpu.dimension_semantics<arbitrary>], iteration_bounds = array<i64: 1, 1, 1>, scalar_prefetch = 0 : i64, scratch_operands = 1 : i64, tpu.core_type = #tpu.core_type<tc>, window_params = [{transform_indices = @transform_0, window_bounds = array<i64: 8, 32>}, {transform_indices = @transform_1, window_bounds = array<i64: 32, 32>}, {transform_indices = @transform_2, window_bounds = array<i64: 1, 32>}, {transform_indices = @transform_3, window_bounds = array<i64: 8, 32>}]} {
    %c0_i32 = arith.constant 0 : i32
    %0 = arith.cmpi eq, %arg2, %c0_i32 : i32
    %1 = arith.extui %0 : i1 to i32
    %c0_i32_0 = arith.constant 0 : i32
    %2 = arith.cmpi ne, %1, %c0_i32_0 : i32
    scf.if %2 {
      %cst_10 = arith.constant 0.000000e+00 : f32
      %12 = vector.broadcast %cst_10 : f32 to vector<8x32xf32>
      %c0_11 = arith.constant 0 : index
      %c0_12 = arith.constant 0 : index
      %13 = vector.load %arg7[%c0_11, %c0_12] : memref<8x32xf32, #tpu.memory_space<vmem>>, vector<8x32xf32>
      tpu.vector_store %arg7[%c0_11, %c0_12], %12 {strides = array<i32>} : memref<8x32xf32, #tpu.memory_space<vmem>>, vector<8x32xf32>,
    } else {
    }
    %c0 = arith.constant 0 : index
    %c0_1 = arith.constant 0 : index
    %3 = vector.load %arg3[%c0, %c0_1] : memref<8x32xbf16, #tpu.memory_space<vmem>>, vector<8x32xbf16>
    %c0_2 = arith.constant 0 : index
    %c0_3 = arith.constant 0 : index
    %4 = vector.load %arg4[%c0_2, %c0_3] : memref<32x32xbf16, #tpu.memory_space<vmem>>, vector<32x32xbf16>
    %c0_4 = arith.constant 0 : index
    %c0_5 = arith.constant 0 : index
    %5 = vector.load %arg7[%c0_4, %c0_5] : memref<8x32xf32, #tpu.memory_space<vmem>>, vector<8x32xf32>
    %cst = arith.constant dense<0.000000e+00> : vector<8x32xf32>
    %6 = tpu.matmul %3, %4, %cst {dimension_numbers = #tpu.dot_dimension_numbers<[1], [0], [0], [1], [0, 0, 1, 1], [], []>} : vector<8x32xbf16>, vector<32x32xbf16>, vector<8x32xf32> -> vector<8x32xf32>
    %7 = arith.addf %5, %6 : vector<8x32xf32>
    %c0_6 = arith.constant 0 : index
    %c0_7 = arith.constant 0 : index
    %8 = vector.load %arg7[%c0_6, %c0_7] : memref<8x32xf32, #tpu.memory_space<vmem>>, vector<8x32xf32>
    tpu.vector_store %arg7[%c0_6, %c0_7], %7 {strides = array<i32>} : memref<8x32xf32, #tpu.memory_space<vmem>>, vector<8x32xf32>,
    %c0_i32_8 = arith.constant 0 : i32
    %9 = arith.cmpi eq, %arg2, %c0_i32_8 : i32
    %10 = arith.extui %9 : i1 to i32
    %c0_i32_9 = arith.constant 0 : i32
    %11 = arith.cmpi ne, %10, %c0_i32_9 : i32
    scf.if %11 {
      %c0_10 = arith.constant 0 : index
      %c0_11 = arith.constant 0 : index
      %12 = vector.load %arg7[%c0_10, %c0_11] : memref<8x32xf32, #tpu.memory_space<vmem>>, vector<8x32xf32>
      %c0_12 = arith.constant 0 : index
      %c0_13 = arith.constant 0 : index
      %13 = vector.load %arg5[%c0_12, %c0_13] : memref<1x32xf32, #tpu.memory_space<vmem>>, vector<1x32xf32>
      %14 = vector.broadcast %13 : vector<1x32xf32> to vector<8x32xf32>
      %15 = arith.addf %12, %14 : vector<8x32xf32>
      %16 = arith.truncf %15 : vector<8x32xf32> to vector<8x32xbf16>
      %c0_14 = arith.constant 0 : index
      %c0_15 = arith.constant 0 : index
      %17 = vector.load %arg6[%c0_14, %c0_15] : memref<8x32xbf16, #tpu.memory_space<vmem>>, vector<8x32xbf16>
      tpu.vector_store %arg6[%c0_14, %c0_15], %16 {strides = array<i32>} : memref<8x32xbf16, #tpu.memory_space<vmem>>, vector<8x32xbf16>,
    } else {
    }
    return
  }
  func.func @transform_0(%arg0: i32, %arg1: i32, %arg2: i32) -> (i32, i32) {
    %c0_i32 = arith.constant 0 : i32
    return %arg0, %arg2 : i32, i32
  }
  func.func @transform_1(%arg0: i32, %arg1: i32, %arg2: i32) -> (i32, i32) {
    %c0_i32 = arith.constant 0 : i32
    return %arg2, %arg1 : i32, i32
  }
  func.func @transform_2(%arg0: i32, %arg1: i32, %arg2: i32) -> (i32, i32) {
    %c0_i32 = arith.constant 0 : i32
    %c0_i32_0 = arith.constant 0 : i32
    return %c0_i32, %arg1 : i32, i32
  }
  func.func @transform_3(%arg0: i32, %arg1: i32, %arg2: i32) -> (i32, i32) {
    %c0_i32 = arith.constant 0 : i32
    return %arg0, %arg1 : i32, i32
  }
}

module attributes {stable_mosaic.version = 11 : i64} {
  func.func @_layernorm_kernel(%arg0: i32, %arg1: memref<8x32xbf16, #tpu.memory_space<vmem>>, %arg2: memref<1x32xf32, #tpu.memory_space<vmem>>, %arg3: memref<1x32xf32, #tpu.memory_space<vmem>>, %arg4: memref<8x32xbf16, #tpu.memory_space<vmem>>) attributes {dimension_semantics = [#tpu.dimension_semantics<parallel>], iteration_bounds = array<i64: 1>, scalar_prefetch = 0 : i64, scratch_operands = 0 : i64, tpu.core_type = #tpu.core_type<tc>, window_params = [{transform_indices = @transform_0, window_bounds = array<i64: 8, 32>}, {pipeline_mode = #tpu.pipeline_mode<synchronous>, transform_indices = @transform_1, window_bounds = array<i64: 1, 32>}, {pipeline_mode = #tpu.pipeline_mode<synchronous>, transform_indices = @transform_2, window_bounds = array<i64: 1, 32>}, {transform_indices = @transform_3, window_bounds = array<i64: 8, 32>}]} {
    %c0 = arith.constant 0 : index
    %c0_0 = arith.constant 0 : index
    %0 = vector.load %arg1[%c0, %c0_0] : memref<8x32xbf16, #tpu.memory_space<vmem>>, vector<8x32xbf16>
    %1 = arith.extf %0 : vector<8x32xbf16> to vector<8x32xf32>
    %cst = arith.constant dense<0.000000e+00> : vector<8xf32>
    %2 = vector.multi_reduction <add>, %1, %cst [1] : vector<8x32xf32> to vector<8xf32>
    %3 = vector.shape_cast %2 : vector<8xf32> to vector<8x1xf32>
    %cst_1 = arith.constant 3.200000e+01 : f32
    %4 = vector.broadcast %cst_1 : f32 to vector<8x1xf32>
    %5 = arith.divf %3, %4 : vector<8x1xf32>
    %6 = vector.broadcast %5 : vector<8x1xf32> to vector<8x32xf32>
    %7 = arith.subf %1, %6 : vector<8x32xf32>
    %8 = arith.mulf %7, %7 : vector<8x32xf32>
    %cst_2 = arith.constant dense<0.000000e+00> : vector<8xf32>
    %9 = vector.multi_reduction <add>, %8, %cst_2 [1] : vector<8x32xf32> to vector<8xf32>
    %10 = vector.shape_cast %9 : vector<8xf32> to vector<8x1xf32>
    %cst_3 = arith.constant 3.200000e+01 : f32
    %11 = vector.broadcast %cst_3 : f32 to vector<8x1xf32>
    %12 = arith.divf %10, %11 : vector<8x1xf32>
    %cst_4 = arith.constant 9.99999974E-6 : f32
    %13 = vector.broadcast %cst_4 : f32 to vector<8x1xf32>
    %14 = arith.addf %12, %13 : vector<8x1xf32>
    %15 = math.rsqrt %14 : vector<8x1xf32>
    %16 = vector.broadcast %15 : vector<8x1xf32> to vector<8x32xf32>
    %17 = arith.mulf %7, %16 : vector<8x32xf32>
    %c0_5 = arith.constant 0 : index
    %c0_6 = arith.constant 0 : index
    %18 = vector.load %arg2[%c0_5, %c0_6] : memref<1x32xf32, #tpu.memory_space<vmem>>, vector<1x32xf32>
    %19 = vector.broadcast %18 : vector<1x32xf32> to vector<8x32xf32>
    %20 = arith.mulf %17, %19 : vector<8x32xf32>
    %c0_7 = arith.constant 0 : index
    %c0_8 = arith.constant 0 : index
    %21 = vector.load %arg3[%c0_7, %c0_8] : memref<1x32xf32, #tpu.memory_space<vmem>>, vector<1x32xf32>
    %22 = vector.broadcast %21 : vector<1x32xf32> to vector<8x32xf32>
    %23 = arith.addf %20, %22 : vector<8x32xf32>
    %24 = arith.truncf %23 : vector<8x32xf32> to vector<8x32xbf16>
    %c0_9 = arith.constant 0 : index
    %c0_10 = arith.constant 0 : index
    %25 = vector.load %arg4[%c0_9, %c0_10] : memref<8x32xbf16, #tpu.memory_space<vmem>>, vector<8x32xbf16>
    tpu.vector_store %arg4[%c0_9, %c0_10], %24 {strides = array<i32>} : memref<8x32xbf16, #tpu.memory_space<vmem>>, vector<8x32xbf16>,
    return
  }
  func.func @transform_0(%arg0: i32) -> (i32, i32) {
    %c0_i32 = arith.constant 0 : i32
    %c0_i32_0 = arith.constant 0 : i32
    return %arg0, %c0_i32 : i32, i32
  }
  func.func @transform_1(%arg0: i32) -> (i32, i32) {
    %c0_i32 = arith.constant 0 : i32
    %c0_i32_0 = arith.constant 0 : i32
    %c0_i32_1 = arith.constant 0 : i32
    return %c0_i32, %c0_i32_0 : i32, i32
  }
  func.func @transform_2(%arg0: i32) -> (i32, i32) {
    %c0_i32 = arith.constant 0 : i32
    %c0_i32_0 = arith.constant 0 : i32
    %c0_i32_1 = arith.constant 0 : i32
    return %c0_i32, %c0_i32_0 : i32, i32
  }
  func.func @transform_3(%arg0: i32) -> (i32, i32) {
    %c0_i32 = arith.constant 0 : i32
    %c0_i32_0 = arith.constant 0 : i32
    return %arg0, %c0_i32 : i32, i32
  }
}

module attributes {stable_mosaic.version = 11 : i64} {
  func.func @_layernorm_kernel(%arg0: i32, %arg1: memref<24x32xbf16, #tpu.memory_space<vmem>>, %arg2: memref<1x32xf32, #tpu.memory_space<vmem>>, %arg3: memref<1x32xf32, #tpu.memory_space<vmem>>, %arg4: memref<24x32xbf16, #tpu.memory_space<vmem>>) attributes {dimension_semantics = [#tpu.dimension_semantics<parallel>], iteration_bounds = array<i64: 1>, scalar_prefetch = 0 : i64, scratch_operands = 0 : i64, tpu.core_type = #tpu.core_type<tc>, window_params = [{transform_indices = @transform_0, window_bounds = array<i64: 24, 32>}, {pipeline_mode = #tpu.pipeline_mode<synchronous>, transform_indices = @transform_1, window_bounds = array<i64: 1, 32>}, {pipeline_mode = #tpu.pipeline_mode<synchronous>, transform_indices = @transform_2, window_bounds = array<i64: 1, 32>}, {transform_indices = @transform_3, window_bounds = array<i64: 24, 32>}]} {
    %c0 = arith.constant 0 : index
    %c0_0 = arith.constant 0 : index
    %0 = vector.load %arg1[%c0, %c0_0] : memref<24x32xbf16, #tpu.memory_space<vmem>>, vector<24x32xbf16>
    %1 = arith.extf %0 : vector<24x32xbf16> to vector<24x32xf32>
    %cst = arith.constant dense<0.000000e+00> : vector<24xf32>
    %2 = vector.multi_reduction <add>, %1, %cst [1] : vector<24x32xf32> to vector<24xf32>
    %3 = vector.shape_cast %2 : vector<24xf32> to vector<24x1xf32>
    %cst_1 = arith.constant 3.200000e+01 : f32
    %4 = vector.broadcast %cst_1 : f32 to vector<24x1xf32>
    %5 = arith.divf %3, %4 : vector<24x1xf32>
    %6 = vector.broadcast %5 : vector<24x1xf32> to vector<24x32xf32>
    %7 = arith.subf %1, %6 : vector<24x32xf32>
    %8 = arith.mulf %7, %7 : vector<24x32xf32>
    %cst_2 = arith.constant dense<0.000000e+00> : vector<24xf32>
    %9 = vector.multi_reduction <add>, %8, %cst_2 [1] : vector<24x32xf32> to vector<24xf32>
    %10 = vector.shape_cast %9 : vector<24xf32> to vector<24x1xf32>
    %cst_3 = arith.constant 3.200000e+01 : f32
    %11 = vector.broadcast %cst_3 : f32 to vector<24x1xf32>
    %12 = arith.divf %10, %11 : vector<24x1xf32>
    %cst_4 = arith.constant 9.99999974E-6 : f32
    %13 = vector.broadcast %cst_4 : f32 to vector<24x1xf32>
    %14 = arith.addf %12, %13 : vector<24x1xf32>
    %15 = math.rsqrt %14 : vector<24x1xf32>
    %16 = vector.broadcast %15 : vector<24x1xf32> to vector<24x32xf32>
    %17 = arith.mulf %7, %16 : vector<24x32xf32>
    %c0_5 = arith.constant 0 : index
    %c0_6 = arith.constant 0 : index
    %18 = vector.load %arg2[%c0_5, %c0_6] : memref<1x32xf32, #tpu.memory_space<vmem>>, vector<1x32xf32>
    %19 = vector.broadcast %18 : vector<1x32xf32> to vector<24x32xf32>
    %20 = arith.mulf %17, %19 : vector<24x32xf32>
    %c0_7 = arith.constant 0 : index
    %c0_8 = arith.constant 0 : index
    %21 = vector.load %arg3[%c0_7, %c0_8] : memref<1x32xf32, #tpu.memory_space<vmem>>, vector<1x32xf32>
    %22 = vector.broadcast %21 : vector<1x32xf32> to vector<24x32xf32>
    %23 = arith.addf %20, %22 : vector<24x32xf32>
    %24 = arith.truncf %23 : vector<24x32xf32> to vector<24x32xbf16>
    %c0_9 = arith.constant 0 : index
    %c0_10 = arith.constant 0 : index
    %25 = vector.load %arg4[%c0_9, %c0_10] : memref<24x32xbf16, #tpu.memory_space<vmem>>, vector<24x32xbf16>
    tpu.vector_store %arg4[%c0_9, %c0_10], %24 {strides = array<i32>} : memref<24x32xbf16, #tpu.memory_space<vmem>>, vector<24x32xbf16>,
    return
  }
  func.func @transform_0(%arg0: i32) -> (i32, i32) {
    %c0_i32 = arith.constant 0 : i32
    %c0_i32_0 = arith.constant 0 : i32
    return %arg0, %c0_i32 : i32, i32
  }
  func.func @transform_1(%arg0: i32) -> (i32, i32) {
    %c0_i32 = arith.constant 0 : i32
    %c0_i32_0 = arith.constant 0 : i32
    %c0_i32_1 = arith.constant 0 : i32
    return %c0_i32, %c0_i32_0 : i32, i32
  }
  func.func @transform_2(%arg0: i32) -> (i32, i32) {
    %c0_i32 = arith.constant 0 : i32
    %c0_i32_0 = arith.constant 0 : i32
    %c0_i32_1 = arith.constant 0 : i32
    return %c0_i32, %c0_i32_0 : i32, i32
  }
  func.func @transform_3(%arg0: i32) -> (i32, i32) {
    %c0_i32 = arith.constant 0 : i32
    %c0_i32_0 = arith.constant 0 : i32
    return %arg0, %c0_i32 : i32, i32
  }
}

module attributes {stable_mosaic.version = 11 : i64} {
  func.func @kernel(%arg0: i32, %arg1: i32, %arg2: i32, %arg3: memref<24x32xbf16, #tpu.memory_space<vmem>>, %arg4: memref<32x96xbf16, #tpu.memory_space<vmem>>, %arg5: memref<1x96xf32, #tpu.memory_space<vmem>>, %arg6: memref<24x96xbf16, #tpu.memory_space<vmem>>, %arg7: memref<24x96xf32, #tpu.memory_space<vmem>>) attributes {dimension_semantics = [#tpu.dimension_semantics<parallel>, #tpu.dimension_semantics<parallel>, #tpu.dimension_semantics<arbitrary>], iteration_bounds = array<i64: 1, 1, 1>, scalar_prefetch = 0 : i64, scratch_operands = 1 : i64, tpu.core_type = #tpu.core_type<tc>, window_params = [{transform_indices = @transform_0, window_bounds = array<i64: 24, 32>}, {transform_indices = @transform_1, window_bounds = array<i64: 32, 96>}, {transform_indices = @transform_2, window_bounds = array<i64: 1, 96>}, {transform_indices = @transform_3, window_bounds = array<i64: 24, 96>}]} {
    %c0_i32 = arith.constant 0 : i32
    %0 = arith.cmpi eq, %arg2, %c0_i32 : i32
    %1 = arith.extui %0 : i1 to i32
    %c0_i32_0 = arith.constant 0 : i32
    %2 = arith.cmpi ne, %1, %c0_i32_0 : i32
    scf.if %2 {
      %cst_10 = arith.constant 0.000000e+00 : f32
      %12 = vector.broadcast %cst_10 : f32 to vector<24x96xf32>
      %c0_11 = arith.constant 0 : index
      %c0_12 = arith.constant 0 : index
      %13 = vector.load %arg7[%c0_11, %c0_12] : memref<24x96xf32, #tpu.memory_space<vmem>>, vector<24x96xf32>
      tpu.vector_store %arg7[%c0_11, %c0_12], %12 {strides = array<i32>} : memref<24x96xf32, #tpu.memory_space<vmem>>, vector<24x96xf32>,
    } else {
    }
    %c0 = arith.constant 0 : index
    %c0_1 = arith.constant 0 : index
    %3 = vector.load %arg3[%c0, %c0_1] : memref<24x32xbf16, #tpu.memory_space<vmem>>, vector<24x32xbf16>
    %c0_2 = arith.constant 0 : index
    %c0_3 = arith.constant 0 : index
    %4 = vector.load %arg4[%c0_2, %c0_3] : memref<32x96xbf16, #tpu.memory_space<vmem>>, vector<32x96xbf16>
    %c0_4 = arith.constant 0 : index
    %c0_5 = arith.constant 0 : index
    %5 = vector.load %arg7[%c0_4, %c0_5] : memref<24x96xf32, #tpu.memory_space<vmem>>, vector<24x96xf32>
    %cst = arith.constant dense<0.000000e+00> : vector<24x96xf32>
    %6 = tpu.matmul %3, %4, %cst {dimension_numbers = #tpu.dot_dimension_numbers<[1], [0], [0], [1], [0, 0, 1, 1], [], []>} : vector<24x32xbf16>, vector<32x96xbf16>, vector<24x96xf32> -> vector<24x96xf32>
    %7 = arith.addf %5, %6 : vector<24x96xf32>
    %c0_6 = arith.constant 0 : index
    %c0_7 = arith.constant 0 : index
    %8 = vector.load %arg7[%c0_6, %c0_7] : memref<24x96xf32, #tpu.memory_space<vmem>>, vector<24x96xf32>
    tpu.vector_store %arg7[%c0_6, %c0_7], %7 {strides = array<i32>} : memref<24x96xf32, #tpu.memory_space<vmem>>, vector<24x96xf32>,
    %c0_i32_8 = arith.constant 0 : i32
    %9 = arith.cmpi eq, %arg2, %c0_i32_8 : i32
    %10 = arith.extui %9 : i1 to i32
    %c0_i32_9 = arith.constant 0 : i32
    %11 = arith.cmpi ne, %10, %c0_i32_9 : i32
    scf.if %11 {
      %c0_10 = arith.constant 0 : index
      %c0_11 = arith.constant 0 : index
      %12 = vector.load %arg7[%c0_10, %c0_11] : memref<24x96xf32, #tpu.memory_space<vmem>>, vector<24x96xf32>
      %c0_12 = arith.constant 0 : index
      %c0_13 = arith.constant 0 : index
      %13 = vector.load %arg5[%c0_12, %c0_13] : memref<1x96xf32, #tpu.memory_space<vmem>>, vector<1x96xf32>
      %14 = vector.broadcast %13 : vector<1x96xf32> to vector<24x96xf32>
      %15 = arith.addf %12, %14 : vector<24x96xf32>
      %16 = arith.truncf %15 : vector<24x96xf32> to vector<24x96xbf16>
      %c0_14 = arith.constant 0 : index
      %c0_15 = arith.constant 0 : index
      %17 = vector.load %arg6[%c0_14, %c0_15] : memref<24x96xbf16, #tpu.memory_space<vmem>>, vector<24x96xbf16>
      tpu.vector_store %arg6[%c0_14, %c0_15], %16 {strides = array<i32>} : memref<24x96xbf16, #tpu.memory_space<vmem>>, vector<24x96xbf16>,
    } else {
    }
    return
  }
  func.func @transform_0(%arg0: i32, %arg1: i32, %arg2: i32) -> (i32, i32) {
    %c0_i32 = arith.constant 0 : i32
    return %arg0, %arg2 : i32, i32
  }
  func.func @transform_1(%arg0: i32, %arg1: i32, %arg2: i32) -> (i32, i32) {
    %c0_i32 = arith.constant 0 : i32
    return %arg2, %arg1 : i32, i32
  }
  func.func @transform_2(%arg0: i32, %arg1: i32, %arg2: i32) -> (i32, i32) {
    %c0_i32 = arith.constant 0 : i32
    %c0_i32_0 = arith.constant 0 : i32
    return %c0_i32, %arg1 : i32, i32
  }
  func.func @transform_3(%arg0: i32, %arg1: i32, %arg2: i32) -> (i32, i32) {
    %c0_i32 = arith.constant 0 : i32
    return %arg0, %arg1 : i32, i32
  }
}

module attributes {stable_mosaic.version = 11 : i64} {
  func.func @_attn_kernel(%arg0: i32, %arg1: memref<1x4x4x8xbf16, #tpu.memory_space<vmem>>, %arg2: memref<1x4x12x8xbf16, #tpu.memory_space<vmem>>, %arg3: memref<1x4x12x8xbf16, #tpu.memory_space<vmem>>, %arg4: memref<1x4x4x12xbf16, #tpu.memory_space<vmem>>, %arg5: memref<1x4x4x8xbf16, #tpu.memory_space<vmem>>) attributes {dimension_semantics = [#tpu.dimension_semantics<parallel>], iteration_bounds = array<i64: 2>, scalar_prefetch = 0 : i64, scratch_operands = 0 : i64, tpu.core_type = #tpu.core_type<tc>, window_params = [{transform_indices = @transform_0, window_bounds = array<i64: 1, 4, 4, 8>}, {transform_indices = @transform_1, window_bounds = array<i64: 1, 4, 12, 8>}, {transform_indices = @transform_2, window_bounds = array<i64: 1, 4, 12, 8>}, {transform_indices = @transform_3, window_bounds = array<i64: 1, 4, 4, 12>}, {transform_indices = @transform_4, window_bounds = array<i64: 1, 4, 4, 8>}]} {
    %c0 = arith.constant 0 : index
    %c0_0 = arith.constant 0 : index
    %c0_1 = arith.constant 0 : index
    %c0_2 = arith.constant 0 : index
    %0 = vector.load %arg1[%c0, %c0_0, %c0_1, %c0_2] : memref<1x4x4x8xbf16, #tpu.memory_space<vmem>>, vector<1x1x4x8xbf16>
    %1 = vector.shape_cast %0 : vector<1x1x4x8xbf16> to vector<4x8xbf16>
    %c0_3 = arith.constant 0 : index
    %c0_4 = arith.constant 0 : index
    %c0_5 = arith.constant 0 : index
    %c0_6 = arith.constant 0 : index
    %2 = vector.load %arg2[%c0_3, %c0_4, %c0_5, %c0_6] : memref<1x4x12x8xbf16, #tpu.memory_space<vmem>>, vector<1x1x12x8xbf16>
    %3 = vector.shape_cast %2 : vector<1x1x12x8xbf16> to vector<12x8xbf16>
    %c0_7 = arith.constant 0 : index
    %c0_8 = arith.constant 0 : index
    %c0_9 = arith.constant 0 : index
    %c0_10 = arith.constant 0 : index
    %4 = vector.load %arg3[%c0_7, %c0_8, %c0_9, %c0_10] : memref<1x4x12x8xbf16, #tpu.memory_space<vmem>>, vector<1x1x12x8xbf16>
    %5 = vector.shape_cast %4 : vector<1x1x12x8xbf16> to vector<12x8xbf16>
    %cst = arith.constant dense<0.000000e+00> : vector<4x12xf32>
    %6 = tpu.matmul %1, %3, %cst {dimension_numbers = #tpu.dot_dimension_numbers<[1], [1], [0], [0], [0, 0, 1, 0], [], []>} : vector<4x8xbf16>, vector<12x8xbf16>, vector<4x12xf32> -> vector<4x12xf32>
    %c0_11 = arith.constant 0 : index
    %c0_12 = arith.constant 0 : index
    %c0_13 = arith.constant 0 : index
    %c0_14 = arith.constant 0 : index
    %7 = vector.load %arg4[%c0_11, %c0_12, %c0_13, %c0_14] : memref<1x4x4x12xbf16, #tpu.memory_space<vmem>>, vector<1x1x4x12xbf16>
    %8 = vector.shape_cast %7 : vector<1x1x4x12xbf16> to vector<4x12xbf16>
    %9 = arith.extf %8 : vector<4x12xbf16> to vector<4x12xf32>
    %10 = arith.addf %6, %9 : vector<4x12xf32>
    %cst_15 = arith.constant dense<0xFF800000> : vector<4xf32>
    %11 = vector.multi_reduction <maximumf>, %10, %cst_15 [1] : vector<4x12xf32> to vector<4xf32>
    %12 = vector.shape_cast %11 : vector<4xf32> to vector<4x1xf32>
    %13 = vector.broadcast %12 : vector<4x1xf32> to vector<4x12xf32>
    %14 = arith.subf %10, %13 : vector<4x12xf32>
    %15 = math.exp %14 : vector<4x12xf32>
    %cst_16 = arith.constant dense<0.000000e+00> : vector<4xf32>
    %16 = vector.multi_reduction <add>, %15, %cst_16 [1] : vector<4x12xf32> to vector<4xf32>
    %17 = vector.shape_cast %16 : vector<4xf32> to vector<4x1xf32>
    %18 = tpu.reciprocal %17 {approx = true} : vector<4x1xf32> -> vector<4x1xf32>
    %19 = vector.broadcast %18 : vector<4x1xf32> to vector<4x12xf32>
    %20 = arith.mulf %15, %19 : vector<4x12xf32>
    %21 = arith.truncf %20 : vector<4x12xf32> to vector<4x12xbf16>
    %cst_17 = arith.constant dense<0.000000e+00> : vector<4x8xf32>
    %22 = tpu.matmul %21, %5, %cst_17 {dimension_numbers = #tpu.dot_dimension_numbers<[1], [0], [0], [1], [0, 0, 1, 1], [], []>} : vector<4x12xbf16>, vector<12x8xbf16>, vector<4x8xf32> -> vector<4x8xf32>
    %23 = arith.truncf %22 : vector<4x8xf32> to vector<4x8xbf16>
    %c0_18 = arith.constant 0 : index
    %c0_19 = arith.constant 0 : index
    %c0_20 = arith.constant 0 : index
    %c0_21 = arith.constant 0 : index
    %24 = vector.load %arg5[%c0_18, %c0_19, %c0_20, %c0_21] : memref<1x4x4x8xbf16, #tpu.memory_space<vmem>>, vector<1x1x4x8xbf16>
    %25 = vector.shape_cast %24 : vector<1x1x4x8xbf16> to vector<4x8xbf16>
    %26 = vector.shape_cast %23 : vector<4x8xbf16> to vector<1x1x4x8xbf16>
    tpu.vector_store %arg5[%c0_18, %c0_19, %c0_20, %c0_21], %26 {strides = array<i32>} : memref<1x4x4x8xbf16, #tpu.memory_space<vmem>>, vector<1x1x4x8xbf16>,
    %c0_22 = arith.constant 0 : index
    %c1 = arith.constant 1 : index
    %c0_23 = arith.constant 0 : index
    %c0_24 = arith.constant 0 : index
    %27 = vector.load %arg1[%c0_22, %c1, %c0_23, %c0_24] : memref<1x4x4x8xbf16, #tpu.memory_space<vmem>>, vector<1x1x4x8xbf16>
    %28 = vector.shape_cast %27 : vector<1x1x4x8xbf16> to vector<4x8xbf16>
    %c0_25 = arith.constant 0 : index
    %c1_26 = arith.constant 1 : index
    %c0_27 = arith.constant 0 : index
    %c0_28 = arith.constant 0 : index
    %29 = vector.load %arg2[%c0_25, %c1_26, %c0_27, %c0_28] : memref<1x4x12x8xbf16, #tpu.memory_space<vmem>>, vector<1x1x12x8xbf16>
    %30 = vector.shape_cast %29 : vector<1x1x12x8xbf16> to vector<12x8xbf16>
    %c0_29 = arith.constant 0 : index
    %c1_30 = arith.constant 1 : index
    %c0_31 = arith.constant 0 : index
    %c0_32 = arith.constant 0 : index
    %31 = vector.load %arg3[%c0_29, %c1_30, %c0_31, %c0_32] : memref<1x4x12x8xbf16, #tpu.memory_space<vmem>>, vector<1x1x12x8xbf16>
    %32 = vector.shape_cast %31 : vector<1x1x12x8xbf16> to vector<12x8xbf16>
    %cst_33 = arith.constant dense<0.000000e+00> : vector<4x12xf32>
    %33 = tpu.matmul %28, %30, %cst_33 {dimension_numbers = #tpu.dot_dimension_numbers<[1], [1], [0], [0], [0, 0, 1, 0], [], []>} : vector<4x8xbf16>, vector<12x8xbf16>, vector<4x12xf32> -> vector<4x12xf32>
    %c0_34 = arith.constant 0 : index
    %c1_35 = arith.constant 1 : index
    %c0_36 = arith.constant 0 : index
    %c0_37 = arith.constant 0 : index
    %34 = vector.load %arg4[%c0_34, %c1_35, %c0_36, %c0_37] : memref<1x4x4x12xbf16, #tpu.memory_space<vmem>>, vector<1x1x4x12xbf16>
    %35 = vector.shape_cast %34 : vector<1x1x4x12xbf16> to vector<4x12xbf16>
    %36 = arith.extf %35 : vector<4x12xbf16> to vector<4x12xf32>
    %37 = arith.addf %33, %36 : vector<4x12xf32>
    %cst_38 = arith.constant dense<0xFF800000> : vector<4xf32>
    %38 = vector.multi_reduction <maximumf>, %37, %cst_38 [1] : vector<4x12xf32> to vector<4xf32>
    %39 = vector.shape_cast %38 : vector<4xf32> to vector<4x1xf32>
    %40 = vector.broadcast %39 : vector<4x1xf32> to vector<4x12xf32>
    %41 = arith.subf %37, %40 : vector<4x12xf32>
    %42 = math.exp %41 : vector<4x12xf32>
    %cst_39 = arith.constant dense<0.000000e+00> : vector<4xf32>
    %43 = vector.multi_reduction <add>, %42, %cst_39 [1] : vector<4x12xf32> to vector<4xf32>
    %44 = vector.shape_cast %43 : vector<4xf32> to vector<4x1xf32>
    %45 = tpu.reciprocal %44 {approx = true} : vector<4x1xf32> -> vector<4x1xf32>
    %46 = vector.broadcast %45 : vector<4x1xf32> to vector<4x12xf32>
    %47 = arith.mulf %42, %46 : vector<4x12xf32>
    %48 = arith.truncf %47 : vector<4x12xf32> to vector<4x12xbf16>
    %cst_40 = arith.constant dense<0.000000e+00> : vector<4x8xf32>
    %49 = tpu.matmul %48, %32, %cst_40 {dimension_numbers = #tpu.dot_dimension_numbers<[1], [0], [0], [1], [0, 0, 1, 1], [], []>} : vector<4x12xbf16>, vector<12x8xbf16>, vector<4x8xf32> -> vector<4x8xf32>
    %50 = arith.truncf %49 : vector<4x8xf32> to vector<4x8xbf16>
    %c0_41 = arith.constant 0 : index
    %c1_42 = arith.constant 1 : index
    %c0_43 = arith.constant 0 : index
    %c0_44 = arith.constant 0 : index
    %51 = vector.load %arg5[%c0_41, %c1_42, %c0_43, %c0_44] : memref<1x4x4x8xbf16, #tpu.memory_space<vmem>>, vector<1x1x4x8xbf16>
    %52 = vector.shape_cast %51 : vector<1x1x4x8xbf16> to vector<4x8xbf16>
    %53 = vector.shape_cast %50 : vector<4x8xbf16> to vector<1x1x4x8xbf16>
    tpu.vector_store %arg5[%c0_41, %c1_42, %c0_43, %c0_44], %53 {strides = array<i32>} : memref<1x4x4x8xbf16, #tpu.memory_space<vmem>>, vector<1x1x4x8xbf16>,
    %c0_45 = arith.constant 0 : index
    %c2 = arith.constant 2 : index
    %c0_46 = arith.constant 0 : index
    %c0_47 = arith.constant 0 : index
    %54 = vector.load %arg1[%c0_45, %c2, %c0_46, %c0_47] : memref<1x4x4x8xbf16, #tpu.memory_space<vmem>>, vector<1x1x4x8xbf16>
    %55 = vector.shape_cast %54 : vector<1x1x4x8xbf16> to vector<4x8xbf16>
    %c0_48 = arith.constant 0 : index
    %c2_49 = arith.constant 2 : index
    %c0_50 = arith.constant 0 : index
    %c0_51 = arith.constant 0 : index
    %56 = vector.load %arg2[%c0_48, %c2_49, %c0_50, %c0_51] : memref<1x4x12x8xbf16, #tpu.memory_space<vmem>>, vector<1x1x12x8xbf16>
    %57 = vector.shape_cast %56 : vector<1x1x12x8xbf16> to vector<12x8xbf16>
    %c0_52 = arith.constant 0 : index
    %c2_53 = arith.constant 2 : index
    %c0_54 = arith.constant 0 : index
    %c0_55 = arith.constant 0 : index
    %58 = vector.load %arg3[%c0_52, %c2_53, %c0_54, %c0_55] : memref<1x4x12x8xbf16, #tpu.memory_space<vmem>>, vector<1x1x12x8xbf16>
    %59 = vector.shape_cast %58 : vector<1x1x12x8xbf16> to vector<12x8xbf16>
    %cst_56 = arith.constant dense<0.000000e+00> : vector<4x12xf32>
    %60 = tpu.matmul %55, %57, %cst_56 {dimension_numbers = #tpu.dot_dimension_numbers<[1], [1], [0], [0], [0, 0, 1, 0], [], []>} : vector<4x8xbf16>, vector<12x8xbf16>, vector<4x12xf32> -> vector<4x12xf32>
    %c0_57 = arith.constant 0 : index
    %c2_58 = arith.constant 2 : index
    %c0_59 = arith.constant 0 : index
    %c0_60 = arith.constant 0 : index
    %61 = vector.load %arg4[%c0_57, %c2_58, %c0_59, %c0_60] : memref<1x4x4x12xbf16, #tpu.memory_space<vmem>>, vector<1x1x4x12xbf16>
    %62 = vector.shape_cast %61 : vector<1x1x4x12xbf16> to vector<4x12xbf16>
    %63 = arith.extf %62 : vector<4x12xbf16> to vector<4x12xf32>
    %64 = arith.addf %60, %63 : vector<4x12xf32>
    %cst_61 = arith.constant dense<0xFF800000> : vector<4xf32>
    %65 = vector.multi_reduction <maximumf>, %64, %cst_61 [1] : vector<4x12xf32> to vector<4xf32>
    %66 = vector.shape_cast %65 : vector<4xf32> to vector<4x1xf32>
    %67 = vector.broadcast %66 : vector<4x1xf32> to vector<4x12xf32>
    %68 = arith.subf %64, %67 : vector<4x12xf32>
    %69 = math.exp %68 : vector<4x12xf32>
    %cst_62 = arith.constant dense<0.000000e+00> : vector<4xf32>
    %70 = vector.multi_reduction <add>, %69, %cst_62 [1] : vector<4x12xf32> to vector<4xf32>
    %71 = vector.shape_cast %70 : vector<4xf32> to vector<4x1xf32>
    %72 = tpu.reciprocal %71 {approx = true} : vector<4x1xf32> -> vector<4x1xf32>
    %73 = vector.broadcast %72 : vector<4x1xf32> to vector<4x12xf32>
    %74 = arith.mulf %69, %73 : vector<4x12xf32>
    %75 = arith.truncf %74 : vector<4x12xf32> to vector<4x12xbf16>
    %cst_63 = arith.constant dense<0.000000e+00> : vector<4x8xf32>
    %76 = tpu.matmul %75, %59, %cst_63 {dimension_numbers = #tpu.dot_dimension_numbers<[1], [0], [0], [1], [0, 0, 1, 1], [], []>} : vector<4x12xbf16>, vector<12x8xbf16>, vector<4x8xf32> -> vector<4x8xf32>
    %77 = arith.truncf %76 : vector<4x8xf32> to vector<4x8xbf16>
    %c0_64 = arith.constant 0 : index
    %c2_65 = arith.constant 2 : index
    %c0_66 = arith.constant 0 : index
    %c0_67 = arith.constant 0 : index
    %78 = vector.load %arg5[%c0_64, %c2_65, %c0_66, %c0_67] : memref<1x4x4x8xbf16, #tpu.memory_space<vmem>>, vector<1x1x4x8xbf16>
    %79 = vector.shape_cast %78 : vector<1x1x4x8xbf16> to vector<4x8xbf16>
    %80 = vector.shape_cast %77 : vector<4x8xbf16> to vector<1x1x4x8xbf16>
    tpu.vector_store %arg5[%c0_64, %c2_65, %c0_66, %c0_67], %80 {strides = array<i32>} : memref<1x4x4x8xbf16, #tpu.memory_space<vmem>>, vector<1x1x4x8xbf16>,
    %c0_68 = arith.constant 0 : index
    %c3 = arith.constant 3 : index
    %c0_69 = arith.constant 0 : index
    %c0_70 = arith.constant 0 : index
    %81 = vector.load %arg1[%c0_68, %c3, %c0_69, %c0_70] : memref<1x4x4x8xbf16, #tpu.memory_space<vmem>>, vector<1x1x4x8xbf16>
    %82 = vector.shape_cast %81 : vector<1x1x4x8xbf16> to vector<4x8xbf16>
    %c0_71 = arith.constant 0 : index
    %c3_72 = arith.constant 3 : index
    %c0_73 = arith.constant 0 : index
    %c0_74 = arith.constant 0 : index
    %83 = vector.load %arg2[%c0_71, %c3_72, %c0_73, %c0_74] : memref<1x4x12x8xbf16, #tpu.memory_space<vmem>>, vector<1x1x12x8xbf16>
    %84 = vector.shape_cast %83 : vector<1x1x12x8xbf16> to vector<12x8xbf16>
    %c0_75 = arith.constant 0 : index
    %c3_76 = arith.constant 3 : index
    %c0_77 = arith.constant 0 : index
    %c0_78 = arith.constant 0 : index
    %85 = vector.load %arg3[%c0_75, %c3_76, %c0_77, %c0_78] : memref<1x4x12x8xbf16, #tpu.memory_space<vmem>>, vector<1x1x12x8xbf16>
    %86 = vector.shape_cast %85 : vector<1x1x12x8xbf16> to vector<12x8xbf16>
    %cst_79 = arith.constant dense<0.000000e+00> : vector<4x12xf32>
    %87 = tpu.matmul %82, %84, %cst_79 {dimension_numbers = #tpu.dot_dimension_numbers<[1], [1], [0], [0], [0, 0, 1, 0], [], []>} : vector<4x8xbf16>, vector<12x8xbf16>, vector<4x12xf32> -> vector<4x12xf32>
    %c0_80 = arith.constant 0 : index
    %c3_81 = arith.constant 3 : index
    %c0_82 = arith.constant 0 : index
    %c0_83 = arith.constant 0 : index
    %88 = vector.load %arg4[%c0_80, %c3_81, %c0_82, %c0_83] : memref<1x4x4x12xbf16, #tpu.memory_space<vmem>>, vector<1x1x4x12xbf16>
    %89 = vector.shape_cast %88 : vector<1x1x4x12xbf16> to vector<4x12xbf16>
    %90 = arith.extf %89 : vector<4x12xbf16> to vector<4x12xf32>
    %91 = arith.addf %87, %90 : vector<4x12xf32>
    %cst_84 = arith.constant dense<0xFF800000> : vector<4xf32>
    %92 = vector.multi_reduction <maximumf>, %91, %cst_84 [1] : vector<4x12xf32> to vector<4xf32>
    %93 = vector.shape_cast %92 : vector<4xf32> to vector<4x1xf32>
    %94 = vector.broadcast %93 : vector<4x1xf32> to vector<4x12xf32>
    %95 = arith.subf %91, %94 : vector<4x12xf32>
    %96 = math.exp %95 : vector<4x12xf32>
    %cst_85 = arith.constant dense<0.000000e+00> : vector<4xf32>
    %97 = vector.multi_reduction <add>, %96, %cst_85 [1] : vector<4x12xf32> to vector<4xf32>
    %98 = vector.shape_cast %97 : vector<4xf32> to vector<4x1xf32>
    %99 = tpu.reciprocal %98 {approx = true} : vector<4x1xf32> -> vector<4x1xf32>
    %100 = vector.broadcast %99 : vector<4x1xf32> to vector<4x12xf32>
    %101 = arith.mulf %96, %100 : vector<4x12xf32>
    %102 = arith.truncf %101 : vector<4x12xf32> to vector<4x12xbf16>
    %cst_86 = arith.constant dense<0.000000e+00> : vector<4x8xf32>
    %103 = tpu.matmul %102, %86, %cst_86 {dimension_numbers = #tpu.dot_dimension_numbers<[1], [0], [0], [1], [0, 0, 1, 1], [], []>} : vector<4x12xbf16>, vector<12x8xbf16>, vector<4x8xf32> -> vector<4x8xf32>
    %104 = arith.truncf %103 : vector<4x8xf32> to vector<4x8xbf16>
    %c0_87 = arith.constant 0 : index
    %c3_88 = arith.constant 3 : index
    %c0_89 = arith.constant 0 : index
    %c0_90 = arith.constant 0 : index
    %105 = vector.load %arg5[%c0_87, %c3_88, %c0_89, %c0_90] : memref<1x4x4x8xbf16, #tpu.memory_space<vmem>>, vector<1x1x4x8xbf16>
    %106 = vector.shape_cast %105 : vector<1x1x4x8xbf16> to vector<4x8xbf16>
    %107 = vector.shape_cast %104 : vector<4x8xbf16> to vector<1x1x4x8xbf16>
    tpu.vector_store %arg5[%c0_87, %c3_88, %c0_89, %c0_90], %107 {strides = array<i32>} : memref<1x4x4x8xbf16, #tpu.memory_space<vmem>>, vector<1x1x4x8xbf16>,
    return
  }
  func.func @transform_0(%arg0: i32) -> (i32, i32, i32, i32) {
    %c0_i32 = arith.constant 0 : i32
    %c0_i32_0 = arith.constant 0 : i32
    %c0_i32_1 = arith.constant 0 : i32
    %c0_i32_2 = arith.constant 0 : i32
    return %arg0, %c0_i32, %c0_i32_0, %c0_i32_1 : i32, i32, i32, i32
  }
  func.func @transform_1(%arg0: i32) -> (i32, i32, i32, i32) {
    %c0_i32 = arith.constant 0 : i32
    %c0_i32_0 = arith.constant 0 : i32
    %c0_i32_1 = arith.constant 0 : i32
    %c0_i32_2 = arith.constant 0 : i32
    return %arg0, %c0_i32, %c0_i32_0, %c0_i32_1 : i32, i32, i32, i32
  }
  func.func @transform_2(%arg0: i32) -> (i32, i32, i32, i32) {
    %c0_i32 = arith.constant 0 : i32
    %c0_i32_0 = arith.constant 0 : i32
    %c0_i32_1 = arith.constant 0 : i32
    %c0_i32_2 = arith.constant 0 : i32
    return %arg0, %c0_i32, %c0_i32_0, %c0_i32_1 : i32, i32, i32, i32
  }
  func.func @transform_3(%arg0: i32) -> (i32, i32, i32, i32) {
    %c0_i32 = arith.constant 0 : i32
    %c0_i32_0 = arith.constant 0 : i32
    %c0_i32_1 = arith.constant 0 : i32
    %c0_i32_2 = arith.constant 0 : i32
    return %arg0, %c0_i32, %c0_i32_0, %c0_i32_1 : i32, i32, i32, i32
  }
  func.func @transform_4(%arg0: i32) -> (i32, i32, i32, i32) {
    %c0_i32 = arith.constant 0 : i32
    %c0_i32_0 = arith.constant 0 : i32
    %c0_i32_1 = arith.constant 0 : i32
    %c0_i32_2 = arith.constant 0 : i32
    return %arg0, %c0_i32, %c0_i32_0, %c0_i32_1 : i32, i32, i32, i32
  }
}

module attributes {stable_mosaic.version = 11 : i64} {
  func.func @kernel(%arg0: i32, %arg1: i32, %arg2: i32, %arg3: memref<8x64xbf16, #tpu.memory_space<vmem>>, %arg4: memref<64x32xbf16, #tpu.memory_space<vmem>>, %arg5: memref<1x32xf32, #tpu.memory_space<vmem>>, %arg6: memref<8x32xbf16, #tpu.memory_space<vmem>>, %arg7: memref<8x32xf32, #tpu.memory_space<vmem>>) attributes {dimension_semantics = [#tpu.dimension_semantics<parallel>, #tpu.dimension_semantics<parallel>, #tpu.dimension_semantics<arbitrary>], iteration_bounds = array<i64: 1, 1, 1>, scalar_prefetch = 0 : i64, scratch_operands = 1 : i64, tpu.core_type = #tpu.core_type<tc>, window_params = [{transform_indices = @transform_0, window_bounds = array<i64: 8, 64>}, {transform_indices = @transform_1, window_bounds = array<i64: 64, 32>}, {transform_indices = @transform_2, window_bounds = array<i64: 1, 32>}, {transform_indices = @transform_3, window_bounds = array<i64: 8, 32>}]} {
    %c0_i32 = arith.constant 0 : i32
    %0 = arith.cmpi eq, %arg2, %c0_i32 : i32
    %1 = arith.extui %0 : i1 to i32
    %c0_i32_0 = arith.constant 0 : i32
    %2 = arith.cmpi ne, %1, %c0_i32_0 : i32
    scf.if %2 {
      %cst_10 = arith.constant 0.000000e+00 : f32
      %12 = vector.broadcast %cst_10 : f32 to vector<8x32xf32>
      %c0_11 = arith.constant 0 : index
      %c0_12 = arith.constant 0 : index
      %13 = vector.load %arg7[%c0_11, %c0_12] : memref<8x32xf32, #tpu.memory_space<vmem>>, vector<8x32xf32>
      tpu.vector_store %arg7[%c0_11, %c0_12], %12 {strides = array<i32>} : memref<8x32xf32, #tpu.memory_space<vmem>>, vector<8x32xf32>,
    } else {
    }
    %c0 = arith.constant 0 : index
    %c0_1 = arith.constant 0 : index
    %3 = vector.load %arg3[%c0, %c0_1] : memref<8x64xbf16, #tpu.memory_space<vmem>>, vector<8x64xbf16>
    %c0_2 = arith.constant 0 : index
    %c0_3 = arith.constant 0 : index
    %4 = vector.load %arg4[%c0_2, %c0_3] : memref<64x32xbf16, #tpu.memory_space<vmem>>, vector<64x32xbf16>
    %c0_4 = arith.constant 0 : index
    %c0_5 = arith.constant 0 : index
    %5 = vector.load %arg7[%c0_4, %c0_5] : memref<8x32xf32, #tpu.memory_space<vmem>>, vector<8x32xf32>
    %cst = arith.constant dense<0.000000e+00> : vector<8x32xf32>
    %6 = tpu.matmul %3, %4, %cst {dimension_numbers = #tpu.dot_dimension_numbers<[1], [0], [0], [1], [0, 0, 1, 1], [], []>} : vector<8x64xbf16>, vector<64x32xbf16>, vector<8x32xf32> -> vector<8x32xf32>
    %7 = arith.addf %5, %6 : vector<8x32xf32>
    %c0_6 = arith.constant 0 : index
    %c0_7 = arith.constant 0 : index
    %8 = vector.load %arg7[%c0_6, %c0_7] : memref<8x32xf32, #tpu.memory_space<vmem>>, vector<8x32xf32>
    tpu.vector_store %arg7[%c0_6, %c0_7], %7 {strides = array<i32>} : memref<8x32xf32, #tpu.memory_space<vmem>>, vector<8x32xf32>,
    %c0_i32_8 = arith.constant 0 : i32
    %9 = arith.cmpi eq, %arg2, %c0_i32_8 : i32
    %10 = arith.extui %9 : i1 to i32
    %c0_i32_9 = arith.constant 0 : i32
    %11 = arith.cmpi ne, %10, %c0_i32_9 : i32
    scf.if %11 {
      %c0_10 = arith.constant 0 : index
      %c0_11 = arith.constant 0 : index
      %12 = vector.load %arg7[%c0_10, %c0_11] : memref<8x32xf32, #tpu.memory_space<vmem>>, vector<8x32xf32>
      %c0_12 = arith.constant 0 : index
      %c0_13 = arith.constant 0 : index
      %13 = vector.load %arg5[%c0_12, %c0_13] : memref<1x32xf32, #tpu.memory_space<vmem>>, vector<1x32xf32>
      %14 = vector.broadcast %13 : vector<1x32xf32> to vector<8x32xf32>
      %15 = arith.addf %12, %14 : vector<8x32xf32>
      %16 = arith.truncf %15 : vector<8x32xf32> to vector<8x32xbf16>
      %c0_14 = arith.constant 0 : index
      %c0_15 = arith.constant 0 : index
      %17 = vector.load %arg6[%c0_14, %c0_15] : memref<8x32xbf16, #tpu.memory_space<vmem>>, vector<8x32xbf16>
      tpu.vector_store %arg6[%c0_14, %c0_15], %16 {strides = array<i32>} : memref<8x32xbf16, #tpu.memory_space<vmem>>, vector<8x32xbf16>,
    } else {
    }
    return
  }
  func.func @transform_0(%arg0: i32, %arg1: i32, %arg2: i32) -> (i32, i32) {
    %c0_i32 = arith.constant 0 : i32
    return %arg0, %arg2 : i32, i32
  }
  func.func @transform_1(%arg0: i32, %arg1: i32, %arg2: i32) -> (i32, i32) {
    %c0_i32 = arith.constant 0 : i32
    return %arg2, %arg1 : i32, i32
  }
  func.func @transform_2(%arg0: i32, %arg1: i32, %arg2: i32) -> (i32, i32) {
    %c0_i32 = arith.constant 0 : i32
    %c0_i32_0 = arith.constant 0 : i32
    return %c0_i32, %arg1 : i32, i32
  }
  func.func @transform_3(%arg0: i32, %arg1: i32, %arg2: i32) -> (i32, i32) {
    %c0_i32 = arith.constant 0 : i32
    return %arg0, %arg1 : i32, i32
  }
}

module attributes {stable_mosaic.version = 11 : i64} {
  func.func @kernel(%arg0: i32, %arg1: i32, %arg2: i32, %arg3: memref<8x32xbf16, #tpu.memory_space<vmem>>, %arg4: memref<32x64xbf16, #tpu.memory_space<vmem>>, %arg5: memref<1x64xf32, #tpu.memory_space<vmem>>, %arg6: memref<8x64xbf16, #tpu.memory_space<vmem>>, %arg7: memref<8x64xf32, #tpu.memory_space<vmem>>) attributes {dimension_semantics = [#tpu.dimension_semantics<parallel>, #tpu.dimension_semantics<parallel>, #tpu.dimension_semantics<arbitrary>], iteration_bounds = array<i64: 1, 1, 1>, scalar_prefetch = 0 : i64, scratch_operands = 1 : i64, tpu.core_type = #tpu.core_type<tc>, window_params = [{transform_indices = @transform_0, window_bounds = array<i64: 8, 32>}, {transform_indices = @transform_1, window_bounds = array<i64: 32, 64>}, {transform_indices = @transform_2, window_bounds = array<i64: 1, 64>}, {transform_indices = @transform_3, window_bounds = array<i64: 8, 64>}]} {
    %c0_i32 = arith.constant 0 : i32
    %0 = arith.cmpi eq, %arg2, %c0_i32 : i32
    %1 = arith.extui %0 : i1 to i32
    %c0_i32_0 = arith.constant 0 : i32
    %2 = arith.cmpi ne, %1, %c0_i32_0 : i32
    scf.if %2 {
      %cst_10 = arith.constant 0.000000e+00 : f32
      %12 = vector.broadcast %cst_10 : f32 to vector<8x64xf32>
      %c0_11 = arith.constant 0 : index
      %c0_12 = arith.constant 0 : index
      %13 = vector.load %arg7[%c0_11, %c0_12] : memref<8x64xf32, #tpu.memory_space<vmem>>, vector<8x64xf32>
      tpu.vector_store %arg7[%c0_11, %c0_12], %12 {strides = array<i32>} : memref<8x64xf32, #tpu.memory_space<vmem>>, vector<8x64xf32>,
    } else {
    }
    %c0 = arith.constant 0 : index
    %c0_1 = arith.constant 0 : index
    %3 = vector.load %arg3[%c0, %c0_1] : memref<8x32xbf16, #tpu.memory_space<vmem>>, vector<8x32xbf16>
    %c0_2 = arith.constant 0 : index
    %c0_3 = arith.constant 0 : index
    %4 = vector.load %arg4[%c0_2, %c0_3] : memref<32x64xbf16, #tpu.memory_space<vmem>>, vector<32x64xbf16>
    %c0_4 = arith.constant 0 : index
    %c0_5 = arith.constant 0 : index
    %5 = vector.load %arg7[%c0_4, %c0_5] : memref<8x64xf32, #tpu.memory_space<vmem>>, vector<8x64xf32>
    %cst = arith.constant dense<0.000000e+00> : vector<8x64xf32>
    %6 = tpu.matmul %3, %4, %cst {dimension_numbers = #tpu.dot_dimension_numbers<[1], [0], [0], [1], [0, 0, 1, 1], [], []>} : vector<8x32xbf16>, vector<32x64xbf16>, vector<8x64xf32> -> vector<8x64xf32>
    %7 = arith.addf %5, %6 : vector<8x64xf32>
    %c0_6 = arith.constant 0 : index
    %c0_7 = arith.constant 0 : index
    %8 = vector.load %arg7[%c0_6, %c0_7] : memref<8x64xf32, #tpu.memory_space<vmem>>, vector<8x64xf32>
    tpu.vector_store %arg7[%c0_6, %c0_7], %7 {strides = array<i32>} : memref<8x64xf32, #tpu.memory_space<vmem>>, vector<8x64xf32>,
    %c0_i32_8 = arith.constant 0 : i32
    %9 = arith.cmpi eq, %arg2, %c0_i32_8 : i32
    %10 = arith.extui %9 : i1 to i32
    %c0_i32_9 = arith.constant 0 : i32
    %11 = arith.cmpi ne, %10, %c0_i32_9 : i32
    scf.if %11 {
      %c0_10 = arith.constant 0 : index
      %c0_11 = arith.constant 0 : index
      %12 = vector.load %arg7[%c0_10, %c0_11] : memref<8x64xf32, #tpu.memory_space<vmem>>, vector<8x64xf32>
      %c0_12 = arith.constant 0 : index
      %c0_13 = arith.constant 0 : index
      %13 = vector.load %arg5[%c0_12, %c0_13] : memref<1x64xf32, #tpu.memory_space<vmem>>, vector<1x64xf32>
      %14 = vector.broadcast %13 : vector<1x64xf32> to vector<8x64xf32>
      %15 = arith.addf %12, %14 : vector<8x64xf32>
      %cst_14 = arith.constant 5.000000e-01 : f32
      %16 = vector.broadcast %cst_14 : f32 to vector<8x64xf32>
      %17 = arith.mulf %16, %15 : vector<8x64xf32>
      %cst_15 = arith.constant 0.707106769 : f32
      %18 = vector.broadcast %cst_15 : f32 to vector<8x64xf32>
      %19 = arith.mulf %15, %18 : vector<8x64xf32>
      %cst_16 = arith.constant 0.000000e+00 : f32
      %20 = vector.broadcast %cst_16 : f32 to vector<8x64xf32>
      %21 = arith.cmpf olt, %19, %20 : vector<8x64xf32>
      %cst_17 = arith.constant -1.000000e+00 : f32
      %cst_18 = arith.constant 1.000000e+00 : f32
      %22 = vector.broadcast %cst_17 : f32 to vector<8x64xf32>
      %23 = vector.broadcast %cst_18 : f32 to vector<8x64xf32>
      %24 = arith.select %21, %22, %23 : vector<8x64xi1>, vector<8x64xf32>
      %25 = math.absf %19 : vector<8x64xf32>
      %cst_19 = arith.constant 0.327591091 : f32
      %26 = vector.broadcast %cst_19 : f32 to vector<8x64xf32>
      %27 = arith.mulf %26, %25 : vector<8x64xf32>
      %cst_20 = arith.constant 1.000000e+00 : f32
      %28 = vector.broadcast %cst_20 : f32 to vector<8x64xf32>
      %29 = arith.addf %28, %27 : vector<8x64xf32>
      %cst_21 = arith.constant 1.000000e+00 : f32
      %30 = vector.broadcast %cst_21 : f32 to vector<8x64xf32>
      %31 = arith.divf %30, %29 : vector<8x64xf32>
      %cst_22 = arith.constant 1.06140542 : f32
      %32 = vector.broadcast %cst_22 : f32 to vector<8x64xf32>
      %33 = arith.mulf %32, %31 : vector<8x64xf32>
      %cst_23 = arith.constant -1.45315206 : f32
      %34 = vector.broadcast %cst_23 : f32 to vector<8x64xf32>
      %35 = arith.addf %33, %34 : vector<8x64xf32>
      %36 = arith.mulf %35, %31 : vector<8x64xf32>
      %cst_24 = arith.constant 1.42141378 : f32
      %37 = vector.broadcast %cst_24 : f32 to vector<8x64xf32>
      %38 = arith.addf %36, %37 : vector<8x64xf32>
      %39 = arith.mulf %38, %31 : vector<8x64xf32>
      %cst_25 = arith.constant -0.284496725 : f32
      %40 = vector.broadcast %cst_25 : f32 to vector<8x64xf32>
      %41 = arith.addf %39, %40 : vector<8x64xf32>
      %42 = arith.mulf %41, %31 : vector<8x64xf32>
      %cst_26 = arith.constant 0.254829586 : f32
      %43 = vector.broadcast %cst_26 : f32 to vector<8x64xf32>
      %44 = arith.addf %42, %43 : vector<8x64xf32>
      %45 = arith.mulf %44, %31 : vector<8x64xf32>
      %cst_27 = arith.constant 0.000000e+00 : f32
      %46 = vector.broadcast %cst_27 : f32 to vector<8x64xf32>
      %47 = arith.subf %46, %25 : vector<8x64xf32>
      %48 = arith.mulf %47, %25 : vector<8x64xf32>
      %49 = math.exp %48 : vector<8x64xf32>
      %50 = arith.mulf %45, %49 : vector<8x64xf32>
      %cst_28 = arith.constant 1.000000e+00 : f32
      %51 = vector.broadcast %cst_28 : f32 to vector<8x64xf32>
      %52 = arith.subf %51, %50 : vector<8x64xf32>
      %53 = arith.mulf %24, %52 : vector<8x64xf32>
      %cst_29 = arith.constant 1.000000e+00 : f32
      %54 = vector.broadcast %cst_29 : f32 to vector<8x64xf32>
      %55 = arith.addf %54, %53 : vector<8x64xf32>
      %56 = arith.mulf %17, %55 : vector<8x64xf32>
      %57 = arith.truncf %56 : vector<8x64xf32> to vector<8x64xbf16>
      %c0_30 = arith.constant 0 : index
      %c0_31 = arith.constant 0 : index
      %58 = vector.load %arg6[%c0_30, %c0_31] : memref<8x64xbf16, #tpu.memory_space<vmem>>, vector<8x64xbf16>
      tpu.vector_store %arg6[%c0_30, %c0_31], %57 {strides = array<i32>} : memref<8x64xbf16, #tpu.memory_space<vmem>>, vector<8x64xbf16>,
    } else {
    }
    return
  }
  func.func @transform_0(%arg0: i32, %arg1: i32, %arg2: i32) -> (i32, i32) {
    %c0_i32 = arith.constant 0 : i32
    return %arg0, %arg2 : i32, i32
  }
  func.func @transform_1(%arg0: i32, %arg1: i32, %arg2: i32) -> (i32, i32) {
    %c0_i32 = arith.constant 0 : i32
    return %arg2, %arg1 : i32, i32
  }
  func.func @transform_2(%arg0: i32, %arg1: i32, %arg2: i32) -> (i32, i32) {
    %c0_i32 = arith.constant 0 : i32
    %c0_i32_0 = arith.constant 0 : i32
    return %c0_i32, %arg1 : i32, i32
  }
  func.func @transform_3(%arg0: i32, %arg1: i32, %arg2: i32) -> (i32, i32) {
    %c0_i32 = arith.constant 0 : i32
    return %arg0, %arg1 : i32, i32
  }
}

module attributes {stable_mosaic.version = 11 : i64} {
  func.func @kernel(%arg0: i32, %arg1: i32, %arg2: i32, %arg3: memref<24x32xbf16, #tpu.memory_space<vmem>>, %arg4: memref<32x32xbf16, #tpu.memory_space<vmem>>, %arg5: memref<1x32xf32, #tpu.memory_space<vmem>>, %arg6: memref<24x32xbf16, #tpu.memory_space<vmem>>, %arg7: memref<24x32xf32, #tpu.memory_space<vmem>>) attributes {dimension_semantics = [#tpu.dimension_semantics<parallel>, #tpu.dimension_semantics<parallel>, #tpu.dimension_semantics<arbitrary>], iteration_bounds = array<i64: 1, 1, 1>, scalar_prefetch = 0 : i64, scratch_operands = 1 : i64, tpu.core_type = #tpu.core_type<tc>, window_params = [{transform_indices = @transform_0, window_bounds = array<i64: 24, 32>}, {transform_indices = @transform_1, window_bounds = array<i64: 32, 32>}, {transform_indices = @transform_2, window_bounds = array<i64: 1, 32>}, {transform_indices = @transform_3, window_bounds = array<i64: 24, 32>}]} {
    %c0_i32 = arith.constant 0 : i32
    %0 = arith.cmpi eq, %arg2, %c0_i32 : i32
    %1 = arith.extui %0 : i1 to i32
    %c0_i32_0 = arith.constant 0 : i32
    %2 = arith.cmpi ne, %1, %c0_i32_0 : i32
    scf.if %2 {
      %cst_10 = arith.constant 0.000000e+00 : f32
      %12 = vector.broadcast %cst_10 : f32 to vector<24x32xf32>
      %c0_11 = arith.constant 0 : index
      %c0_12 = arith.constant 0 : index
      %13 = vector.load %arg7[%c0_11, %c0_12] : memref<24x32xf32, #tpu.memory_space<vmem>>, vector<24x32xf32>
      tpu.vector_store %arg7[%c0_11, %c0_12], %12 {strides = array<i32>} : memref<24x32xf32, #tpu.memory_space<vmem>>, vector<24x32xf32>,
    } else {
    }
    %c0 = arith.constant 0 : index
    %c0_1 = arith.constant 0 : index
    %3 = vector.load %arg3[%c0, %c0_1] : memref<24x32xbf16, #tpu.memory_space<vmem>>, vector<24x32xbf16>
    %c0_2 = arith.constant 0 : index
    %c0_3 = arith.constant 0 : index
    %4 = vector.load %arg4[%c0_2, %c0_3] : memref<32x32xbf16, #tpu.memory_space<vmem>>, vector<32x32xbf16>
    %c0_4 = arith.constant 0 : index
    %c0_5 = arith.constant 0 : index
    %5 = vector.load %arg7[%c0_4, %c0_5] : memref<24x32xf32, #tpu.memory_space<vmem>>, vector<24x32xf32>
    %cst = arith.constant dense<0.000000e+00> : vector<24x32xf32>
    %6 = tpu.matmul %3, %4, %cst {dimension_numbers = #tpu.dot_dimension_numbers<[1], [0], [0], [1], [0, 0, 1, 1], [], []>} : vector<24x32xbf16>, vector<32x32xbf16>, vector<24x32xf32> -> vector<24x32xf32>
    %7 = arith.addf %5, %6 : vector<24x32xf32>
    %c0_6 = arith.constant 0 : index
    %c0_7 = arith.constant 0 : index
    %8 = vector.load %arg7[%c0_6, %c0_7] : memref<24x32xf32, #tpu.memory_space<vmem>>, vector<24x32xf32>
    tpu.vector_store %arg7[%c0_6, %c0_7], %7 {strides = array<i32>} : memref<24x32xf32, #tpu.memory_space<vmem>>, vector<24x32xf32>,
    %c0_i32_8 = arith.constant 0 : i32
    %9 = arith.cmpi eq, %arg2, %c0_i32_8 : i32
    %10 = arith.extui %9 : i1 to i32
    %c0_i32_9 = arith.constant 0 : i32
    %11 = arith.cmpi ne, %10, %c0_i32_9 : i32
    scf.if %11 {
      %c0_10 = arith.constant 0 : index
      %c0_11 = arith.constant 0 : index
      %12 = vector.load %arg7[%c0_10, %c0_11] : memref<24x32xf32, #tpu.memory_space<vmem>>, vector<24x32xf32>
      %c0_12 = arith.constant 0 : index
      %c0_13 = arith.constant 0 : index
      %13 = vector.load %arg5[%c0_12, %c0_13] : memref<1x32xf32, #tpu.memory_space<vmem>>, vector<1x32xf32>
      %14 = vector.broadcast %13 : vector<1x32xf32> to vector<24x32xf32>
      %15 = arith.addf %12, %14 : vector<24x32xf32>
      %16 = arith.truncf %15 : vector<24x32xf32> to vector<24x32xbf16>
      %c0_14 = arith.constant 0 : index
      %c0_15 = arith.constant 0 : index
      %17 = vector.load %arg6[%c0_14, %c0_15] : memref<24x32xbf16, #tpu.memory_space<vmem>>, vector<24x32xbf16>
      tpu.vector_store %arg6[%c0_14, %c0_15], %16 {strides = array<i32>} : memref<24x32xbf16, #tpu.memory_space<vmem>>, vector<24x32xbf16>,
    } else {
    }
    return
  }
  func.func @transform_0(%arg0: i32, %arg1: i32, %arg2: i32) -> (i32, i32) {
    %c0_i32 = arith.constant 0 : i32
    return %arg0, %arg2 : i32, i32
  }
  func.func @transform_1(%arg0: i32, %arg1: i32, %arg2: i32) -> (i32, i32) {
    %c0_i32 = arith.constant 0 : i32
    return %arg2, %arg1 : i32, i32
  }
  func.func @transform_2(%arg0: i32, %arg1: i32, %arg2: i32) -> (i32, i32) {
    %c0_i32 = arith.constant 0 : i32
    %c0_i32_0 = arith.constant 0 : i32
    return %c0_i32, %arg1 : i32, i32
  }
  func.func @transform_3(%arg0: i32, %arg1: i32, %arg2: i32) -> (i32, i32) {
    %c0_i32 = arith.constant 0 : i32
    return %arg0, %arg1 : i32, i32
  }
}

module attributes {stable_mosaic.version = 11 : i64} {
  func.func @_attn_kernel(%arg0: i32, %arg1: memref<1x4x12x8xbf16, #tpu.memory_space<vmem>>, %arg2: memref<1x4x12x8xbf16, #tpu.memory_space<vmem>>, %arg3: memref<1x4x12x8xbf16, #tpu.memory_space<vmem>>, %arg4: memref<1x4x12x12xbf16, #tpu.memory_space<vmem>>, %arg5: memref<1x4x12x8xbf16, #tpu.memory_space<vmem>>) attributes {dimension_semantics = [#tpu.dimension_semantics<parallel>], iteration_bounds = array<i64: 2>, scalar_prefetch = 0 : i64, scratch_operands = 0 : i64, tpu.core_type = #tpu.core_type<tc>, window_params = [{transform_indices = @transform_0, window_bounds = array<i64: 1, 4, 12, 8>}, {transform_indices = @transform_1, window_bounds = array<i64: 1, 4, 12, 8>}, {transform_indices = @transform_2, window_bounds = array<i64: 1, 4, 12, 8>}, {transform_indices = @transform_3, window_bounds = array<i64: 1, 4, 12, 12>}, {transform_indices = @transform_4, window_bounds = array<i64: 1, 4, 12, 8>}]} {
    %c0 = arith.constant 0 : index
    %c0_0 = arith.constant 0 : index
    %c0_1 = arith.constant 0 : index
    %c0_2 = arith.constant 0 : index
    %0 = vector.load %arg1[%c0, %c0_0, %c0_1, %c0_2] : memref<1x4x12x8xbf16, #tpu.memory_space<vmem>>, vector<1x1x12x8xbf16>
    %1 = vector.shape_cast %0 : vector<1x1x12x8xbf16> to vector<12x8xbf16>
    %c0_3 = arith.constant 0 : index
    %c0_4 = arith.constant 0 : index
    %c0_5 = arith.constant 0 : index
    %c0_6 = arith.constant 0 : index
    %2 = vector.load %arg2[%c0_3, %c0_4, %c0_5, %c0_6] : memref<1x4x12x8xbf16, #tpu.memory_space<vmem>>, vector<1x1x12x8xbf16>
    %3 = vector.shape_cast %2 : vector<1x1x12x8xbf16> to vector<12x8xbf16>
    %c0_7 = arith.constant 0 : index
    %c0_8 = arith.constant 0 : index
    %c0_9 = arith.constant 0 : index
    %c0_10 = arith.constant 0 : index
    %4 = vector.load %arg3[%c0_7, %c0_8, %c0_9, %c0_10] : memref<1x4x12x8xbf16, #tpu.memory_space<vmem>>, vector<1x1x12x8xbf16>
    %5 = vector.shape_cast %4 : vector<1x1x12x8xbf16> to vector<12x8xbf16>
    %cst = arith.constant dense<0.000000e+00> : vector<12x12xf32>
    %6 = tpu.matmul %1, %3, %cst {dimension_numbers = #tpu.dot_dimension_numbers<[1], [1], [0], [0], [0, 0, 1, 0], [], []>} : vector<12x8xbf16>, vector<12x8xbf16>, vector<12x12xf32> -> vector<12x12xf32>
    %c0_11 = arith.constant 0 : index
    %c0_12 = arith.constant 0 : index
    %c0_13 = arith.constant 0 : index
    %c0_14 = arith.constant 0 : index
    %7 = vector.load %arg4[%c0_11, %c0_12, %c0_13, %c0_14] : memref<1x4x12x12xbf16, #tpu.memory_space<vmem>>, vector<1x1x12x12xbf16>
    %8 = vector.shape_cast %7 : vector<1x1x12x12xbf16> to vector<12x12xbf16>
    %9 = arith.extf %8 : vector<12x12xbf16> to vector<12x12xf32>
    %10 = arith.addf %6, %9 : vector<12x12xf32>
    %cst_15 = arith.constant dense<0xFF800000> : vector<12xf32>
    %11 = vector.multi_reduction <maximumf>, %10, %cst_15 [1] : vector<12x12xf32> to vector<12xf32>
    %12 = vector.shape_cast %11 : vector<12xf32> to vector<12x1xf32>
    %13 = vector.broadcast %12 : vector<12x1xf32> to vector<12x12xf32>
    %14 = arith.subf %10, %13 : vector<12x12xf32>
    %15 = math.exp %14 : vector<12x12xf32>
    %cst_16 = arith.constant dense<0.000000e+00> : vector<12xf32>
    %16 = vector.multi_reduction <add>, %15, %cst_16 [1] : vector<12x12xf32> to vector<12xf32>
    %17 = vector.shape_cast %16 : vector<12xf32> to vector<12x1xf32>
    %18 = tpu.reciprocal %17 {approx = true} : vector<12x1xf32> -> vector<12x1xf32>
    %19 = vector.broadcast %18 : vector<12x1xf32> to vector<12x12xf32>
    %20 = arith.mulf %15, %19 : vector<12x12xf32>
    %21 = arith.truncf %20 : vector<12x12xf32> to vector<12x12xbf16>
    %cst_17 = arith.constant dense<0.000000e+00> : vector<12x8xf32>
    %22 = tpu.matmul %21, %5, %cst_17 {dimension_numbers = #tpu.dot_dimension_numbers<[1], [0], [0], [1], [0, 0, 1, 1], [], []>} : vector<12x12xbf16>, vector<12x8xbf16>, vector<12x8xf32> -> vector<12x8xf32>
    %23 = arith.truncf %22 : vector<12x8xf32> to vector<12x8xbf16>
    %c0_18 = arith.constant 0 : index
    %c0_19 = arith.constant 0 : index
    %c0_20 = arith.constant 0 : index
    %c0_21 = arith.constant 0 : index
    %24 = vector.load %arg5[%c0_18, %c0_19, %c0_20, %c0_21] : memref<1x4x12x8xbf16, #tpu.memory_space<vmem>>, vector<1x1x12x8xbf16>
    %25 = vector.shape_cast %24 : vector<1x1x12x8xbf16> to vector<12x8xbf16>
    %26 = vector.shape_cast %23 : vector<12x8xbf16> to vector<1x1x12x8xbf16>
    tpu.vector_store %arg5[%c0_18, %c0_19, %c0_20, %c0_21], %26 {strides = array<i32>} : memref<1x4x12x8xbf16, #tpu.memory_space<vmem>>, vector<1x1x12x8xbf16>,
    %c0_22 = arith.constant 0 : index
    %c1 = arith.constant 1 : index
    %c0_23 = arith.constant 0 : index
    %c0_24 = arith.constant 0 : index
    %27 = vector.load %arg1[%c0_22, %c1, %c0_23, %c0_24] : memref<1x4x12x8xbf16, #tpu.memory_space<vmem>>, vector<1x1x12x8xbf16>
    %28 = vector.shape_cast %27 : vector<1x1x12x8xbf16> to vector<12x8xbf16>
    %c0_25 = arith.constant 0 : index
    %c1_26 = arith.constant 1 : index
    %c0_27 = arith.constant 0 : index
    %c0_28 = arith.constant 0 : index
    %29 = vector.load %arg2[%c0_25, %c1_26, %c0_27, %c0_28] : memref<1x4x12x8xbf16, #tpu.memory_space<vmem>>, vector<1x1x12x8xbf16>
    %30 = vector.shape_cast %29 : vector<1x1x12x8xbf16> to vector<12x8xbf16>
    %c0_29 = arith.constant 0 : index
    %c1_30 = arith.constant 1 : index
    %c0_31 = arith.constant 0 : index
    %c0_32 = arith.constant 0 : index
    %31 = vector.load %arg3[%c0_29, %c1_30, %c0_31, %c0_32] : memref<1x4x12x8xbf16, #tpu.memory_space<vmem>>, vector<1x1x12x8xbf16>
    %32 = vector.shape_cast %31 : vector<1x1x12x8xbf16> to vector<12x8xbf16>
    %cst_33 = arith.constant dense<0.000000e+00> : vector<12x12xf32>
    %33 = tpu.matmul %28, %30, %cst_33 {dimension_numbers = #tpu.dot_dimension_numbers<[1], [1], [0], [0], [0, 0, 1, 0], [], []>} : vector<12x8xbf16>, vector<12x8xbf16>, vector<12x12xf32> -> vector<12x12xf32>
    %c0_34 = arith.constant 0 : index
    %c1_35 = arith.constant 1 : index
    %c0_36 = arith.constant 0 : index
    %c0_37 = arith.constant 0 : index
    %34 = vector.load %arg4[%c0_34, %c1_35, %c0_36, %c0_37] : memref<1x4x12x12xbf16, #tpu.memory_space<vmem>>, vector<1x1x12x12xbf16>
    %35 = vector.shape_cast %34 : vector<1x1x12x12xbf16> to vector<12x12xbf16>
    %36 = arith.extf %35 : vector<12x12xbf16> to vector<12x12xf32>
    %37 = arith.addf %33, %36 : vector<12x12xf32>
    %cst_38 = arith.constant dense<0xFF800000> : vector<12xf32>
    %38 = vector.multi_reduction <maximumf>, %37, %cst_38 [1] : vector<12x12xf32> to vector<12xf32>
    %39 = vector.shape_cast %38 : vector<12xf32> to vector<12x1xf32>
    %40 = vector.broadcast %39 : vector<12x1xf32> to vector<12x12xf32>
    %41 = arith.subf %37, %40 : vector<12x12xf32>
    %42 = math.exp %41 : vector<12x12xf32>
    %cst_39 = arith.constant dense<0.000000e+00> : vector<12xf32>
    %43 = vector.multi_reduction <add>, %42, %cst_39 [1] : vector<12x12xf32> to vector<12xf32>
    %44 = vector.shape_cast %43 : vector<12xf32> to vector<12x1xf32>
    %45 = tpu.reciprocal %44 {approx = true} : vector<12x1xf32> -> vector<12x1xf32>
    %46 = vector.broadcast %45 : vector<12x1xf32> to vector<12x12xf32>
    %47 = arith.mulf %42, %46 : vector<12x12xf32>
    %48 = arith.truncf %47 : vector<12x12xf32> to vector<12x12xbf16>
    %cst_40 = arith.constant dense<0.000000e+00> : vector<12x8xf32>
    %49 = tpu.matmul %48, %32, %cst_40 {dimension_numbers = #tpu.dot_dimension_numbers<[1], [0], [0], [1], [0, 0, 1, 1], [], []>} : vector<12x12xbf16>, vector<12x8xbf16>, vector<12x8xf32> -> vector<12x8xf32>
    %50 = arith.truncf %49 : vector<12x8xf32> to vector<12x8xbf16>
    %c0_41 = arith.constant 0 : index
    %c1_42 = arith.constant 1 : index
    %c0_43 = arith.constant 0 : index
    %c0_44 = arith.constant 0 : index
    %51 = vector.load %arg5[%c0_41, %c1_42, %c0_43, %c0_44] : memref<1x4x12x8xbf16, #tpu.memory_space<vmem>>, vector<1x1x12x8xbf16>
    %52 = vector.shape_cast %51 : vector<1x1x12x8xbf16> to vector<12x8xbf16>
    %53 = vector.shape_cast %50 : vector<12x8xbf16> to vector<1x1x12x8xbf16>
    tpu.vector_store %arg5[%c0_41, %c1_42, %c0_43, %c0_44], %53 {strides = array<i32>} : memref<1x4x12x8xbf16, #tpu.memory_space<vmem>>, vector<1x1x12x8xbf16>,
    %c0_45 = arith.constant 0 : index
    %c2 = arith.constant 2 : index
    %c0_46 = arith.constant 0 : index
    %c0_47 = arith.constant 0 : index
    %54 = vector.load %arg1[%c0_45, %c2, %c0_46, %c0_47] : memref<1x4x12x8xbf16, #tpu.memory_space<vmem>>, vector<1x1x12x8xbf16>
    %55 = vector.shape_cast %54 : vector<1x1x12x8xbf16> to vector<12x8xbf16>
    %c0_48 = arith.constant 0 : index
    %c2_49 = arith.constant 2 : index
    %c0_50 = arith.constant 0 : index
    %c0_51 = arith.constant 0 : index
    %56 = vector.load %arg2[%c0_48, %c2_49, %c0_50, %c0_51] : memref<1x4x12x8xbf16, #tpu.memory_space<vmem>>, vector<1x1x12x8xbf16>
    %57 = vector.shape_cast %56 : vector<1x1x12x8xbf16> to vector<12x8xbf16>
    %c0_52 = arith.constant 0 : index
    %c2_53 = arith.constant 2 : index
    %c0_54 = arith.constant 0 : index
    %c0_55 = arith.constant 0 : index
    %58 = vector.load %arg3[%c0_52, %c2_53, %c0_54, %c0_55] : memref<1x4x12x8xbf16, #tpu.memory_space<vmem>>, vector<1x1x12x8xbf16>
    %59 = vector.shape_cast %58 : vector<1x1x12x8xbf16> to vector<12x8xbf16>
    %cst_56 = arith.constant dense<0.000000e+00> : vector<12x12xf32>
    %60 = tpu.matmul %55, %57, %cst_56 {dimension_numbers = #tpu.dot_dimension_numbers<[1], [1], [0], [0], [0, 0, 1, 0], [], []>} : vector<12x8xbf16>, vector<12x8xbf16>, vector<12x12xf32> -> vector<12x12xf32>
    %c0_57 = arith.constant 0 : index
    %c2_58 = arith.constant 2 : index
    %c0_59 = arith.constant 0 : index
    %c0_60 = arith.constant 0 : index
    %61 = vector.load %arg4[%c0_57, %c2_58, %c0_59, %c0_60] : memref<1x4x12x12xbf16, #tpu.memory_space<vmem>>, vector<1x1x12x12xbf16>
    %62 = vector.shape_cast %61 : vector<1x1x12x12xbf16> to vector<12x12xbf16>
    %63 = arith.extf %62 : vector<12x12xbf16> to vector<12x12xf32>
    %64 = arith.addf %60, %63 : vector<12x12xf32>
    %cst_61 = arith.constant dense<0xFF800000> : vector<12xf32>
    %65 = vector.multi_reduction <maximumf>, %64, %cst_61 [1] : vector<12x12xf32> to vector<12xf32>
    %66 = vector.shape_cast %65 : vector<12xf32> to vector<12x1xf32>
    %67 = vector.broadcast %66 : vector<12x1xf32> to vector<12x12xf32>
    %68 = arith.subf %64, %67 : vector<12x12xf32>
    %69 = math.exp %68 : vector<12x12xf32>
    %cst_62 = arith.constant dense<0.000000e+00> : vector<12xf32>
    %70 = vector.multi_reduction <add>, %69, %cst_62 [1] : vector<12x12xf32> to vector<12xf32>
    %71 = vector.shape_cast %70 : vector<12xf32> to vector<12x1xf32>
    %72 = tpu.reciprocal %71 {approx = true} : vector<12x1xf32> -> vector<12x1xf32>
    %73 = vector.broadcast %72 : vector<12x1xf32> to vector<12x12xf32>
    %74 = arith.mulf %69, %73 : vector<12x12xf32>
    %75 = arith.truncf %74 : vector<12x12xf32> to vector<12x12xbf16>
    %cst_63 = arith.constant dense<0.000000e+00> : vector<12x8xf32>
    %76 = tpu.matmul %75, %59, %cst_63 {dimension_numbers = #tpu.dot_dimension_numbers<[1], [0], [0], [1], [0, 0, 1, 1], [], []>} : vector<12x12xbf16>, vector<12x8xbf16>, vector<12x8xf32> -> vector<12x8xf32>
    %77 = arith.truncf %76 : vector<12x8xf32> to vector<12x8xbf16>
    %c0_64 = arith.constant 0 : index
    %c2_65 = arith.constant 2 : index
    %c0_66 = arith.constant 0 : index
    %c0_67 = arith.constant 0 : index
    %78 = vector.load %arg5[%c0_64, %c2_65, %c0_66, %c0_67] : memref<1x4x12x8xbf16, #tpu.memory_space<vmem>>, vector<1x1x12x8xbf16>
    %79 = vector.shape_cast %78 : vector<1x1x12x8xbf16> to vector<12x8xbf16>
    %80 = vector.shape_cast %77 : vector<12x8xbf16> to vector<1x1x12x8xbf16>
    tpu.vector_store %arg5[%c0_64, %c2_65, %c0_66, %c0_67], %80 {strides = array<i32>} : memref<1x4x12x8xbf16, #tpu.memory_space<vmem>>, vector<1x1x12x8xbf16>,
    %c0_68 = arith.constant 0 : index
    %c3 = arith.constant 3 : index
    %c0_69 = arith.constant 0 : index
    %c0_70 = arith.constant 0 : index
    %81 = vector.load %arg1[%c0_68, %c3, %c0_69, %c0_70] : memref<1x4x12x8xbf16, #tpu.memory_space<vmem>>, vector<1x1x12x8xbf16>
    %82 = vector.shape_cast %81 : vector<1x1x12x8xbf16> to vector<12x8xbf16>
    %c0_71 = arith.constant 0 : index
    %c3_72 = arith.constant 3 : index
    %c0_73 = arith.constant 0 : index
    %c0_74 = arith.constant 0 : index
    %83 = vector.load %arg2[%c0_71, %c3_72, %c0_73, %c0_74] : memref<1x4x12x8xbf16, #tpu.memory_space<vmem>>, vector<1x1x12x8xbf16>
    %84 = vector.shape_cast %83 : vector<1x1x12x8xbf16> to vector<12x8xbf16>
    %c0_75 = arith.constant 0 : index
    %c3_76 = arith.constant 3 : index
    %c0_77 = arith.constant 0 : index
    %c0_78 = arith.constant 0 : index
    %85 = vector.load %arg3[%c0_75, %c3_76, %c0_77, %c0_78] : memref<1x4x12x8xbf16, #tpu.memory_space<vmem>>, vector<1x1x12x8xbf16>
    %86 = vector.shape_cast %85 : vector<1x1x12x8xbf16> to vector<12x8xbf16>
    %cst_79 = arith.constant dense<0.000000e+00> : vector<12x12xf32>
    %87 = tpu.matmul %82, %84, %cst_79 {dimension_numbers = #tpu.dot_dimension_numbers<[1], [1], [0], [0], [0, 0, 1, 0], [], []>} : vector<12x8xbf16>, vector<12x8xbf16>, vector<12x12xf32> -> vector<12x12xf32>
    %c0_80 = arith.constant 0 : index
    %c3_81 = arith.constant 3 : index
    %c0_82 = arith.constant 0 : index
    %c0_83 = arith.constant 0 : index
    %88 = vector.load %arg4[%c0_80, %c3_81, %c0_82, %c0_83] : memref<1x4x12x12xbf16, #tpu.memory_space<vmem>>, vector<1x1x12x12xbf16>
    %89 = vector.shape_cast %88 : vector<1x1x12x12xbf16> to vector<12x12xbf16>
    %90 = arith.extf %89 : vector<12x12xbf16> to vector<12x12xf32>
    %91 = arith.addf %87, %90 : vector<12x12xf32>
    %cst_84 = arith.constant dense<0xFF800000> : vector<12xf32>
    %92 = vector.multi_reduction <maximumf>, %91, %cst_84 [1] : vector<12x12xf32> to vector<12xf32>
    %93 = vector.shape_cast %92 : vector<12xf32> to vector<12x1xf32>
    %94 = vector.broadcast %93 : vector<12x1xf32> to vector<12x12xf32>
    %95 = arith.subf %91, %94 : vector<12x12xf32>
    %96 = math.exp %95 : vector<12x12xf32>
    %cst_85 = arith.constant dense<0.000000e+00> : vector<12xf32>
    %97 = vector.multi_reduction <add>, %96, %cst_85 [1] : vector<12x12xf32> to vector<12xf32>
    %98 = vector.shape_cast %97 : vector<12xf32> to vector<12x1xf32>
    %99 = tpu.reciprocal %98 {approx = true} : vector<12x1xf32> -> vector<12x1xf32>
    %100 = vector.broadcast %99 : vector<12x1xf32> to vector<12x12xf32>
    %101 = arith.mulf %96, %100 : vector<12x12xf32>
    %102 = arith.truncf %101 : vector<12x12xf32> to vector<12x12xbf16>
    %cst_86 = arith.constant dense<0.000000e+00> : vector<12x8xf32>
    %103 = tpu.matmul %102, %86, %cst_86 {dimension_numbers = #tpu.dot_dimension_numbers<[1], [0], [0], [1], [0, 0, 1, 1], [], []>} : vector<12x12xbf16>, vector<12x8xbf16>, vector<12x8xf32> -> vector<12x8xf32>
    %104 = arith.truncf %103 : vector<12x8xf32> to vector<12x8xbf16>
    %c0_87 = arith.constant 0 : index
    %c3_88 = arith.constant 3 : index
    %c0_89 = arith.constant 0 : index
    %c0_90 = arith.constant 0 : index
    %105 = vector.load %arg5[%c0_87, %c3_88, %c0_89, %c0_90] : memref<1x4x12x8xbf16, #tpu.memory_space<vmem>>, vector<1x1x12x8xbf16>
    %106 = vector.shape_cast %105 : vector<1x1x12x8xbf16> to vector<12x8xbf16>
    %107 = vector.shape_cast %104 : vector<12x8xbf16> to vector<1x1x12x8xbf16>
    tpu.vector_store %arg5[%c0_87, %c3_88, %c0_89, %c0_90], %107 {strides = array<i32>} : memref<1x4x12x8xbf16, #tpu.memory_space<vmem>>, vector<1x1x12x8xbf16>,
    return
  }
  func.func @transform_0(%arg0: i32) -> (i32, i32, i32, i32) {
    %c0_i32 = arith.constant 0 : i32
    %c0_i32_0 = arith.constant 0 : i32
    %c0_i32_1 = arith.constant 0 : i32
    %c0_i32_2 = arith.constant 0 : i32
    return %arg0, %c0_i32, %c0_i32_0, %c0_i32_1 : i32, i32, i32, i32
  }
  func.func @transform_1(%arg0: i32) -> (i32, i32, i32, i32) {
    %c0_i32 = arith.constant 0 : i32
    %c0_i32_0 = arith.constant 0 : i32
    %c0_i32_1 = arith.constant 0 : i32
    %c0_i32_2 = arith.constant 0 : i32
    return %arg0, %c0_i32, %c0_i32_0, %c0_i32_1 : i32, i32, i32, i32
  }
  func.func @transform_2(%arg0: i32) -> (i32, i32, i32, i32) {
    %c0_i32 = arith.constant 0 : i32
    %c0_i32_0 = arith.constant 0 : i32
    %c0_i32_1 = arith.constant 0 : i32
    %c0_i32_2 = arith.constant 0 : i32
    return %arg0, %c0_i32, %c0_i32_0, %c0_i32_1 : i32, i32, i32, i32
  }
  func.func @transform_3(%arg0: i32) -> (i32, i32, i32, i32) {
    %c0_i32 = arith.constant 0 : i32
    %c0_i32_0 = arith.constant 0 : i32
    %c0_i32_1 = arith.constant 0 : i32
    %c0_i32_2 = arith.constant 0 : i32
    return %arg0, %c0_i32, %c0_i32_0, %c0_i32_1 : i32, i32, i32, i32
  }
  func.func @transform_4(%arg0: i32) -> (i32, i32, i32, i32) {
    %c0_i32 = arith.constant 0 : i32
    %c0_i32_0 = arith.constant 0 : i32
    %c0_i32_1 = arith.constant 0 : i32
    %c0_i32_2 = arith.constant 0 : i32
    return %arg0, %c0_i32, %c0_i32_0, %c0_i32_1 : i32, i32, i32, i32
  }
}

module attributes {stable_mosaic.version = 11 : i64} {
  func.func @kernel(%arg0: i32, %arg1: i32, %arg2: i32, %arg3: memref<24x32xbf16, #tpu.memory_space<vmem>>, %arg4: memref<32x64xbf16, #tpu.memory_space<vmem>>, %arg5: memref<1x64xf32, #tpu.memory_space<vmem>>, %arg6: memref<24x64xbf16, #tpu.memory_space<vmem>>, %arg7: memref<24x64xf32, #tpu.memory_space<vmem>>) attributes {dimension_semantics = [#tpu.dimension_semantics<parallel>, #tpu.dimension_semantics<parallel>, #tpu.dimension_semantics<arbitrary>], iteration_bounds = array<i64: 1, 1, 1>, scalar_prefetch = 0 : i64, scratch_operands = 1 : i64, tpu.core_type = #tpu.core_type<tc>, window_params = [{transform_indices = @transform_0, window_bounds = array<i64: 24, 32>}, {transform_indices = @transform_1, window_bounds = array<i64: 32, 64>}, {transform_indices = @transform_2, window_bounds = array<i64: 1, 64>}, {transform_indices = @transform_3, window_bounds = array<i64: 24, 64>}]} {
    %c0_i32 = arith.constant 0 : i32
    %0 = arith.cmpi eq, %arg2, %c0_i32 : i32
    %1 = arith.extui %0 : i1 to i32
    %c0_i32_0 = arith.constant 0 : i32
    %2 = arith.cmpi ne, %1, %c0_i32_0 : i32
    scf.if %2 {
      %cst_10 = arith.constant 0.000000e+00 : f32
      %12 = vector.broadcast %cst_10 : f32 to vector<24x64xf32>
      %c0_11 = arith.constant 0 : index
      %c0_12 = arith.constant 0 : index
      %13 = vector.load %arg7[%c0_11, %c0_12] : memref<24x64xf32, #tpu.memory_space<vmem>>, vector<24x64xf32>
      tpu.vector_store %arg7[%c0_11, %c0_12], %12 {strides = array<i32>} : memref<24x64xf32, #tpu.memory_space<vmem>>, vector<24x64xf32>,
    } else {
    }
    %c0 = arith.constant 0 : index
    %c0_1 = arith.constant 0 : index
    %3 = vector.load %arg3[%c0, %c0_1] : memref<24x32xbf16, #tpu.memory_space<vmem>>, vector<24x32xbf16>
    %c0_2 = arith.constant 0 : index
    %c0_3 = arith.constant 0 : index
    %4 = vector.load %arg4[%c0_2, %c0_3] : memref<32x64xbf16, #tpu.memory_space<vmem>>, vector<32x64xbf16>
    %c0_4 = arith.constant 0 : index
    %c0_5 = arith.constant 0 : index
    %5 = vector.load %arg7[%c0_4, %c0_5] : memref<24x64xf32, #tpu.memory_space<vmem>>, vector<24x64xf32>
    %cst = arith.constant dense<0.000000e+00> : vector<24x64xf32>
    %6 = tpu.matmul %3, %4, %cst {dimension_numbers = #tpu.dot_dimension_numbers<[1], [0], [0], [1], [0, 0, 1, 1], [], []>} : vector<24x32xbf16>, vector<32x64xbf16>, vector<24x64xf32> -> vector<24x64xf32>
    %7 = arith.addf %5, %6 : vector<24x64xf32>
    %c0_6 = arith.constant 0 : index
    %c0_7 = arith.constant 0 : index
    %8 = vector.load %arg7[%c0_6, %c0_7] : memref<24x64xf32, #tpu.memory_space<vmem>>, vector<24x64xf32>
    tpu.vector_store %arg7[%c0_6, %c0_7], %7 {strides = array<i32>} : memref<24x64xf32, #tpu.memory_space<vmem>>, vector<24x64xf32>,
    %c0_i32_8 = arith.constant 0 : i32
    %9 = arith.cmpi eq, %arg2, %c0_i32_8 : i32
    %10 = arith.extui %9 : i1 to i32
    %c0_i32_9 = arith.constant 0 : i32
    %11 = arith.cmpi ne, %10, %c0_i32_9 : i32
    scf.if %11 {
      %c0_10 = arith.constant 0 : index
      %c0_11 = arith.constant 0 : index
      %12 = vector.load %arg7[%c0_10, %c0_11] : memref<24x64xf32, #tpu.memory_space<vmem>>, vector<24x64xf32>
      %c0_12 = arith.constant 0 : index
      %c0_13 = arith.constant 0 : index
      %13 = vector.load %arg5[%c0_12, %c0_13] : memref<1x64xf32, #tpu.memory_space<vmem>>, vector<1x64xf32>
      %14 = vector.broadcast %13 : vector<1x64xf32> to vector<24x64xf32>
      %15 = arith.addf %12, %14 : vector<24x64xf32>
      %cst_14 = arith.constant 5.000000e-01 : f32
      %16 = vector.broadcast %cst_14 : f32 to vector<24x64xf32>
      %17 = arith.mulf %16, %15 : vector<24x64xf32>
      %cst_15 = arith.constant 0.707106769 : f32
      %18 = vector.broadcast %cst_15 : f32 to vector<24x64xf32>
      %19 = arith.mulf %15, %18 : vector<24x64xf32>
      %cst_16 = arith.constant 0.000000e+00 : f32
      %20 = vector.broadcast %cst_16 : f32 to vector<24x64xf32>
      %21 = arith.cmpf olt, %19, %20 : vector<24x64xf32>
      %cst_17 = arith.constant -1.000000e+00 : f32
      %cst_18 = arith.constant 1.000000e+00 : f32
      %22 = vector.broadcast %cst_17 : f32 to vector<24x64xf32>
      %23 = vector.broadcast %cst_18 : f32 to vector<24x64xf32>
      %24 = arith.select %21, %22, %23 : vector<24x64xi1>, vector<24x64xf32>
      %25 = math.absf %19 : vector<24x64xf32>
      %cst_19 = arith.constant 0.327591091 : f32
      %26 = vector.broadcast %cst_19 : f32 to vector<24x64xf32>
      %27 = arith.mulf %26, %25 : vector<24x64xf32>
      %cst_20 = arith.constant 1.000000e+00 : f32
      %28 = vector.broadcast %cst_20 : f32 to vector<24x64xf32>
      %29 = arith.addf %28, %27 : vector<24x64xf32>
      %cst_21 = arith.constant 1.000000e+00 : f32
      %30 = vector.broadcast %cst_21 : f32 to vector<24x64xf32>
      %31 = arith.divf %30, %29 : vector<24x64xf32>
      %cst_22 = arith.constant 1.06140542 : f32
      %32 = vector.broadcast %cst_22 : f32 to vector<24x64xf32>
      %33 = arith.mulf %32, %31 : vector<24x64xf32>
      %cst_23 = arith.constant -1.45315206 : f32
      %34 = vector.broadcast %cst_23 : f32 to vector<24x64xf32>
      %35 = arith.addf %33, %34 : vector<24x64xf32>
      %36 = arith.mulf %35, %31 : vector<24x64xf32>
      %cst_24 = arith.constant 1.42141378 : f32
      %37 = vector.broadcast %cst_24 : f32 to vector<24x64xf32>
      %38 = arith.addf %36, %37 : vector<24x64xf32>
      %39 = arith.mulf %38, %31 : vector<24x64xf32>
      %cst_25 = arith.constant -0.284496725 : f32
      %40 = vector.broadcast %cst_25 : f32 to vector<24x64xf32>
      %41 = arith.addf %39, %40 : vector<24x64xf32>
      %42 = arith.mulf %41, %31 : vector<24x64xf32>
      %cst_26 = arith.constant 0.254829586 : f32
      %43 = vector.broadcast %cst_26 : f32 to vector<24x64xf32>
      %44 = arith.addf %42, %43 : vector<24x64xf32>
      %45 = arith.mulf %44, %31 : vector<24x64xf32>
      %cst_27 = arith.constant 0.000000e+00 : f32
      %46 = vector.broadcast %cst_27 : f32 to vector<24x64xf32>
      %47 = arith.subf %46, %25 : vector<24x64xf32>
      %48 = arith.mulf %47, %25 : vector<24x64xf32>
      %49 = math.exp %48 : vector<24x64xf32>
      %50 = arith.mulf %45, %49 : vector<24x64xf32>
      %cst_28 = arith.constant 1.000000e+00 : f32
      %51 = vector.broadcast %cst_28 : f32 to vector<24x64xf32>
      %52 = arith.subf %51, %50 : vector<24x64xf32>
      %53 = arith.mulf %24, %52 : vector<24x64xf32>
      %cst_29 = arith.constant 1.000000e+00 : f32
      %54 = vector.broadcast %cst_29 : f32 to vector<24x64xf32>
      %55 = arith.addf %54, %53 : vector<24x64xf32>
      %56 = arith.mulf %17, %55 : vector<24x64xf32>
      %57 = arith.truncf %56 : vector<24x64xf32> to vector<24x64xbf16>
      %c0_30 = arith.constant 0 : index
      %c0_31 = arith.constant 0 : index
      %58 = vector.load %arg6[%c0_30, %c0_31] : memref<24x64xbf16, #tpu.memory_space<vmem>>, vector<24x64xbf16>
      tpu.vector_store %arg6[%c0_30, %c0_31], %57 {strides = array<i32>} : memref<24x64xbf16, #tpu.memory_space<vmem>>, vector<24x64xbf16>,
    } else {
    }
    return
  }
  func.func @transform_0(%arg0: i32, %arg1: i32, %arg2: i32) -> (i32, i32) {
    %c0_i32 = arith.constant 0 : i32
    return %arg0, %arg2 : i32, i32
  }
  func.func @transform_1(%arg0: i32, %arg1: i32, %arg2: i32) -> (i32, i32) {
    %c0_i32 = arith.constant 0 : i32
    return %arg2, %arg1 : i32, i32
  }
  func.func @transform_2(%arg0: i32, %arg1: i32, %arg2: i32) -> (i32, i32) {
    %c0_i32 = arith.constant 0 : i32
    %c0_i32_0 = arith.constant 0 : i32
    return %c0_i32, %arg1 : i32, i32
  }
  func.func @transform_3(%arg0: i32, %arg1: i32, %arg2: i32) -> (i32, i32) {
    %c0_i32 = arith.constant 0 : i32
    return %arg0, %arg1 : i32, i32
  }
}

module attributes {stable_mosaic.version = 11 : i64} {
  func.func @kernel(%arg0: i32, %arg1: i32, %arg2: i32, %arg3: memref<24x64xbf16, #tpu.memory_space<vmem>>, %arg4: memref<64x32xbf16, #tpu.memory_space<vmem>>, %arg5: memref<1x32xf32, #tpu.memory_space<vmem>>, %arg6: memref<24x32xbf16, #tpu.memory_space<vmem>>, %arg7: memref<24x32xf32, #tpu.memory_space<vmem>>) attributes {dimension_semantics = [#tpu.dimension_semantics<parallel>, #tpu.dimension_semantics<parallel>, #tpu.dimension_semantics<arbitrary>], iteration_bounds = array<i64: 1, 1, 1>, scalar_prefetch = 0 : i64, scratch_operands = 1 : i64, tpu.core_type = #tpu.core_type<tc>, window_params = [{transform_indices = @transform_0, window_bounds = array<i64: 24, 64>}, {transform_indices = @transform_1, window_bounds = array<i64: 64, 32>}, {transform_indices = @transform_2, window_bounds = array<i64: 1, 32>}, {transform_indices = @transform_3, window_bounds = array<i64: 24, 32>}]} {
    %c0_i32 = arith.constant 0 : i32
    %0 = arith.cmpi eq, %arg2, %c0_i32 : i32
    %1 = arith.extui %0 : i1 to i32
    %c0_i32_0 = arith.constant 0 : i32
    %2 = arith.cmpi ne, %1, %c0_i32_0 : i32
    scf.if %2 {
      %cst_10 = arith.constant 0.000000e+00 : f32
      %12 = vector.broadcast %cst_10 : f32 to vector<24x32xf32>
      %c0_11 = arith.constant 0 : index
      %c0_12 = arith.constant 0 : index
      %13 = vector.load %arg7[%c0_11, %c0_12] : memref<24x32xf32, #tpu.memory_space<vmem>>, vector<24x32xf32>
      tpu.vector_store %arg7[%c0_11, %c0_12], %12 {strides = array<i32>} : memref<24x32xf32, #tpu.memory_space<vmem>>, vector<24x32xf32>,
    } else {
    }
    %c0 = arith.constant 0 : index
    %c0_1 = arith.constant 0 : index
    %3 = vector.load %arg3[%c0, %c0_1] : memref<24x64xbf16, #tpu.memory_space<vmem>>, vector<24x64xbf16>
    %c0_2 = arith.constant 0 : index
    %c0_3 = arith.constant 0 : index
    %4 = vector.load %arg4[%c0_2, %c0_3] : memref<64x32xbf16, #tpu.memory_space<vmem>>, vector<64x32xbf16>
    %c0_4 = arith.constant 0 : index
    %c0_5 = arith.constant 0 : index
    %5 = vector.load %arg7[%c0_4, %c0_5] : memref<24x32xf32, #tpu.memory_space<vmem>>, vector<24x32xf32>
    %cst = arith.constant dense<0.000000e+00> : vector<24x32xf32>
    %6 = tpu.matmul %3, %4, %cst {dimension_numbers = #tpu.dot_dimension_numbers<[1], [0], [0], [1], [0, 0, 1, 1], [], []>} : vector<24x64xbf16>, vector<64x32xbf16>, vector<24x32xf32> -> vector<24x32xf32>
    %7 = arith.addf %5, %6 : vector<24x32xf32>
    %c0_6 = arith.constant 0 : index
    %c0_7 = arith.constant 0 : index
    %8 = vector.load %arg7[%c0_6, %c0_7] : memref<24x32xf32, #tpu.memory_space<vmem>>, vector<24x32xf32>
    tpu.vector_store %arg7[%c0_6, %c0_7], %7 {strides = array<i32>} : memref<24x32xf32, #tpu.memory_space<vmem>>, vector<24x32xf32>,
    %c0_i32_8 = arith.constant 0 : i32
    %9 = arith.cmpi eq, %arg2, %c0_i32_8 : i32
    %10 = arith.extui %9 : i1 to i32
    %c0_i32_9 = arith.constant 0 : i32
    %11 = arith.cmpi ne, %10, %c0_i32_9 : i32
    scf.if %11 {
      %c0_10 = arith.constant 0 : index
      %c0_11 = arith.constant 0 : index
      %12 = vector.load %arg7[%c0_10, %c0_11] : memref<24x32xf32, #tpu.memory_space<vmem>>, vector<24x32xf32>
      %c0_12 = arith.constant 0 : index
      %c0_13 = arith.constant 0 : index
      %13 = vector.load %arg5[%c0_12, %c0_13] : memref<1x32xf32, #tpu.memory_space<vmem>>, vector<1x32xf32>
      %14 = vector.broadcast %13 : vector<1x32xf32> to vector<24x32xf32>
      %15 = arith.addf %12, %14 : vector<24x32xf32>
      %16 = arith.truncf %15 : vector<24x32xf32> to vector<24x32xbf16>
      %c0_14 = arith.constant 0 : index
      %c0_15 = arith.constant 0 : index
      %17 = vector.load %arg6[%c0_14, %c0_15] : memref<24x32xbf16, #tpu.memory_space<vmem>>, vector<24x32xbf16>
      tpu.vector_store %arg6[%c0_14, %c0_15], %16 {strides = array<i32>} : memref<24x32xbf16, #tpu.memory_space<vmem>>, vector<24x32xbf16>,
    } else {
    }
    return
  }
  func.func @transform_0(%arg0: i32, %arg1: i32, %arg2: i32) -> (i32, i32) {
    %c0_i32 = arith.constant 0 : i32
    return %arg0, %arg2 : i32, i32
  }
  func.func @transform_1(%arg0: i32, %arg1: i32, %arg2: i32) -> (i32, i32) {
    %c0_i32 = arith.constant 0 : i32
    return %arg2, %arg1 : i32, i32
  }
  func.func @transform_2(%arg0: i32, %arg1: i32, %arg2: i32) -> (i32, i32) {
    %c0_i32 = arith.constant 0 : i32
    %c0_i32_0 = arith.constant 0 : i32
    return %c0_i32, %arg1 : i32, i32
  }
  func.func @transform_3(%arg0: i32, %arg1: i32, %arg2: i32) -> (i32, i32) {
    %c0_i32 = arith.constant 0 : i32
    return %arg0, %arg1 : i32, i32
  }
}

module attributes {stable_mosaic.version = 11 : i64} {
  func.func @kernel(%arg0: i32, %arg1: i32, %arg2: i32, %arg3: memref<8x32xbf16, #tpu.memory_space<vmem>>, %arg4: memref<64x32xbf16, #tpu.memory_space<vmem>>, %arg5: memref<1x64xf32, #tpu.memory_space<vmem>>, %arg6: memref<8x64xf32, #tpu.memory_space<vmem>>, %arg7: memref<8x64xf32, #tpu.memory_space<vmem>>) attributes {dimension_semantics = [#tpu.dimension_semantics<parallel>, #tpu.dimension_semantics<parallel>, #tpu.dimension_semantics<arbitrary>], iteration_bounds = array<i64: 1, 1, 1>, scalar_prefetch = 0 : i64, scratch_operands = 1 : i64, tpu.core_type = #tpu.core_type<tc>, window_params = [{transform_indices = @transform_0, window_bounds = array<i64: 8, 32>}, {transform_indices = @transform_1, window_bounds = array<i64: 64, 32>}, {transform_indices = @transform_2, window_bounds = array<i64: 1, 64>}, {transform_indices = @transform_3, window_bounds = array<i64: 8, 64>}]} {
    %c0_i32 = arith.constant 0 : i32
    %0 = arith.cmpi eq, %arg2, %c0_i32 : i32
    %1 = arith.extui %0 : i1 to i32
    %c0_i32_0 = arith.constant 0 : i32
    %2 = arith.cmpi ne, %1, %c0_i32_0 : i32
    scf.if %2 {
      %cst_10 = arith.constant 0.000000e+00 : f32
      %12 = vector.broadcast %cst_10 : f32 to vector<8x64xf32>
      %c0_11 = arith.constant 0 : index
      %c0_12 = arith.constant 0 : index
      %13 = vector.load %arg7[%c0_11, %c0_12] : memref<8x64xf32, #tpu.memory_space<vmem>>, vector<8x64xf32>
      tpu.vector_store %arg7[%c0_11, %c0_12], %12 {strides = array<i32>} : memref<8x64xf32, #tpu.memory_space<vmem>>, vector<8x64xf32>,
    } else {
    }
    %c0 = arith.constant 0 : index
    %c0_1 = arith.constant 0 : index
    %3 = vector.load %arg3[%c0, %c0_1] : memref<8x32xbf16, #tpu.memory_space<vmem>>, vector<8x32xbf16>
    %c0_2 = arith.constant 0 : index
    %c0_3 = arith.constant 0 : index
    %4 = vector.load %arg4[%c0_2, %c0_3] : memref<64x32xbf16, #tpu.memory_space<vmem>>, vector<64x32xbf16>
    %c0_4 = arith.constant 0 : index
    %c0_5 = arith.constant 0 : index
    %5 = vector.load %arg7[%c0_4, %c0_5] : memref<8x64xf32, #tpu.memory_space<vmem>>, vector<8x64xf32>
    %cst = arith.constant dense<0.000000e+00> : vector<8x64xf32>
    %6 = tpu.matmul %3, %4, %cst {dimension_numbers = #tpu.dot_dimension_numbers<[1], [1], [0], [0], [0, 0, 1, 0], [], []>} : vector<8x32xbf16>, vector<64x32xbf16>, vector<8x64xf32> -> vector<8x64xf32>
    %7 = arith.addf %5, %6 : vector<8x64xf32>
    %c0_6 = arith.constant 0 : index
    %c0_7 = arith.constant 0 : index
    %8 = vector.load %arg7[%c0_6, %c0_7] : memref<8x64xf32, #tpu.memory_space<vmem>>, vector<8x64xf32>
    tpu.vector_store %arg7[%c0_6, %c0_7], %7 {strides = array<i32>} : memref<8x64xf32, #tpu.memory_space<vmem>>, vector<8x64xf32>,
    %c0_i32_8 = arith.constant 0 : i32
    %9 = arith.cmpi eq, %arg2, %c0_i32_8 : i32
    %10 = arith.extui %9 : i1 to i32
    %c0_i32_9 = arith.constant 0 : i32
    %11 = arith.cmpi ne, %10, %c0_i32_9 : i32
    scf.if %11 {
      %c0_10 = arith.constant 0 : index
      %c0_11 = arith.constant 0 : index
      %12 = vector.load %arg7[%c0_10, %c0_11] : memref<8x64xf32, #tpu.memory_space<vmem>>, vector<8x64xf32>
      %c0_12 = arith.constant 0 : index
      %c0_13 = arith.constant 0 : index
      %13 = vector.load %arg5[%c0_12, %c0_13] : memref<1x64xf32, #tpu.memory_space<vmem>>, vector<1x64xf32>
      %14 = vector.broadcast %13 : vector<1x64xf32> to vector<8x64xf32>
      %15 = arith.addf %12, %14 : vector<8x64xf32>
      %c0_14 = arith.constant 0 : index
      %c0_15 = arith.constant 0 : index
      %16 = vector.load %arg6[%c0_14, %c0_15] : memref<8x64xf32, #tpu.memory_space<vmem>>, vector<8x64xf32>
      tpu.vector_store %arg6[%c0_14, %c0_15], %15 {strides = array<i32>} : memref<8x64xf32, #tpu.memory_space<vmem>>, vector<8x64xf32>,
    } else {
    }
    return
  }
  func.func @transform_0(%arg0: i32, %arg1: i32, %arg2: i32) -> (i32, i32) {
    %c0_i32 = arith.constant 0 : i32
    return %arg0, %arg2 : i32, i32
  }
  func.func @transform_1(%arg0: i32, %arg1: i32, %arg2: i32) -> (i32, i32) {
    %c0_i32 = arith.constant 0 : i32
    return %arg1, %arg2 : i32, i32
  }
  func.func @transform_2(%arg0: i32, %arg1: i32, %arg2: i32) -> (i32, i32) {
    %c0_i32 = arith.constant 0 : i32
    %c0_i32_0 = arith.constant 0 : i32
    return %c0_i32, %arg1 : i32, i32
  }
  func.func @transform_3(%arg0: i32, %arg1: i32, %arg2: i32) -> (i32, i32) {
    %c0_i32 = arith.constant 0 : i32
    return %arg0, %arg1 : i32, i32
  }
}

module attributes {stable_mosaic.version = 11 : i64} {
  func.func @kernel(%arg0: i32, %arg1: i32, %arg2: i32, %arg3: memref<8x32xbf16, #tpu.memory_space<vmem>>, %arg4: memref<32x32xbf16, #tpu.memory_space<vmem>>, %arg5: memref<1x32xf32, #tpu.memory_space<vmem>>, %arg6: memref<8x32xbf16, #tpu.memory_space<vmem>>, %arg7: memref<8x32xf32, #tpu.memory_space<vmem>>) attributes {dimension_semantics = [#tpu.dimension_semantics<parallel>, #tpu.dimension_semantics<parallel>, #tpu.dimension_semantics<arbitrary>], iteration_bounds = array<i64: 1, 1, 1>, scalar_prefetch = 0 : i64, scratch_operands = 1 : i64, tpu.core_type = #tpu.core_type<tc>, window_params = [{transform_indices = @transform_0, window_bounds = array<i64: 8, 32>}, {transform_indices = @transform_1, window_bounds = array<i64: 32, 32>}, {transform_indices = @transform_2, window_bounds = array<i64: 1, 32>}, {transform_indices = @transform_3, window_bounds = array<i64: 8, 32>}]} {
    %c0_i32 = arith.constant 0 : i32
    %0 = arith.cmpi eq, %arg2, %c0_i32 : i32
    %1 = arith.extui %0 : i1 to i32
    %c0_i32_0 = arith.constant 0 : i32
    %2 = arith.cmpi ne, %1, %c0_i32_0 : i32
    scf.if %2 {
      %cst_10 = arith.constant 0.000000e+00 : f32
      %12 = vector.broadcast %cst_10 : f32 to vector<8x32xf32>
      %c0_11 = arith.constant 0 : index
      %c0_12 = arith.constant 0 : index
      %13 = vector.load %arg7[%c0_11, %c0_12] : memref<8x32xf32, #tpu.memory_space<vmem>>, vector<8x32xf32>
      tpu.vector_store %arg7[%c0_11, %c0_12], %12 {strides = array<i32>} : memref<8x32xf32, #tpu.memory_space<vmem>>, vector<8x32xf32>,
    } else {
    }
    %c0 = arith.constant 0 : index
    %c0_1 = arith.constant 0 : index
    %3 = vector.load %arg3[%c0, %c0_1] : memref<8x32xbf16, #tpu.memory_space<vmem>>, vector<8x32xbf16>
    %c0_2 = arith.constant 0 : index
    %c0_3 = arith.constant 0 : index
    %4 = vector.load %arg4[%c0_2, %c0_3] : memref<32x32xbf16, #tpu.memory_space<vmem>>, vector<32x32xbf16>
    %c0_4 = arith.constant 0 : index
    %c0_5 = arith.constant 0 : index
    %5 = vector.load %arg7[%c0_4, %c0_5] : memref<8x32xf32, #tpu.memory_space<vmem>>, vector<8x32xf32>
    %cst = arith.constant dense<0.000000e+00> : vector<8x32xf32>
    %6 = tpu.matmul %3, %4, %cst {dimension_numbers = #tpu.dot_dimension_numbers<[1], [0], [0], [1], [0, 0, 1, 1], [], []>} : vector<8x32xbf16>, vector<32x32xbf16>, vector<8x32xf32> -> vector<8x32xf32>
    %7 = arith.addf %5, %6 : vector<8x32xf32>
    %c0_6 = arith.constant 0 : index
    %c0_7 = arith.constant 0 : index
    %8 = vector.load %arg7[%c0_6, %c0_7] : memref<8x32xf32, #tpu.memory_space<vmem>>, vector<8x32xf32>
    tpu.vector_store %arg7[%c0_6, %c0_7], %7 {strides = array<i32>} : memref<8x32xf32, #tpu.memory_space<vmem>>, vector<8x32xf32>,
    %c0_i32_8 = arith.constant 0 : i32
    %9 = arith.cmpi eq, %arg2, %c0_i32_8 : i32
    %10 = arith.extui %9 : i1 to i32
    %c0_i32_9 = arith.constant 0 : i32
    %11 = arith.cmpi ne, %10, %c0_i32_9 : i32
    scf.if %11 {
      %c0_10 = arith.constant 0 : index
      %c0_11 = arith.constant 0 : index
      %12 = vector.load %arg7[%c0_10, %c0_11] : memref<8x32xf32, #tpu.memory_space<vmem>>, vector<8x32xf32>
      %c0_12 = arith.constant 0 : index
      %c0_13 = arith.constant 0 : index
      %13 = vector.load %arg5[%c0_12, %c0_13] : memref<1x32xf32, #tpu.memory_space<vmem>>, vector<1x32xf32>
      %14 = vector.broadcast %13 : vector<1x32xf32> to vector<8x32xf32>
      %15 = arith.addf %12, %14 : vector<8x32xf32>
      %cst_14 = arith.constant 5.000000e-01 : f32
      %16 = vector.broadcast %cst_14 : f32 to vector<8x32xf32>
      %17 = arith.mulf %16, %15 : vector<8x32xf32>
      %cst_15 = arith.constant 0.707106769 : f32
      %18 = vector.broadcast %cst_15 : f32 to vector<8x32xf32>
      %19 = arith.mulf %15, %18 : vector<8x32xf32>
      %cst_16 = arith.constant 0.000000e+00 : f32
      %20 = vector.broadcast %cst_16 : f32 to vector<8x32xf32>
      %21 = arith.cmpf olt, %19, %20 : vector<8x32xf32>
      %cst_17 = arith.constant -1.000000e+00 : f32
      %cst_18 = arith.constant 1.000000e+00 : f32
      %22 = vector.broadcast %cst_17 : f32 to vector<8x32xf32>
      %23 = vector.broadcast %cst_18 : f32 to vector<8x32xf32>
      %24 = arith.select %21, %22, %23 : vector<8x32xi1>, vector<8x32xf32>
      %25 = math.absf %19 : vector<8x32xf32>
      %cst_19 = arith.constant 0.327591091 : f32
      %26 = vector.broadcast %cst_19 : f32 to vector<8x32xf32>
      %27 = arith.mulf %26, %25 : vector<8x32xf32>
      %cst_20 = arith.constant 1.000000e+00 : f32
      %28 = vector.broadcast %cst_20 : f32 to vector<8x32xf32>
      %29 = arith.addf %28, %27 : vector<8x32xf32>
      %cst_21 = arith.constant 1.000000e+00 : f32
      %30 = vector.broadcast %cst_21 : f32 to vector<8x32xf32>
      %31 = arith.divf %30, %29 : vector<8x32xf32>
      %cst_22 = arith.constant 1.06140542 : f32
      %32 = vector.broadcast %cst_22 : f32 to vector<8x32xf32>
      %33 = arith.mulf %32, %31 : vector<8x32xf32>
      %cst_23 = arith.constant -1.45315206 : f32
      %34 = vector.broadcast %cst_23 : f32 to vector<8x32xf32>
      %35 = arith.addf %33, %34 : vector<8x32xf32>
      %36 = arith.mulf %35, %31 : vector<8x32xf32>
      %cst_24 = arith.constant 1.42141378 : f32
      %37 = vector.broadcast %cst_24 : f32 to vector<8x32xf32>
      %38 = arith.addf %36, %37 : vector<8x32xf32>
      %39 = arith.mulf %38, %31 : vector<8x32xf32>
      %cst_25 = arith.constant -0.284496725 : f32
      %40 = vector.broadcast %cst_25 : f32 to vector<8x32xf32>
      %41 = arith.addf %39, %40 : vector<8x32xf32>
      %42 = arith.mulf %41, %31 : vector<8x32xf32>
      %cst_26 = arith.constant 0.254829586 : f32
      %43 = vector.broadcast %cst_26 : f32 to vector<8x32xf32>
      %44 = arith.addf %42, %43 : vector<8x32xf32>
      %45 = arith.mulf %44, %31 : vector<8x32xf32>
      %cst_27 = arith.constant 0.000000e+00 : f32
      %46 = vector.broadcast %cst_27 : f32 to vector<8x32xf32>
      %47 = arith.subf %46, %25 : vector<8x32xf32>
      %48 = arith.mulf %47, %25 : vector<8x32xf32>
      %49 = math.exp %48 : vector<8x32xf32>
      %50 = arith.mulf %45, %49 : vector<8x32xf32>
      %cst_28 = arith.constant 1.000000e+00 : f32
      %51 = vector.broadcast %cst_28 : f32 to vector<8x32xf32>
      %52 = arith.subf %51, %50 : vector<8x32xf32>
      %53 = arith.mulf %24, %52 : vector<8x32xf32>
      %cst_29 = arith.constant 1.000000e+00 : f32
      %54 = vector.broadcast %cst_29 : f32 to vector<8x32xf32>
      %55 = arith.addf %54, %53 : vector<8x32xf32>
      %56 = arith.mulf %17, %55 : vector<8x32xf32>
      %57 = arith.truncf %56 : vector<8x32xf32> to vector<8x32xbf16>
      %c0_30 = arith.constant 0 : index
      %c0_31 = arith.constant 0 : index
      %58 = vector.load %arg6[%c0_30, %c0_31] : memref<8x32xbf16, #tpu.memory_space<vmem>>, vector<8x32xbf16>
      tpu.vector_store %arg6[%c0_30, %c0_31], %57 {strides = array<i32>} : memref<8x32xbf16, #tpu.memory_space<vmem>>, vector<8x32xbf16>,
    } else {
    }
    return
  }
  func.func @transform_0(%arg0: i32, %arg1: i32, %arg2: i32) -> (i32, i32) {
    %c0_i32 = arith.constant 0 : i32
    return %arg0, %arg2 : i32, i32
  }
  func.func @transform_1(%arg0: i32, %arg1: i32, %arg2: i32) -> (i32, i32) {
    %c0_i32 = arith.constant 0 : i32
    return %arg2, %arg1 : i32, i32
  }
  func.func @transform_2(%arg0: i32, %arg1: i32, %arg2: i32) -> (i32, i32) {
    %c0_i32 = arith.constant 0 : i32
    %c0_i32_0 = arith.constant 0 : i32
    return %c0_i32, %arg1 : i32, i32
  }
  func.func @transform_3(%arg0: i32, %arg1: i32, %arg2: i32) -> (i32, i32) {
    %c0_i32 = arith.constant 0 : i32
    return %arg0, %arg1 : i32, i32
  }
}

</mosaic_0001>

<bundles_post_ra>
// kernel: _lambda_.30
= control target key start
LH: loop header
LB: loop body
LE: loop exit
PB: predicated region body
PF: predicated region fallthrough
CT: control target
= control target key end

     0   :  { %vm19_vm0 = vcmask 261120   ;;  %v123_v0 = vmov 0.0   ;;  %vm124_vm1 = vmmov 0   ;;  %vm98_vm2 = vcmask 257024   ;;  %s163_s1 = inlined_call_operand.vmem [shape: bf16[32,32], index: 1, kind: input, shape index: {}]   ;;  %s164_s0 = inlined_call_operand.vmem [shape: bf16[8,32], index: 0, kind: input, shape index: {}]   ;;  %s165_s2 = inlined_call_operand.vmem [shape: f32[1,32], index: 2, kind: input, shape index: {}]   ;;  %s166_s3 = inlined_call_operand.vmem [shape: bf16[8,32], index: 3, kind: output, shape index: {}]  }
   0x1   :  { %111 = vmatprep.subr.bf16.mxu0 %v123_v0  ;;  %v121_v1 = vld [vmem:[%s163_s1] sm:$0xff]   ;;  %115 = vmatprep.mubr.msk.bf16.mxu0 %vm124_vm1, %v123_v0  ;;  %20 = vst.msk [vmem:[#allocation2] sm:$0xff] %vm19_vm0, %v123_v0  ;;  %v122_v2 = vld [vmem:[%s163_s1 + $0x8] sm:$0xff]  }
   0x2   :  { %112 = vmatpush3.bf16.msra.mxu0 %v121_v1  ;;  %v21_v3 = vld [vmem:[%s164_s0] sm:$0xf] }
   0x3   :  { %113 = vmatprep.subr.bf16.mxu0 %v123_v0  ;;  %v107_v10 = vld [vmem:[%s165_s2] ss:$0 sm:$0xff] }
   0x6   :  { %114 = vmatpush3.bf16.msra.mxu0 %v122_v2 }
   0x8   :  { %v26_v4 = vld [vmem:[#allocation2] sm:$0xff] }
   0x9   :  { %116 = vmatmul.mubr.msk.bf16.vlgmr.msra.gmra.mrb[0].mxu0 %vm19_vm0, %v21_v3 }
  0xdc   :  { %v77_v5 = vpop.f32.mrb[0].mxu0 }
  0xdd   :  { %v83_v6 = vadd.f32 %v77_v5, %v26_v4  ;;  %v117_v7 = vpop.f32.mrb[1].mxu0 }
  0xde   :  { %v80_v8 = vpop.f32.mrb[2].mxu0 }
  0xdf   :  { %84 = vst.msk [vmem:[#allocation2] sm:$0xff] %vm19_vm0, %v83_v6  ;;  %v118_v9 = vpop.f32.mrb[3].mxu0 }
  0xe6   :  { %v88_v11 = vld [vmem:[#allocation2] sm:$0xff] }
  0xe7   :  { %v96_v12 = vadd.f32 %v107_v10, %v88_v11 }
  0xe9   :  { %v97_v13 = vpack.c.bf16 %v96_v12, %v96_v12 }
  0xeb   :  { %99 = vst.msk [vmem:[%s166_s3] sm:$0xf] %vm98_vm2, %v97_v13 }

// kernel: _lambda_.28
= control target key start
LH: loop header
LB: loop body
LE: loop exit
PB: predicated region body
PF: predicated region fallthrough
CT: control target
= control target key end

     0   :  { %vm16_vm0 = vcmask 261120   ;;  %vm48_vm1 = vcmask 257024   ;;  %s90_s0 = inlined_call_operand.vmem [shape: bf16[8,32], index: 0, kind: input, shape index: {}]   ;;  %s91_s1 = inlined_call_operand.vmem [shape: f32[1,32], index: 1, kind: input, shape index: {}]   ;;  %s92_s2 = inlined_call_operand.vmem [shape: f32[1,32], index: 2, kind: input, shape index: {}]   ;;  %s93_s3 = inlined_call_operand.vmem [shape: bf16[8,32], index: 3, kind: output, shape index: {}]  }
   0x1   :  { %v14_v0 = vld [vmem:[%s90_s0] sm:$0xf] }
   0x2   :  { %v15_v1 = vunpack.c.l.bf16 %v14_v0  ;;  %v54_v12 = vld [vmem:[%s91_s1] ss:$0 sm:$0xff] }
   0x3   :  { %v55_v14 = vld [vmem:[%s92_s2] ss:$0 sm:$0xff] }
   0x4   :  { %v17_v2 = vsel %vm16_vm0, %v15_v1, 0.0 }
   0x5   :  { %18 = vadd.xlane.f32.xlu0 %v17_v2 }
  0x92   :  { %v19_v3 = vpop.xlane.xlu0 %18 }
  0x93   :  { %v21_v4 = vmul.f32 0.03125, %v19_v3 }
  0x95   :  { %v22_v5 = vsub.f32 %v15_v1, %v21_v4 }
  0x97   :  { %v23_v6 = vmul.f32 %v22_v5, %v22_v5 }
  0x99   :  { %v24_v7 = vsel %vm16_vm0, %v23_v6, 0.0 }
  0x9a   :  { %25 = vadd.xlane.f32.xlu0 %v24_v7 }
 0x127   :  { %v26_v8 = vpop.xlane.xlu0 %25 }
 0x128   :  { %v27_v9 = vmul.f32 0.03125, %v26_v8 }
 0x12a   :  { %v28_v10 = vadd.f32 1e-05, %v27_v9 }
 0x12c   :  { %56 = vrsqrt.f32 %v28_v10 }
 0x136   :  { %v57_v11 = vpop.eup %56 }
 0x137   :  { %v30_v13 = vmul.f32 %v57_v11, %v22_v5 }
 0x139   :  { %v38_v15 = vmul.f32 %v54_v12, %v30_v13 }
 0x13b   :  { %v46_v16 = vadd.f32 %v55_v14, %v38_v15 }
 0x13d   :  { %v47_v17 = vpack.c.bf16 %v46_v16, %v46_v16 }
 0x13f   :  { %49 = vst.msk [vmem:[%s93_s3] sm:$0xf] %vm48_vm1, %v47_v17 }

// kernel: _lambda_.27
= control target key start
LH: loop header
LB: loop body
LE: loop exit
PB: predicated region body
PF: predicated region fallthrough
CT: control target
= control target key end

     0   :  { %vm20_vm0 = vcmask 261120   ;;  %vm94_vm1 = vcmask 257024   ;;  %s167_s0 = inlined_call_operand.vmem [shape: bf16[24,32], index: 0, kind: input, shape index: {}]   ;;  %s168_s1 = inlined_call_operand.vmem [shape: f32[1,32], index: 1, kind: input, shape index: {}]   ;;  %s169_s2 = inlined_call_operand.vmem [shape: f32[1,32], index: 2, kind: input, shape index: {}]   ;;  %s170_s3 = inlined_call_operand.vmem [shape: bf16[24,32], index: 3, kind: output, shape index: {}]  }
   0x1   :  { %v111_v0 = vld [vmem:[%s167_s0] sm:$0xff]   ;;  %v16_v1 = vld [vmem:[%s167_s0 + $0x8] sm:$0xf] }
   0x2   :  { %v112_v2 = vunpack.c.l.bf16 %v111_v0  ;;  %v19_v3 = vunpack.c.l.bf16 %v16_v1  ;;  %v113_v4 = vunpack.c.h.bf16 %v111_v0  ;;  %v102_v33 = vld [vmem:[%s168_s1] ss:$0 sm:$0xff] }
   0x3   :  { %v103_v35 = vld [vmem:[%s169_s2] ss:$0 sm:$0xff] }
   0x4   :  { %v21_v5 = vsel %vm20_vm0, %v112_v2, 0.0  ;;  %v27_v6 = vsel %vm20_vm0, %v19_v3, 0.0  ;;  %v24_v7 = vsel %vm20_vm0, %v113_v4, 0.0 }
   0x5   :  { %22 = vadd.xlane.f32.xlu0 %v21_v5  ;;  %28 = vadd.xlane.f32.xlu1 %v27_v6 }
   0x9   :  { %25 = vadd.xlane.f32.xlu0 %v24_v7 }
  0x92   :  { %v23_v8 = vpop.xlane.xlu0 %22  ;;  %v29_v9 = vpop.xlane.xlu1 %28 }
  0x93   :  { %v31_v10 = vmul.f32 0.03125, %v23_v8  ;;  %v33_v11 = vmul.f32 0.03125, %v29_v9 }
  0x95   :  { %v34_v12 = vsub.f32 %v112_v2, %v31_v10  ;;  %v36_v13 = vsub.f32 %v19_v3, %v33_v11 }
  0x96   :  { %v26_v14 = vpop.xlane.xlu0 %25 }
  0x97   :  { %v32_v15 = vmul.f32 0.03125, %v26_v14  ;;  %v37_v16 = vmul.f32 %v34_v12, %v34_v12  ;;  %v39_v17 = vmul.f32 %v36_v13, %v36_v13 }
  0x99   :  { %v35_v18 = vsub.f32 %v113_v4, %v32_v15  ;;  %v40_v19 = vsel %vm20_vm0, %v37_v16, 0.0  ;;  %v46_v20 = vsel %vm20_vm0, %v39_v17, 0.0 }
  0x9a   :  { %41 = vadd.xlane.f32.xlu1 %v40_v19 }
  0x9b   :  { %v38_v21 = vmul.f32 %v35_v18, %v35_v18 }
  0x9d   :  { %v43_v22 = vsel %vm20_vm0, %v38_v21, 0.0 }
  0x9e   :  { %47 = vadd.xlane.f32.xlu1 %v46_v20  ;;  %44 = vadd.xlane.f32.xlu0 %v43_v22 }
 0x127   :  { %v42_v23 = vpop.xlane.xlu1 %41 }
 0x128   :  { %v49_v24 = vmul.f32 0.03125, %v42_v23 }
 0x12a   :  { %v52_v25 = vadd.f32 1e-05, %v49_v24 }
 0x12b   :  { %v48_v26 = vpop.xlane.xlu1 %47  ;;  %v45_v27 = vpop.xlane.xlu0 %44 }
 0x12c   :  { %114 = vrsqrt.f32 %v52_v25  ;;  %v51_v28 = vmul.f32 0.03125, %v48_v26  ;;  %v50_v29 = vmul.f32 0.03125, %v45_v27 }
 0x12e   :  { %v54_v30 = vadd.f32 1e-05, %v51_v28  ;;  %v53_v31 = vadd.f32 1e-05, %v50_v29 }
 0x130   :  { %116 = vrsqrt.f32 %v54_v30 }
 0x131   :  { %118 = vrsqrt.f32 %v53_v31 }
 0x136   :  { %v115_v32 = vpop.eup %114 }
 0x137   :  { %v58_v34 = vmul.f32 %v115_v32, %v34_v12 }
 0x139   :  { %v68_v36 = vmul.f32 %v102_v33, %v58_v34 }
 0x13a   :  { %v117_v37 = vpop.eup %116 }
 0x13b   :  { %v119_v38 = vpop.eup %118  ;;  %v78_v39 = vadd.f32 %v103_v35, %v68_v36  ;;  %v60_v40 = vmul.f32 %v117_v37, %v36_v13 }
 0x13c   :  { %v59_v41 = vmul.f32 %v119_v38, %v35_v18 }
 0x13d   :  { %v107_v42 = vpack.c.bf16 %v78_v39, %v78_v39  ;;  %v70_v43 = vmul.f32 %v102_v33, %v60_v40 }
 0x13e   :  { %v69_v44 = vmul.f32 %v102_v33, %v59_v41 }
 0x13f   :  { %95 = vst.msk [vmem:[%s170_s3] sm:$0xf] %vm94_vm1, %v107_v42  ;;  %v80_v45 = vadd.f32 %v103_v35, %v70_v43 }
 0x140   :  { %v79_v46 = vadd.f32 %v103_v35, %v69_v44 }
 0x141   :  { %v109_v47 = vpack.c.bf16 %v80_v45, %v80_v45 }
 0x142   :  { %v108_v48 = vpack.c.bf16 %v79_v46, %v79_v46 }
 0x143   :  { %97 = vst.msk [vmem:[%s170_s3 + $0x8] sm:$0xf] %vm94_vm1, %v109_v47 }
 0x144   :  { %96 = vst.msk [vmem:[%s170_s3 + $0x4] sm:$0xf] %vm94_vm1, %v108_v48 }

// kernel: _lambda_.29
= control target key start
LH: loop header
LB: loop body
LE: loop exit
PB: predicated region body
PF: predicated region fallthrough
CT: control target
= control target key end

     0   :  { %vm19_vm0 = vcmask 785408   ;;  %v182_v1 = vmov 0.0   ;;  %vm53_vm1 = vcmask 261120   ;;  %vm144_vm2 = vcmask 781312   ;;  %s233_s1 = inlined_call_operand.vmem [shape: bf16[32,96], index: 1, kind: input, shape index: {}]   ;;  %s234_s0 = inlined_call_operand.vmem [shape: bf16[24,32], index: 0, kind: input, shape index: {}]   ;;  %s235_s2 = inlined_call_operand.vmem [shape: f32[1,96], index: 2, kind: input, shape index: {}]   ;;  %s236_s3 = inlined_call_operand.vmem [shape: bf16[24,96], index: 3, kind: output, shape index: {}]  }
   0x1   :  { %v178_v0 = vld [vmem:[%s233_s1] sm:$0xff]   ;;  %22 = vst.msk [vmem:[#allocation2 + $0x10] sm:$0xff] %vm19_vm0, %v182_v1  ;;  %20 = vst.msk [vmem:[#allocation2] sm:$0xff] %vm19_vm0, %v182_v1  ;;  %v179_v2 = vld [vmem:[%s233_s1 + $0x8] sm:$0xff]  }
   0x2   :  { %21 = vst.msk [vmem:[#allocation2 + $0x8] sm:$0xff] %vm19_vm0, %v182_v1  ;;  %169 = vmatprep.subr.bf16.mxu0 %v178_v0  ;;  %v180_v3 = vld [vmem:[%s234_s0] sm:$0xff]   ;;  %v181_v4 = vld [vmem:[%s234_s0 + $0x8] ss:$0 sps:$4 sm:$0xff]  }
   0x3   :  { %170 = vmatpush3.bf16.msra.mxu0 %v178_v0  ;;  %173 = vmatprep.mubr.msk.bf16.mxu0 %vm53_vm1, %v180_v3  ;;  %v158_v15 = vld [vmem:[%s235_s2] ss:$0 sm:$0xff] }
   0x4   :  { %171 = vmatprep.subr.bf16.mxu0 %v179_v2 }
   0x7   :  { %172 = vmatpush3.bf16.msra.mxu0 %v179_v2 }
   0x8   :  { %v32_v5 = vld [vmem:[#allocation2 + $0x10] sm:$0xff]  ;;  %v30_v6 = vld [vmem:[#allocation2] sm:$0xff] }
   0x9   :  { %v31_v10 = vld [vmem:[#allocation2 + $0x8] sm:$0xff] }
   0xa   :  { %174 = vmatmul.mubr.msk.bf16.vlgmr.msra.gmra.mrb[0].mxu0 %vm53_vm1, %v181_v4 }
  0xdd   :  { %v175_v7 = vpop.f32.mrb[0].mxu0 }
  0xde   :  { %v110_v8 = vadd.f32 %v175_v7, %v32_v5  ;;  %v94_v9 = vpop.f32.mrb[1].mxu0 }
  0xdf   :  { %v108_v11 = vadd.f32 %v94_v9, %v30_v6  ;;  %v176_v12 = vpop.f32.mrb[2].mxu0 }
  0xe0   :  { %114 = vst.msk [vmem:[#allocation2 + $0x10] sm:$0xff] %vm19_vm0, %v110_v8  ;;  %v97_v13 = vpop.f32.mrb[3].mxu0 }
  0xe1   :  { %112 = vst.msk [vmem:[#allocation2] sm:$0xff] %vm19_vm0, %v108_v11  ;;  %v109_v14 = vadd.f32 %v97_v13, %v31_v10 }
  0xe3   :  { %113 = vst.msk [vmem:[#allocation2 + $0x8] sm:$0xff] %vm19_vm0, %v109_v14 }
  0xe7   :  { %v120_v16 = vld [vmem:[#allocation2 + $0x10] sm:$0xff] }
  0xe8   :  { %v130_v17 = vadd.f32 %v158_v15, %v120_v16  ;;  %v118_v18 = vld [vmem:[#allocation2] sm:$0xff] }
  0xe9   :  { %v128_v19 = vadd.f32 %v158_v15, %v118_v18 }
  0xea   :  { %v164_v20 = vpack.c.bf16 %v130_v17, %v130_v17  ;;  %v119_v21 = vld [vmem:[#allocation2 + $0x8] sm:$0xff] }
  0xeb   :  { %v162_v22 = vpack.c.bf16 %v128_v19, %v128_v19  ;;  %v129_v23 = vadd.f32 %v158_v15, %v119_v21 }
  0xec   :  { %147 = vst.msk [vmem:[%s236_s3 + $0x8] sm:$0xf] %vm144_vm2, %v164_v20 }
  0xed   :  { %145 = vst.msk [vmem:[%s236_s3] sm:$0xf] %vm144_vm2, %v162_v22  ;;  %v163_v24 = vpack.c.bf16 %v129_v23, %v129_v23 }
  0xef   :  { %146 = vst.msk [vmem:[%s236_s3 + $0x4] sm:$0xf] %vm144_vm2, %v163_v24 }

// kernel: _lambda_.40
= control target key start
LH: loop header
LB: loop body
LE: loop exit
PB: predicated region body
PF: predicated region fallthrough
CT: control target
= control target key end

     0   :  { %vm19_vm0 = vcmask 261120   ;;  %v150_v0 = vmov 0.0   ;;  %vm151_vm1 = vmmov 0   ;;  %vm55_vm2 = vcmask 523264   ;;  %s195_s1 = inlined_call_operand.vmem [shape: bf16[64,32], index: 1, kind: input, shape index: {}]   ;;  %s196_s0 = inlined_call_operand.vmem [shape: bf16[8,64], index: 0, kind: input, shape index: {}]   ;;  %s197_s2 = inlined_call_operand.vmem [shape: f32[1,32], index: 2, kind: input, shape index: {}]   ;;  %s198_s3 = inlined_call_operand.vmem [shape: bf16[8,32], index: 3, kind: output, shape index: {}]  }
   0x1   :  { %132 = vmatprep.subr.bf16.mxu0 %v150_v0  ;;  %v146_v1 = vld [vmem:[%s195_s1] sm:$0xff]   ;;  %140 = vmatprep.mubr.msk.bf16.mxu0 %vm151_vm1, %v150_v0  ;;  %20 = vst.msk [vmem:[#allocation2] sm:$0xff] %vm19_vm0, %v150_v0  ;;  %v147_v2 = vld [vmem:[%s195_s1 + $0x8] sm:$0xff]   ;;  %v148_v3 = vld [vmem:[%s195_s1 + $0x10] sm:$0xff]   ;;  %vm115_vm3 = vcmask 257024  }
   0x2   :  { %133 = vmatpush3.bf16.msra.mxu0 %v146_v1  ;;  %v149_v4 = vld [vmem:[%s195_s1 + $0x18] sm:$0xff]   ;;  %v21_v5 = vld [vmem:[%s196_s0] sm:$0xf] }
   0x3   :  { %134 = vmatprep.subr.bf16.mxu0 %v150_v0  ;;  %v126_v12 = vld [vmem:[%s197_s2] ss:$0 sm:$0xff] }
   0x6   :  { %135 = vmatpush3.bf16.msra.mxu0 %v147_v2 }
   0x7   :  { %136 = vmatprep.subr.bf16.mxu0 %v150_v0 }
   0x8   :  { %v30_v6 = vld [vmem:[#allocation2] sm:$0xff] }
   0xa   :  { %137 = vmatpush3.bf16.msra.mxu0 %v148_v3 }
   0xb   :  { %138 = vmatprep.subr.bf16.mxu0 %v150_v0 }
   0xe   :  { %139 = vmatpush3.bf16.msra.mxu0 %v149_v4 }
  0x11   :  { %141 = vmatmul.mubr.msk.bf16.vlgmr.msra.gmra.mrb[0].mxu0 %vm55_vm2, %v21_v5 }
  0xe4   :  { %v93_v7 = vpop.f32.mrb[0].mxu0 }
  0xe5   :  { %v99_v8 = vadd.f32 %v93_v7, %v30_v6  ;;  %v142_v9 = vpop.f32.mrb[1].mxu0 }
  0xe6   :  { %v96_v10 = vpop.f32.mrb[2].mxu0 }
  0xe7   :  { %101 = vst.msk [vmem:[#allocation2] sm:$0xff] %vm19_vm0, %v99_v8  ;;  %v143_v11 = vpop.f32.mrb[3].mxu0 }
  0xee   :  { %v105_v13 = vld [vmem:[#allocation2] sm:$0xff] }
  0xef   :  { %v113_v14 = vadd.f32 %v126_v12, %v105_v13 }
  0xf1   :  { %v114_v15 = vpack.c.bf16 %v113_v14, %v113_v14 }
  0xf3   :  { %116 = vst.msk [vmem:[%s198_s3] sm:$0xf] %vm115_vm3, %v114_v15 }

// kernel: _lambda_.32
= control target key start
LH: loop header
LB: loop body
LE: loop exit
PB: predicated region body
PF: predicated region fallthrough
CT: control target
= control target key end

     0   :  { %s1054_s15 = smov 0   ;;  %s1175_s0 = inlined_call_operand.vmem [shape: bf16[2,4,4,8], index: 0, kind: input, shape index: {}]   ;;  %s1176_s1 = inlined_call_operand.vmem [shape: bf16[2,4,12,8], index: 1, kind: input, shape index: {}]   ;;  %s1177_s2 = inlined_call_operand.vmem [shape: bf16[2,4,12,8], index: 2, kind: input, shape index: {}]   ;;  %s1178_s3 = inlined_call_operand.vmem [shape: bf16[2,4,4,12], index: 3, kind: input, shape index: {}]   ;;  %s1179_s4 = inlined_call_operand.vmem [shape: bf16[2,4,4,8], index: 4, kind: output, shape index: {}]  }
   0x1 LB: > { %s862_s16 = sadd.s32 4294967295, %s1025_s15   ;;  %p866_p0 = scmp.ge.s32.totalorder %s1025_s15, 1  ;;  %s1025_s15 = sphi %s1054_s15, %s14_s15  }
   0x2   : > { %p192_p1 = scmp.lt.s32.totalorder %s1025_s15, 3 }
   0x4   : > { %p193_p2 = pnand %p866_p0, %p192_p1 }
   0x5   : > { %p233_p3 = scmp.lt.s32.totalorder (!%p193_p2), %s862_s16, 1  ;;  %v1027_v0 = vmov (!%p193_p2), 0.0   ;;  %vm1028_vm0 = vmmov (!%p193_p2), 0   ;;  %vm271_vm1 = vcmask (!%p193_p2), 64512   ;;  %vm318_vm2 = vcmask (!%p193_p2), 93184  }
   0x6   : > { %196 = sbr.rel (%p193_p2) target bundleno = 1324 (0x52c), region = 36  ;;  %937 = vmatprep.subr.bf16.mxu0 (!%p193_p2), %v1027_v0  ;;  %939 = vmatprep.mubr.msk.bf16.mxu0 (!%p193_p2), %vm1028_vm0, %v1027_v0  ;;  %vm340_vm3 = vcmask (!%p193_p2), 1045504   ;;  %vm336_vm4 = vcmask (!%p193_p2), 97280   ;;  %vm385_vm5 = vcmask (!%p193_p2), 58368  }
   0x7   : > { %943 = vmatprep.subr.bf16.mxu1 (!%p193_p2), %v1027_v0  ;;  %945 = vmatprep.mubr.msk.bf16.mxu1 (!%p193_p2), %vm1028_vm0, %v1027_v0 }
   0xd   : > { %s1181_s16 = smov (!%p233_p3, %s862_s16), 1 }
   0xe   : > { %s917_s17 = sshll.u32 %s1181_s16, 5  ;;  %s1080_s21 = sshll.u32 %s1181_s16, 3 }
   0xf   : > { %s1076_s20 = scalar_lea.vmem %s1176_s1, %s917_s17  ;;  %s1087_s24 = scalar_lea.vmem %s1175_s0, %s1080_s21 }
  0x10   : > { %v995_v1 = vld [vmem:[%s1076_s20] sm:$0x3f]   ;;  %s1098_s27 = scalar_lea.vmem %s1178_s3, %s1080_s21  ;;  %s1108_s30 = scalar_lea.vmem %s1177_s2, %s917_s17  ;;  %v997_v20 = vld [vmem:[%s1076_s20 + $0x8] sm:$0x3f]   ;;  %v998_v25 = vld [vmem:[%s1076_s20 + $0x10] sm:$0x3f]  }
  0x11   : > { %v276_v2 = vsel %vm271_vm1, %v995_v1, 0  ;;  %v259_v3 = vld [vmem:[%s1087_s24] sm:$0x3]  ;;  %v407_v24 = vsel %vm271_vm1, %v997_v20, 0  ;;  %v881_v26 = vld [vmem:[%s1087_s24 + $0x2] sm:$0x3]  ;;  %s1138_s7 = scalar_lea.vmem %s1179_s4, %s1080_s21 }
  0x12   : > { %938 = vmatpush3.bf16.xpose.msra.mxu0 %v276_v2  ;;  %v264_v4 = vld [vmem:[%s1098_s27] sm:$0x3]  ;;  %v535_v27 = vsel %vm271_vm1, %v998_v25, 0  ;;  %v999_v28 = vld [vmem:[%s1076_s20 + $0x18] sm:$0x3f]  }
  0x13   : > { %955 = vmatprep.subr.bf16.mxu0 %v1027_v0  ;;  %v265_v5 = vunpack.c.l.bf16 %v264_v4  ;;  %v996_v17 = vld [vmem:[%s1108_s30] sm:$0x3f]   ;;  %v663_v30 = vsel %vm271_vm1, %v999_v28, 0  ;;  %v903_v31 = vld [vmem:[%s1087_s24 + $0x6] sm:$0x3] }
  0x14   : > { %v342_v18 = vsel %vm340_vm3, %v996_v17, 0  ;;  %v892_v29 = vld [vmem:[%s1087_s24 + $0x4] sm:$0x3]  ;;  %v886_v36 = vld [vmem:[%s1098_s27 + $0x2] sm:$0x3] }
  0x15   : > { %944 = vmatpush3.bf16.msra.mxu1 %v342_v18  ;;  %v397_v38 = vunpack.c.l.bf16 %v886_v36  ;;  %v897_v43 = vld [vmem:[%s1098_s27 + $0x4] sm:$0x3]  ;;  %v908_v51 = vld [vmem:[%s1098_s27 + $0x6] sm:$0x3]  ;;  %v1001_v17 = vld [vmem:[%s1108_s30 + $0x10] sm:$0x3f]  }
  0x16   : > { %949 = vmatprep.subr.bf16.mxu1 %v1027_v0  ;;  %v525_v46 = vunpack.c.l.bf16 %v897_v43  ;;  %v653_v54 = vunpack.c.l.bf16 %v908_v51 }
  0x19   : > { %940 = vmatmul.mubr.msk.bf16.vlgmr.msra.gmra.mrb[0].mxu0 %vm271_vm1, %v259_v3 }
  0x1a   : > { %957 = vmatprep.mubr.msk.bf16.mxu0 %vm1028_vm0, %v1027_v0 }
  0xec   : > { %v312_v6 = vpop.f32.mrb[0].mxu0 }
  0xed   : > { %v313_v7 = vadd.f32 %v312_v6, %v265_v5  ;;  %v941_v8 = vpop.f32.mrb[1].mxu0 }
  0xee   : > { %v315_v9 = vpop.f32.mrb[2].mxu0 }
  0xef   : > { %v942_v10 = vpop.f32.mrb[3].mxu0  ;;  %v319_v11 = vsel %vm318_vm2, %v313_v7, -inf }
  0xf0   : > { %320 = vmax.xlane.f32.xlu0 %v319_v11 }
 0x17d   : > { %v321_v12 = vpop.xlane.xlu0 %320 }
 0x17e   : > { %v322_v13 = vsub.f32 %v313_v7, %v321_v12 }
 0x180   : > { %v323_v14 = vmul.f32 1.442695, %v322_v13  ;;  %v1000_v13 = vld [vmem:[%s1108_s30 + $0x8] sm:$0x3f]  }
 0x182   : > { %1003 = vpow2.f32 %v323_v14  ;;  %v470_v14 = vsel %vm340_vm3, %v1000_v13, 0 }
 0x183   : > { %956 = vmatpush3.bf16.msra.mxu0 %v470_v14 }
 0x184   : > { %967 = vmatprep.subr.bf16.mxu0 %v1027_v0 }
 0x18c   : > { %v1004_v15 = vpop.eup %1003 }
 0x18d   : > { %v325_v16 = vsel %vm318_vm2, %v1004_v15, 0.0 }
 0x18e   : > { %326 = vadd.xlane.f32.xlu0 %v325_v16 }
 0x21b   : > { %v327_v19 = vpop.xlane.xlu0 %326 }
 0x21c   : > { %1005 = vrcp.f32 %v327_v19 }
 0x226   : > { %v1006_v21 = vpop.eup %1005 }
 0x227   : > { %v329_v22 = vmul.f32 %v1006_v21, %v1004_v15  ;;  %v598_v21 = vsel %vm340_vm3, %v1001_v17, 0 }
 0x229   : > { %v330_v23 = vpack.c.bf16 %v329_v22, %v329_v22 }
 0x22b   : > { %946 = vmatmul.mubr.msk.bf16.vlgmr.msra.gmra.mrb[0].mxu1 %vm336_vm4, %v330_v23  ;;  %v1002_v23 = vld [vmem:[%s1108_s30 + $0x18] sm:$0x3f]  }
 0x22c   : > { %950 = vmatpush3.bf16.xpose.msra.mxu1 %v407_v24  ;;  %951 = vmatprep.mubr.msk.bf16.mxu1 %vm1028_vm0, %v1027_v0 }
 0x22d   : > { %961 = vmatprep.subr.bf16.mxu1 %v1027_v0 }
 0x233   : > { %952 = vmatmul.mubr.msk.bf16.vlgmr.msra.gmra.mrb[4].mxu1 %vm271_vm1, %v881_v26 }
 0x234   : > { %962 = vmatpush3.bf16.xpose.msra.mxu1 %v535_v27  ;;  %963 = vmatprep.mubr.msk.bf16.mxu1 %vm1028_vm0, %v1027_v0  ;;  %v726_v27 = vsel %vm340_vm3, %v1002_v23, 0 }
 0x235   : > { %973 = vmatprep.subr.bf16.mxu1 %v1027_v0 }
 0x23b   : > { %964 = vmatmul.mubr.msk.bf16.vlgmr.msra.gmra.mrb[8].mxu1 %vm271_vm1, %v892_v29 }
 0x23c   : > { %974 = vmatpush3.bf16.xpose.msra.mxu1 %v663_v30  ;;  %975 = vmatprep.mubr.msk.bf16.mxu1 %vm1028_vm0, %v1027_v0 }
 0x243   : > { %976 = vmatmul.mubr.msk.bf16.vlgmr.msra.gmra.mrb[12].mxu1 %vm271_vm1, %v903_v31 }
 0x2fe   : > { %v378_v32 = vpop.f32.mrb[0].mxu1 }
 0x2ff   : > { %v384_v33 = vpack.c.bf16 %v378_v32, %v378_v32  ;;  %v947_v34 = vpop.f32.mrb[1].mxu1 }
 0x300   : > { %v381_v35 = vpop.f32.mrb[2].mxu1 }
 0x301   : > { %386 = vst.msk [vmem:[%s1138_s7] sm:$0x3] %vm385_vm5, %v384_v33  ;;  %v948_v37 = vpop.f32.mrb[3].mxu1 }
 0x306   : > { %v443_v39 = vpop.f32.mrb[4].mxu1 }
 0x307   : > { %v444_v40 = vadd.f32 %v443_v39, %v397_v38  ;;  %v953_v41 = vpop.f32.mrb[5].mxu1 }
 0x308   : > { %v446_v42 = vpop.f32.mrb[6].mxu1 }
 0x309   : > { %v954_v44 = vpop.f32.mrb[7].mxu1  ;;  %v449_v45 = vsel %vm318_vm2, %v444_v40, -inf }
 0x30a   : > { %450 = vmax.xlane.f32.xlu1 %v449_v45 }
 0x30e   : > { %v571_v47 = vpop.f32.mrb[8].mxu1 }
 0x30f   : > { %v572_v48 = vadd.f32 %v571_v47, %v525_v46  ;;  %v965_v49 = vpop.f32.mrb[9].mxu1 }
 0x310   : > { %v574_v50 = vpop.f32.mrb[10].mxu1 }
 0x311   : > { %v966_v52 = vpop.f32.mrb[11].mxu1  ;;  %v577_v53 = vsel %vm318_vm2, %v572_v48, -inf }
 0x312   : > { %578 = vmax.xlane.f32.xlu1 %v577_v53 }
 0x316   : > { %v699_v55 = vpop.f32.mrb[12].mxu1 }
 0x317   : > { %v700_v56 = vadd.f32 %v699_v55, %v653_v54  ;;  %v977_v57 = vpop.f32.mrb[13].mxu1 }
 0x318   : > { %v702_v58 = vpop.f32.mrb[14].mxu1 }
 0x319   : > { %v978_v59 = vpop.f32.mrb[15].mxu1  ;;  %v705_v60 = vsel %vm318_vm2, %v700_v56, -inf }
 0x31a   : > { %706 = vmax.xlane.f32.xlu0 %v705_v60 }
 0x397   : > { %v451_v61 = vpop.xlane.xlu1 %450 }
 0x398   : > { %v452_v62 = vsub.f32 %v444_v40, %v451_v61 }
 0x39a   : > { %v453_v63 = vmul.f32 1.442695, %v452_v62 }
 0x39c   : > { %1007 = vpow2.f32 %v453_v63 }
 0x39f   : > { %v579_v1 = vpop.xlane.xlu1 %578 }
 0x3a0   : > { %v580_v2 = vsub.f32 %v572_v48, %v579_v1 }
 0x3a2   : > { %v581_v3 = vmul.f32 1.442695, %v580_v2 }
 0x3a4   : > { %1009 = vpow2.f32 %v581_v3 }
 0x3a6   : > { %v1008_v4 = vpop.eup %1007 }
 0x3a7   : > { %v707_v5 = vpop.xlane.xlu0 %706  ;;  %v455_v6 = vsel %vm318_vm2, %v1008_v4, 0.0 }
 0x3a8   : > { %v708_v7 = vsub.f32 %v700_v56, %v707_v5  ;;  %456 = vadd.xlane.f32.xlu1 %v455_v6 }
 0x3aa   : > { %v709_v8 = vmul.f32 1.442695, %v708_v7 }
 0x3ac   : > { %1011 = vpow2.f32 %v709_v8 }
 0x3ae   : > { %v1010_v9 = vpop.eup %1009 }
 0x3af   : > { %v583_v10 = vsel %vm318_vm2, %v1010_v9, 0.0 }
 0x3b0   : > { %584 = vadd.xlane.f32.xlu0 %v583_v10 }
 0x3b6   : > { %v1012_v11 = vpop.eup %1011 }
 0x3b7   : > { %v711_v12 = vsel %vm318_vm2, %v1012_v11, 0.0 }
 0x3b8   : > { %712 = vadd.xlane.f32.xlu1 %v711_v12 }
 0x435   : > { %v457_v15 = vpop.xlane.xlu1 %456 }
 0x436   : > { %1013 = vrcp.f32 %v457_v15 }
 0x43d   : > { %v585_v16 = vpop.xlane.xlu0 %584 }
 0x43e   : > { %1015 = vrcp.f32 %v585_v16 }
 0x440   : > { %v1014_v18 = vpop.eup %1013 }
 0x441   : > { %v459_v19 = vmul.f32 %v1014_v18, %v1008_v4 }
 0x443   : > { %v460_v20 = vpack.c.bf16 %v459_v19, %v459_v19 }
 0x445   : > { %958 = vmatmul.mubr.msk.bf16.vlgmr.msra.gmra.mrb[4].mxu0 %vm336_vm4, %v460_v20  ;;  %v713_v22 = vpop.xlane.xlu1 %712 }
 0x446   : > { %968 = vmatpush3.bf16.msra.mxu0 %v598_v21  ;;  %1017 = vrcp.f32 %v713_v22  ;;  %969 = vmatprep.mubr.msk.bf16.mxu0 %vm1028_vm0, %v1027_v0 }
 0x447   : > { %979 = vmatprep.subr.bf16.mxu0 %v1027_v0 }
 0x448   : > { %v1016_v24 = vpop.eup %1015 }
 0x449   : > { %v587_v25 = vmul.f32 %v1016_v24, %v1010_v9 }
 0x44b   : > { %v588_v26 = vpack.c.bf16 %v587_v25, %v587_v25 }
 0x44d   : > { %970 = vmatmul.mubr.msk.bf16.vlgmr.msra.gmra.mrb[8].mxu0 %vm336_vm4, %v588_v26 }
 0x44e   : > { %980 = vmatpush3.bf16.msra.mxu0 %v726_v27  ;;  %981 = vmatprep.mubr.msk.bf16.mxu0 %vm1028_vm0, %v1027_v0 }
 0x450   : > { %v1018_v28 = vpop.eup %1017 }
 0x451   : > { %v715_v29 = vmul.f32 %v1018_v28, %v1012_v11 }
 0x453   : > { %v716_v30 = vpack.c.bf16 %v715_v29, %v715_v29 }
 0x455   : > { %982 = vmatmul.mubr.msk.bf16.vlgmr.msra.gmra.mrb[12].mxu0 %vm336_vm4, %v716_v30 }
 0x518   : > { %v506_v31 = vpop.f32.mrb[4].mxu0 }
 0x519   : > { %v512_v32 = vpack.c.bf16 %v506_v31, %v506_v31  ;;  %v959_v33 = vpop.f32.mrb[5].mxu0 }
 0x51a   : > { %v509_v34 = vpop.f32.mrb[6].mxu0 }
 0x51b   : > { %891 = vst.msk [vmem:[%s1138_s7 + $0x2] sm:$0x3] %vm385_vm5, %v512_v32  ;;  %v960_v35 = vpop.f32.mrb[7].mxu0 }
 0x520   : > { %v634_v36 = vpop.f32.mrb[8].mxu0 }
 0x521   : > { %v640_v37 = vpack.c.bf16 %v634_v36, %v634_v36  ;;  %v971_v38 = vpop.f32.mrb[9].mxu0 }
 0x522   : > { %v637_v39 = vpop.f32.mrb[10].mxu0 }
 0x523   : > { %902 = vst.msk [vmem:[%s1138_s7 + $0x4] sm:$0x3] %vm385_vm5, %v640_v37  ;;  %v972_v0 = vpop.f32.mrb[11].mxu0 }
 0x528   : > { %v762_v40 = vpop.f32.mrb[12].mxu0 }
 0x529   : > { %v768_v41 = vpack.c.bf16 %v762_v40, %v762_v40  ;;  %v983_v42 = vpop.f32.mrb[13].mxu0 }
 0x52a   : > { %v765_v43 = vpop.f32.mrb[14].mxu0 }
 0x52b   : > { %913 = vst.msk [vmem:[%s1138_s7 + $0x6] sm:$0x3] %vm385_vm5, %v768_v41  ;;  %v984_v44 = vpop.f32.mrb[15].mxu0 }
 0x52c PF: > { %s14_s15 = sadd.s32 1, %s1025_s15  }
 0x52d   : > { %p11_p4 = scmp.ge.s32.totalorder %s14_s15, 4  }
 0x52f   :  { %13 = sbr.rel (!%p11_p4) target bundleno = 1 (0x1), region = 90 }

// kernel: _lambda_.39
= control target key start
LH: loop header
LB: loop body
LE: loop exit
PB: predicated region body
PF: predicated region fallthrough
CT: control target
= control target key end

     0   :  { %vm19_vm0 = vcmask 523264   ;;  %v156_v0 = vmov 0.0   ;;  %vm157_vm1 = vmmov 0   ;;  %vm39_vm2 = vcmask 261120   ;;  %s196_s1 = inlined_call_operand.vmem [shape: bf16[32,64], index: 1, kind: input, shape index: {}]   ;;  %s197_s0 = inlined_call_operand.vmem [shape: bf16[8,32], index: 0, kind: input, shape index: {}]   ;;  %s198_s2 = inlined_call_operand.vmem [shape: f32[1,64], index: 2, kind: input, shape index: {}]   ;;  %s199_s3 = inlined_call_operand.vmem [shape: bf16[8,64], index: 3, kind: output, shape index: {}]  }
   0x1   :  { %20 = vst.msk [vmem:[#allocation2] sm:$0xff] %vm19_vm0, %v156_v0  ;;  %139 = vmatprep.subr.bf16.mxu0 %v156_v0  ;;  %v150_v1 = vld [vmem:[%s196_s1] sm:$0xff]   ;;  %143 = vmatprep.mubr.msk.bf16.mxu0 %vm157_vm1, %v156_v0  ;;  %v151_v2 = vld [vmem:[%s196_s1 + $0x8] sm:$0xff]   ;;  %v158_v33 = vmov 1.0   ;;  %vm126_vm4 = vcmask 519168  }
   0x2   :  { %140 = vmatpush3.bf16.msra.mxu0 %v150_v1  ;;  %v21_v3 = vld [vmem:[%s197_s0] sm:$0xf] }
   0x3   :  { %141 = vmatprep.subr.bf16.mxu0 %v156_v0  ;;  %v135_v10 = vld [vmem:[%s198_s2] ss:$0 sm:$0xff] }
   0x6   :  { %142 = vmatpush3.bf16.msra.mxu0 %v151_v2 }
   0x8   :  { %v26_v4 = vld [vmem:[#allocation2] sm:$0xff] }
   0x9   :  { %144 = vmatmul.mubr.msk.bf16.vlgmr.msra.gmra.mrb[0].mxu0 %vm39_vm2, %v21_v3 }
  0xdc   :  { %v77_v5 = vpop.f32.mrb[0].mxu0 }
  0xdd   :  { %v83_v6 = vadd.f32 %v77_v5, %v26_v4  ;;  %v145_v7 = vpop.f32.mrb[1].mxu0 }
  0xde   :  { %v80_v8 = vpop.f32.mrb[2].mxu0 }
  0xdf   :  { %85 = vst.msk [vmem:[#allocation2] sm:$0xff] %vm19_vm0, %v83_v6  ;;  %v146_v9 = vpop.f32.mrb[3].mxu0 }
  0xe6   :  { %v89_v11 = vld [vmem:[#allocation2] sm:$0xff] }
  0xe7   :  { %v97_v12 = vadd.f32 %v135_v10, %v89_v11 }
  0xe9   :  { %v99_v13 = vmul.f32 0.70710677, %v97_v12  ;;  %v98_v36 = vmul.f32 0.5, %v97_v12 }
  0xeb   :  { %v102_v14 = vand.u32 2147483647, %v99_v13  ;;  %vm100_vm3 = vcmp.lt.f32.partialorder %v99_v13, 0.0 }
  0xec   :  { %v101_v34 = vsel %vm100_vm3, -1.0, %v158_v33 }
  0xed   :  { %v103_v15 = vmul.f32 0.3275911, %v102_v14  ;;  %v116_v17 = vsub.f32 0.0, %v102_v14 }
  0xef   :  { %v104_v16 = vadd.f32 1.0, %v103_v15  ;;  %v117_v19 = vmul.f32 %v116_v17, %v102_v14 }
  0xf1   :  { %152 = vrcp.f32 %v104_v16  ;;  %v118_v22 = vmul.f32 1.442695, %v117_v19 }
  0xf3   :  { %154 = vpow2.f32 %v118_v22 }
  0xfb   :  { %v153_v18 = vpop.eup %152 }
  0xfc   :  { %v107_v20 = vmul.f32 1.0614054, %v153_v18 }
  0xfd   :  { %v155_v30 = vpop.eup %154 }
  0xfe   :  { %v108_v21 = vadd.f32 -1.4531521, %v107_v20 }
 0x100   :  { %v109_v23 = vmul.f32 %v153_v18, %v108_v21 }
 0x102   :  { %v110_v24 = vadd.f32 1.4214138, %v109_v23 }
 0x104   :  { %v111_v25 = vmul.f32 %v153_v18, %v110_v24 }
 0x106   :  { %v112_v26 = vadd.f32 -0.28449672, %v111_v25 }
 0x108   :  { %v113_v27 = vmul.f32 %v153_v18, %v112_v26 }
 0x10a   :  { %v114_v28 = vadd.f32 0.2548296, %v113_v27 }
 0x10c   :  { %v115_v29 = vmul.f32 %v153_v18, %v114_v28 }
 0x10e   :  { %v120_v31 = vmul.f32 %v155_v30, %v115_v29 }
 0x110   :  { %v121_v32 = vsub.f32 1.0, %v120_v31 }
 0x112   :  { %v122_v35 = vmul.f32 %v121_v32, %v101_v34 }
 0x114   :  { %v123_v37 = vadd.f32 1.0, %v122_v35 }
 0x116   :  { %v124_v38 = vmul.f32 %v123_v37, %v98_v36 }
 0x118   :  { %v125_v39 = vpack.c.bf16 %v124_v38, %v124_v38 }
 0x11a   :  { %127 = vst.msk [vmem:[%s199_s3] sm:$0xf] %vm126_vm4, %v125_v39 }

// kernel: _lambda_.33
= control target key start
LH: loop header
LB: loop body
LE: loop exit
PB: predicated region body
PF: predicated region fallthrough
CT: control target
= control target key end

     0   :  { %vm19_vm0 = vcmask 261120   ;;  %v181_v1 = vmov 0.0   ;;  %vm143_vm1 = vcmask 257024   ;;  %s234_s1 = inlined_call_operand.vmem [shape: bf16[32,32], index: 1, kind: input, shape index: {}]   ;;  %s235_s0 = inlined_call_operand.vmem [shape: bf16[24,32], index: 0, kind: input, shape index: {}]   ;;  %s236_s2 = inlined_call_operand.vmem [shape: f32[1,32], index: 2, kind: input, shape index: {}]   ;;  %s237_s3 = inlined_call_operand.vmem [shape: bf16[24,32], index: 3, kind: output, shape index: {}]  }
   0x1   :  { %v177_v0 = vld [vmem:[%s234_s1] sm:$0xff]   ;;  %22 = vst.msk [vmem:[#allocation2 + $0x10] sm:$0xff] %vm19_vm0, %v181_v1  ;;  %20 = vst.msk [vmem:[#allocation2] sm:$0xff] %vm19_vm0, %v181_v1  ;;  %v178_v2 = vld [vmem:[%s234_s1 + $0x8] sm:$0xff]  }
   0x2   :  { %21 = vst.msk [vmem:[#allocation2 + $0x8] sm:$0xff] %vm19_vm0, %v181_v1  ;;  %168 = vmatprep.subr.bf16.mxu0 %v177_v0  ;;  %v179_v3 = vld [vmem:[%s235_s0] sm:$0xff]   ;;  %v180_v4 = vld [vmem:[%s235_s0 + $0x8] ss:$0 sps:$4 sm:$0xff]  }
   0x3   :  { %169 = vmatpush3.bf16.msra.mxu0 %v177_v0  ;;  %172 = vmatprep.mubr.msk.bf16.mxu0 %vm19_vm0, %v179_v3  ;;  %v157_v15 = vld [vmem:[%s236_s2] ss:$0 sm:$0xff] }
   0x4   :  { %170 = vmatprep.subr.bf16.mxu0 %v178_v2 }
   0x7   :  { %171 = vmatpush3.bf16.msra.mxu0 %v178_v2 }
   0x8   :  { %v32_v5 = vld [vmem:[#allocation2 + $0x10] sm:$0xff]  ;;  %v30_v6 = vld [vmem:[#allocation2] sm:$0xff] }
   0x9   :  { %v31_v10 = vld [vmem:[#allocation2 + $0x8] sm:$0xff] }
   0xa   :  { %173 = vmatmul.mubr.msk.bf16.vlgmr.msra.gmra.mrb[0].mxu0 %vm19_vm0, %v180_v4 }
  0xdd   :  { %v174_v7 = vpop.f32.mrb[0].mxu0 }
  0xde   :  { %v110_v8 = vadd.f32 %v174_v7, %v32_v5  ;;  %v94_v9 = vpop.f32.mrb[1].mxu0 }
  0xdf   :  { %v108_v11 = vadd.f32 %v94_v9, %v30_v6  ;;  %v175_v12 = vpop.f32.mrb[2].mxu0 }
  0xe0   :  { %113 = vst.msk [vmem:[#allocation2 + $0x10] sm:$0xff] %vm19_vm0, %v110_v8  ;;  %v97_v13 = vpop.f32.mrb[3].mxu0 }
  0xe1   :  { %111 = vst.msk [vmem:[#allocation2] sm:$0xff] %vm19_vm0, %v108_v11  ;;  %v109_v14 = vadd.f32 %v97_v13, %v31_v10 }
  0xe3   :  { %112 = vst.msk [vmem:[#allocation2 + $0x8] sm:$0xff] %vm19_vm0, %v109_v14 }
  0xe7   :  { %v119_v16 = vld [vmem:[#allocation2 + $0x10] sm:$0xff] }
  0xe8   :  { %v129_v17 = vadd.f32 %v157_v15, %v119_v16  ;;  %v117_v18 = vld [vmem:[#allocation2] sm:$0xff] }
  0xe9   :  { %v127_v19 = vadd.f32 %v157_v15, %v117_v18 }
  0xea   :  { %v163_v20 = vpack.c.bf16 %v129_v17, %v129_v17  ;;  %v118_v21 = vld [vmem:[#allocation2 + $0x8] sm:$0xff] }
  0xeb   :  { %v161_v22 = vpack.c.bf16 %v127_v19, %v127_v19  ;;  %v128_v23 = vadd.f32 %v157_v15, %v118_v21 }
  0xec   :  { %146 = vst.msk [vmem:[%s237_s3 + $0x8] sm:$0xf] %vm143_vm1, %v163_v20 }
  0xed   :  { %144 = vst.msk [vmem:[%s237_s3] sm:$0xf] %vm143_vm1, %v161_v22  ;;  %v162_v24 = vpack.c.bf16 %v128_v23, %v128_v23 }
  0xef   :  { %145 = vst.msk [vmem:[%s237_s3 + $0x4] sm:$0xf] %vm143_vm1, %v162_v24 }

// kernel: _lambda_.36
= control target key start
LH: loop header
LB: loop body
LE: loop exit
PB: predicated region body
PF: predicated region fallthrough
CT: control target
= control target key end

     0   :  { %vm19_vm0 = vcmask 523264   ;;  %v276_v1 = vmov 0.0   ;;  %vm53_vm1 = vcmask 261120   ;;  %vm225_vm5 = vcmask 519168   ;;  %s352_s1 = inlined_call_operand.vmem [shape: bf16[32,64], index: 1, kind: input, shape index: {}]   ;;  %s353_s0 = inlined_call_operand.vmem [shape: bf16[24,32], index: 0, kind: input, shape index: {}]   ;;  %s354_s2 = inlined_call_operand.vmem [shape: f32[1,64], index: 2, kind: input, shape index: {}]   ;;  %s355_s3 = inlined_call_operand.vmem [shape: bf16[24,64], index: 3, kind: output, shape index: {}]  }
   0x1   :  { %v260_v0 = vld [vmem:[%s352_s1] sm:$0xff]   ;;  %22 = vst.msk [vmem:[#allocation2 + $0x10] sm:$0xff] %vm19_vm0, %v276_v1  ;;  %20 = vst.msk [vmem:[#allocation2] sm:$0xff] %vm19_vm0, %v276_v1  ;;  %v261_v2 = vld [vmem:[%s352_s1 + $0x8] sm:$0xff]  }
   0x2   :  { %21 = vst.msk [vmem:[#allocation2 + $0x8] sm:$0xff] %vm19_vm0, %v276_v1  ;;  %250 = vmatprep.subr.bf16.mxu0 %v260_v0  ;;  %v262_v3 = vld [vmem:[%s353_s0] sm:$0xff]   ;;  %v263_v4 = vld [vmem:[%s353_s0 + $0x8] ss:$0 sps:$4 sm:$0xff]  }
   0x3   :  { %251 = vmatpush3.bf16.msra.mxu0 %v260_v0  ;;  %254 = vmatprep.mubr.msk.bf16.mxu0 %vm53_vm1, %v262_v3  ;;  %v239_v15 = vld [vmem:[%s354_s2] ss:$0 sm:$0xff] }
   0x4   :  { %252 = vmatprep.subr.bf16.mxu0 %v261_v2 }
   0x7   :  { %253 = vmatpush3.bf16.msra.mxu0 %v261_v2 }
   0x8   :  { %v32_v5 = vld [vmem:[#allocation2 + $0x10] sm:$0xff]  ;;  %v30_v6 = vld [vmem:[#allocation2] sm:$0xff] }
   0x9   :  { %v31_v10 = vld [vmem:[#allocation2 + $0x8] sm:$0xff] }
   0xa   :  { %255 = vmatmul.mubr.msk.bf16.vlgmr.msra.gmra.mrb[0].mxu0 %vm53_vm1, %v263_v4 }
  0xdd   :  { %v256_v7 = vpop.f32.mrb[0].mxu0 }
  0xde   :  { %v110_v8 = vadd.f32 %v256_v7, %v32_v5  ;;  %v94_v9 = vpop.f32.mrb[1].mxu0 }
  0xdf   :  { %v108_v11 = vadd.f32 %v94_v9, %v30_v6  ;;  %v257_v12 = vpop.f32.mrb[2].mxu0 }
  0xe0   :  { %114 = vst.msk [vmem:[#allocation2 + $0x10] sm:$0xff] %vm19_vm0, %v110_v8  ;;  %v97_v13 = vpop.f32.mrb[3].mxu0 }
  0xe1   :  { %112 = vst.msk [vmem:[#allocation2] sm:$0xff] %vm19_vm0, %v108_v11  ;;  %v109_v14 = vadd.f32 %v97_v13, %v31_v10 }
  0xe3   :  { %113 = vst.msk [vmem:[#allocation2 + $0x8] sm:$0xff] %vm19_vm0, %v109_v14 }
  0xe7   :  { %v120_v16 = vld [vmem:[#allocation2 + $0x10] sm:$0xff] }
  0xe8   :  { %v319_v17 = vadd.f32 %v239_v15, %v120_v16  ;;  %v118_v18 = vld [vmem:[#allocation2] sm:$0xff] }
  0xe9   :  { %v321_v19 = vadd.f32 %v239_v15, %v118_v18 }
  0xea   :  { %v324_v20 = vmul.f32 0.70710677, %v319_v17  ;;  %v119_v21 = vld [vmem:[#allocation2 + $0x8] sm:$0xff] }
  0xeb   :  { %v327_v22 = vmul.f32 0.70710677, %v321_v19  ;;  %v329_v23 = vadd.f32 %v239_v15, %v119_v21  ;;  %v277_v15 = vmov 1.0  }
  0xec   :  { %v145_v24 = vand.u32 2147483647, %v324_v20  ;;  %vm139_vm2 = vcmp.lt.f32.partialorder %v324_v20, 0.0 }
  0xed   :  { %v143_v25 = vand.u32 2147483647, %v327_v22  ;;  %v334_v27 = vmul.f32 0.70710677, %v329_v23  ;;  %vm137_vm3 = vcmp.lt.f32.partialorder %v327_v22, 0.0  ;;  %v142_v16 = vsel %vm139_vm2, -1.0, %v277_v15 }
  0xee   :  { %v148_v26 = vmul.f32 0.3275911, %v145_v24  ;;  %v187_v34 = vsub.f32 0.0, %v145_v24 }
  0xef   :  { %v146_v28 = vmul.f32 0.3275911, %v143_v25  ;;  %v144_v30 = vand.u32 2147483647, %v334_v27  ;;  %v185_v35 = vsub.f32 0.0, %v143_v25  ;;  %vm138_vm4 = vcmp.lt.f32.partialorder %v334_v27, 0.0 }
  0xf0   :  { %v151_v29 = vadd.f32 1.0, %v148_v26  ;;  %v190_v37 = vmul.f32 %v187_v34, %v145_v24  ;;  %v140_v24 = vsel %vm137_vm3, -1.0, %v277_v15 }
  0xf1   :  { %v149_v31 = vadd.f32 1.0, %v146_v28  ;;  %v147_v32 = vmul.f32 0.3275911, %v144_v30  ;;  %v186_v38 = vsub.f32 0.0, %v144_v30  ;;  %v188_v41 = vmul.f32 %v185_v35, %v143_v25 }
  0xf2   :  { %264 = vrcp.f32 %v151_v29  ;;  %v195_v45 = vmul.f32 1.442695, %v190_v37  ;;  %v133_v28 = vmul.f32 0.5, %v319_v17 }
  0xf3   :  { %266 = vrcp.f32 %v149_v31  ;;  %v150_v33 = vadd.f32 1.0, %v147_v32  ;;  %v189_v47 = vmul.f32 %v186_v38, %v144_v30  ;;  %v191_v49 = vmul.f32 1.442695, %v188_v41 }
  0xf4   :  { %v131_v30 = vmul.f32 0.5, %v321_v19  ;;  %v141_v31 = vsel %vm138_vm4, -1.0, %v277_v15 }
  0xf5   :  { %268 = vrcp.f32 %v150_v33  ;;  %v193_v55 = vmul.f32 1.442695, %v189_v47 }
  0xf6   :  { %270 = vpow2.f32 %v195_v45 }
  0xf7   :  { %272 = vpow2.f32 %v191_v49 }
  0xf8   :  { %274 = vpow2.f32 %v193_v55 }
  0xfc   :  { %v265_v36 = vpop.eup %264 }
  0xfd   :  { %v267_v39 = vpop.eup %266  ;;  %v160_v40 = vmul.f32 1.0614054, %v265_v36 }
  0xfe   :  { %v158_v42 = vmul.f32 1.0614054, %v267_v39 }
  0xff   :  { %v163_v43 = vadd.f32 -1.4531521, %v160_v40  ;;  %v269_v44 = vpop.eup %268 }
 0x100   :  { %v161_v46 = vadd.f32 -1.4531521, %v158_v42  ;;  %v159_v50 = vmul.f32 1.0614054, %v269_v44  ;;  %v271_v6 = vpop.eup %270 }
 0x101   :  { %v166_v48 = vmul.f32 %v265_v36, %v163_v43  ;;  %v273_v8 = vpop.eup %272 }
 0x102   :  { %v164_v51 = vmul.f32 %v267_v39, %v161_v46  ;;  %v162_v53 = vadd.f32 -1.4531521, %v159_v50  ;;  %v275_v14 = vpop.eup %274 }
 0x103   :  { %v169_v52 = vadd.f32 1.4214138, %v166_v48 }
 0x104   :  { %v167_v54 = vadd.f32 1.4214138, %v164_v51  ;;  %v165_v57 = vmul.f32 %v269_v44, %v162_v53 }
 0x105   :  { %v172_v56 = vmul.f32 %v265_v36, %v169_v52 }
 0x106   :  { %v170_v58 = vmul.f32 %v267_v39, %v167_v54  ;;  %v168_v60 = vadd.f32 1.4214138, %v165_v57 }
 0x107   :  { %v175_v59 = vadd.f32 -0.28449672, %v172_v56 }
 0x108   :  { %v173_v61 = vadd.f32 -0.28449672, %v170_v58  ;;  %v171_v63 = vmul.f32 %v269_v44, %v168_v60 }
 0x109   :  { %v178_v62 = vmul.f32 %v265_v36, %v175_v59 }
 0x10a   :  { %v176_v0 = vmul.f32 %v267_v39, %v173_v61  ;;  %v174_v2 = vadd.f32 -0.28449672, %v171_v63 }
 0x10b   :  { %v181_v1 = vadd.f32 0.2548296, %v178_v62 }
 0x10c   :  { %v179_v3 = vadd.f32 0.2548296, %v176_v0  ;;  %v177_v5 = vmul.f32 %v269_v44, %v174_v2 }
 0x10d   :  { %v184_v4 = vmul.f32 %v265_v36, %v181_v1  ;;  %v132_v36 = vmul.f32 0.5, %v329_v23 }
 0x10e   :  { %v182_v7 = vmul.f32 %v267_v39, %v179_v3  ;;  %v180_v10 = vadd.f32 0.2548296, %v177_v5 }
 0x10f   :  { %v199_v9 = vmul.f32 %v271_v6, %v184_v4 }
 0x110   :  { %v197_v11 = vmul.f32 %v273_v8, %v182_v7  ;;  %v183_v13 = vmul.f32 %v269_v44, %v180_v10 }
 0x111   :  { %v202_v12 = vsub.f32 1.0, %v199_v9 }
 0x112   :  { %v200_v18 = vsub.f32 1.0, %v197_v11  ;;  %v198_v25 = vmul.f32 %v275_v14, %v183_v13 }
 0x113   :  { %v205_v21 = vmul.f32 %v202_v12, %v142_v16 }
 0x114   :  { %v203_v26 = vmul.f32 %v200_v18, %v140_v24  ;;  %v201_v29 = vsub.f32 1.0, %v198_v25 }
 0x115   :  { %v208_v20 = vadd.f32 1.0, %v205_v21 }
 0x116   :  { %v206_v22 = vadd.f32 1.0, %v203_v26  ;;  %v204_v33 = vmul.f32 %v201_v29, %v141_v31 }
 0x117   :  { %v211_v32 = vmul.f32 %v208_v20, %v133_v28 }
 0x118   :  { %v209_v34 = vmul.f32 %v206_v22, %v131_v30  ;;  %v207_v37 = vadd.f32 1.0, %v204_v33 }
 0x119   :  { %v245_v35 = vpack.c.bf16 %v211_v32, %v211_v32 }
 0x11a   :  { %v243_v38 = vpack.c.bf16 %v209_v34, %v209_v34  ;;  %v210_v17 = vmul.f32 %v207_v37, %v132_v36 }
 0x11b   :  { %228 = vst.msk [vmem:[%s355_s3 + $0x8] sm:$0xf] %vm225_vm5, %v245_v35 }
 0x11c   :  { %226 = vst.msk [vmem:[%s355_s3] sm:$0xf] %vm225_vm5, %v243_v38  ;;  %v244_v19 = vpack.c.bf16 %v210_v17, %v210_v17 }
 0x11e   :  { %227 = vst.msk [vmem:[%s355_s3 + $0x4] sm:$0xf] %vm225_vm5, %v244_v19 }

// kernel: _lambda_.37
= control target key start
LH: loop header
LB: loop body
LE: loop exit
PB: predicated region body
PF: predicated region fallthrough
CT: control target
= control target key end

     0   :  { %vm19_vm0 = vcmask 261120   ;;  %v208_v1 = vmov 0.0   ;;  %vm69_vm1 = vcmask 523264   ;;  %vm160_vm2 = vcmask 257024   ;;  %s265_s1 = inlined_call_operand.vmem [shape: bf16[64,32], index: 1, kind: input, shape index: {}]   ;;  %s266_s0 = inlined_call_operand.vmem [shape: bf16[24,64], index: 0, kind: input, shape index: {}]   ;;  %s267_s2 = inlined_call_operand.vmem [shape: f32[1,32], index: 2, kind: input, shape index: {}]   ;;  %s268_s3 = inlined_call_operand.vmem [shape: bf16[24,32], index: 3, kind: output, shape index: {}]  }
   0x1   :  { %v202_v0 = vld [vmem:[%s265_s1] sm:$0xff]   ;;  %22 = vst.msk [vmem:[#allocation2 + $0x10] sm:$0xff] %vm19_vm0, %v208_v1  ;;  %20 = vst.msk [vmem:[#allocation2] sm:$0xff] %vm19_vm0, %v208_v1  ;;  %v203_v2 = vld [vmem:[%s265_s1 + $0x8] sm:$0xff]  }
   0x2   :  { %21 = vst.msk [vmem:[#allocation2 + $0x8] sm:$0xff] %vm19_vm0, %v208_v1  ;;  %189 = vmatprep.subr.bf16.mxu0 %v202_v0  ;;  %v204_v3 = vld [vmem:[%s265_s1 + $0x10] sm:$0xff]   ;;  %v206_v4 = vld [vmem:[%s266_s0] sm:$0xff]   ;;  %v205_v5 = vld [vmem:[%s265_s1 + $0x18] sm:$0xff]  }
   0x3   :  { %190 = vmatpush3.bf16.msra.mxu0 %v202_v0  ;;  %197 = vmatprep.mubr.msk.bf16.mxu0 %vm69_vm1, %v206_v4  ;;  %v207_v6 = vld [vmem:[%s266_s0 + $0x8] ss:$0 sps:$4 sm:$0xff]   ;;  %v176_v17 = vld [vmem:[%s267_s2] ss:$0 sm:$0xff] }
   0x4   :  { %191 = vmatprep.subr.bf16.mxu0 %v203_v2 }
   0x7   :  { %192 = vmatpush3.bf16.msra.mxu0 %v203_v2 }
   0x8   :  { %193 = vmatprep.subr.bf16.mxu0 %v204_v3  ;;  %v36_v7 = vld [vmem:[#allocation2 + $0x10] sm:$0xff]  ;;  %v34_v8 = vld [vmem:[#allocation2] sm:$0xff] }
   0x9   :  { %v35_v12 = vld [vmem:[#allocation2 + $0x8] sm:$0xff] }
   0xb   :  { %194 = vmatpush3.bf16.msra.mxu0 %v204_v3 }
   0xc   :  { %195 = vmatprep.subr.bf16.mxu0 %v205_v5 }
   0xf   :  { %196 = vmatpush3.bf16.msra.mxu0 %v205_v5 }
  0x12   :  { %198 = vmatmul.mubr.msk.bf16.vlgmr.msra.gmra.mrb[0].mxu0 %vm69_vm1, %v207_v6 }
  0xe5   :  { %v199_v9 = vpop.f32.mrb[0].mxu0 }
  0xe6   :  { %v126_v10 = vadd.f32 %v199_v9, %v36_v7  ;;  %v110_v11 = vpop.f32.mrb[1].mxu0 }
  0xe7   :  { %v124_v13 = vadd.f32 %v110_v11, %v34_v8  ;;  %v200_v14 = vpop.f32.mrb[2].mxu0 }
  0xe8   :  { %130 = vst.msk [vmem:[#allocation2 + $0x10] sm:$0xff] %vm19_vm0, %v126_v10  ;;  %v113_v15 = vpop.f32.mrb[3].mxu0 }
  0xe9   :  { %128 = vst.msk [vmem:[#allocation2] sm:$0xff] %vm19_vm0, %v124_v13  ;;  %v125_v16 = vadd.f32 %v113_v15, %v35_v12 }
  0xeb   :  { %129 = vst.msk [vmem:[#allocation2 + $0x8] sm:$0xff] %vm19_vm0, %v125_v16 }
  0xef   :  { %v136_v18 = vld [vmem:[#allocation2 + $0x10] sm:$0xff] }
  0xf0   :  { %v146_v19 = vadd.f32 %v176_v17, %v136_v18  ;;  %v134_v20 = vld [vmem:[#allocation2] sm:$0xff] }
  0xf1   :  { %v144_v21 = vadd.f32 %v176_v17, %v134_v20 }
  0xf2   :  { %v182_v22 = vpack.c.bf16 %v146_v19, %v146_v19  ;;  %v135_v23 = vld [vmem:[#allocation2 + $0x8] sm:$0xff] }
  0xf3   :  { %v180_v24 = vpack.c.bf16 %v144_v21, %v144_v21  ;;  %v145_v25 = vadd.f32 %v176_v17, %v135_v23 }
  0xf4   :  { %163 = vst.msk [vmem:[%s268_s3 + $0x8] sm:$0xf] %vm160_vm2, %v182_v22 }
  0xf5   :  { %161 = vst.msk [vmem:[%s268_s3] sm:$0xf] %vm160_vm2, %v180_v24  ;;  %v181_v26 = vpack.c.bf16 %v145_v25, %v145_v25 }
  0xf7   :  { %162 = vst.msk [vmem:[%s268_s3 + $0x4] sm:$0xf] %vm160_vm2, %v181_v26 }

// kernel: _lambda_.31
= control target key start
LH: loop header
LB: loop body
LE: loop exit
PB: predicated region body
PF: predicated region fallthrough
CT: control target
= control target key end

     0   :  { %s1220_s15 = smov 0   ;;  %s1357_s0 = inlined_call_operand.vmem [shape: bf16[2,4,12,8], index: 0, kind: input, shape index: {}]   ;;  %s1358_s1 = inlined_call_operand.vmem [shape: bf16[2,4,12,8], index: 1, kind: input, shape index: {}]   ;;  %s1359_s2 = inlined_call_operand.vmem [shape: bf16[2,4,12,8], index: 2, kind: input, shape index: {}]   ;;  %s1360_s3 = inlined_call_operand.vmem [shape: bf16[2,4,12,12], index: 3, kind: input, shape index: {}]   ;;  %s1361_s4 = inlined_call_operand.vmem [shape: bf16[2,4,12,8], index: 4, kind: output, shape index: {}]  }
   0x1 LB: > { %s979_s16 = sadd.s32 4294967295, %s1191_s15   ;;  %p983_p0 = scmp.ge.s32.totalorder %s1191_s15, 1  ;;  %s1191_s15 = sphi %s1220_s15, %s14_s15  }
   0x2   : > { %p192_p1 = scmp.lt.s32.totalorder %s1191_s15, 3 }
   0x4   : > { %p193_p2 = pnand %p983_p0, %p192_p1 }
   0x5   : > { %p233_p3 = scmp.lt.s32.totalorder (!%p193_p2), %s979_s16, 1  ;;  %v1193_v0 = vmov (!%p193_p2), 0.0   ;;  %vm1194_vm0 = vmmov (!%p193_p2), 0   ;;  %vm279_vm1 = vcmask (!%p193_p2), 64512   ;;  %vm327_vm2 = vcmask (!%p193_p2), 97280  }
   0x6   : > { %196 = sbr.rel (%p193_p2) target bundleno = 1332 (0x534), region = 36  ;;  %1083 = vmatprep.subr.bf16.mxu0 (!%p193_p2), %v1193_v0  ;;  %1085 = vmatprep.mubr.msk.bf16.mxu0 (!%p193_p2), %vm1194_vm0, %v1193_v0  ;;  %vm331_vm3 = vcmask (!%p193_p2), 93184   ;;  %vm360_vm4 = vcmask (!%p193_p2), 1045504   ;;  %vm413_vm5 = vcmask (!%p193_p2), 60416   ;;  %vm415_vm6 = vcmask (!%p193_p2), 58368  }
   0x7   : > { %1089 = vmatprep.subr.bf16.mxu1 (!%p193_p2), %v1193_v0  ;;  %1091 = vmatprep.mubr.msk.bf16.mxu1 (!%p193_p2), %vm1194_vm0, %v1193_v0 }
   0xd   : > { %s1363_s16 = smov (!%p233_p3, %s979_s16), 1 }
   0xe   : > { %s1234_s17 = sshll.u32 %s1363_s16, 5 }
   0xf   : > { %s1240_s20 = scalar_lea.vmem %s1358_s1, %s1234_s17  ;;  %s1247_s23 = scalar_lea.vmem %s1357_s0, %s1234_s17 }
  0x10   : > { %v1141_v1 = vld [vmem:[%s1240_s20] sm:$0x3f]   ;;  %s1259_s26 = scalar_lea.vmem %s1360_s3, %s1234_s17  ;;  %s1274_s29 = scalar_lea.vmem %s1359_s2, %s1234_s17  ;;  %v1144_v31 = vld [vmem:[%s1240_s20 + $0x8] sm:$0x3f]   ;;  %v1146_v37 = vld [vmem:[%s1240_s20 + $0x10] sm:$0x3f]  }
  0x11   : > { %v284_v2 = vsel %vm279_vm1, %v1141_v1, 0  ;;  %v1142_v3 = vld [vmem:[%s1247_s23] sm:$0x3f]   ;;  %v445_v36 = vsel %vm279_vm1, %v1144_v31, 0  ;;  %v1145_v38 = vld [vmem:[%s1247_s23 + $0x8] sm:$0x3f]   ;;  %s1304_s6 = scalar_lea.vmem %s1361_s4, %s1234_s17 }
  0x12   : > { %1084 = vmatpush3.bf16.xpose.msra.mxu0 %v284_v2  ;;  %v1262_v4 = vld [vmem:[%s1259_s26] ss:$8 sps:$4 sm:$0xff]   ;;  %v266_v5 = vld [vmem:[%s1259_s26 + $0x4] sm:$0x3]  ;;  %v602_v39 = vsel %vm279_vm1, %v1146_v37, 0 }
  0x13   : > { %1101 = vmatprep.subr.bf16.mxu0 %v1193_v0  ;;  %v267_v6 = vunpack.c.l.bf16 %v1262_v4  ;;  %v268_v7 = vunpack.c.l.bf16 %v266_v5  ;;  %v1143_v26 = vld [vmem:[%s1274_s29] sm:$0x3f]   ;;  %v1148_v40 = vld [vmem:[%s1240_s20 + $0x18] sm:$0x3f]   ;;  %v1147_v41 = vld [vmem:[%s1247_s23 + $0x10] sm:$0x3f]   ;;  %v429_v51 = vunpack.c.h.bf16 %v1262_v4 }
  0x14   : > { %v362_v27 = vsel %vm360_vm4, %v1143_v26, 0  ;;  %v759_v42 = vsel %vm279_vm1, %v1148_v40, 0  ;;  %v1149_v43 = vld [vmem:[%s1247_s23 + $0x18] sm:$0x3f]   ;;  %v1008_v50 = vld [vmem:[%s1259_s26 + $0xc] sm:$0x3] }
  0x15   : > { %1090 = vmatpush3.bf16.msra.mxu1 %v362_v27  ;;  %v430_v52 = vunpack.c.l.bf16 %v1008_v50  ;;  %v1024_v57 = vld [vmem:[%s1259_s26 + $0x10] ss:$8 sps:$4 sm:$0xff]   ;;  %v1025_v61 = vld [vmem:[%s1259_s26 + $0x14] sm:$0x3] }
  0x16   : > { %1095 = vmatprep.subr.bf16.mxu1 %v1193_v0  ;;  %v586_v63 = vunpack.c.l.bf16 %v1024_v57  ;;  %v587_v1 = vunpack.c.l.bf16 %v1025_v61 }
  0x19   : > { %1086 = vmatmul.mubr.msk.bf16.vlgmr.msra.gmra.mrb[0].mxu0 %vm279_vm1, %v1142_v3 }
  0x1a   : > { %1103 = vmatprep.mubr.msk.bf16.mxu0 %vm1194_vm0, %v1193_v0 }
  0xec   : > { %v320_v8 = vpop.f32.mrb[0].mxu0 }
  0xed   : > { %v321_v9 = vadd.f32 %v320_v8, %v267_v6  ;;  %v1087_v10 = vpop.f32.mrb[1].mxu0 }
  0xee   : > { %v323_v11 = vpop.f32.mrb[2].mxu0 }
  0xef   : > { %v324_v12 = vadd.f32 %v323_v11, %v268_v7  ;;  %v1088_v13 = vpop.f32.mrb[3].mxu0  ;;  %v328_v14 = vsel %vm327_vm2, %v321_v9, -inf  ;;  %v743_v11 = vunpack.c.h.bf16 %v1024_v57 }
  0xf0   : > { %329 = vmax.xlane.f32.xlu0 %v328_v14 }
  0xf1   : > { %v332_v15 = vsel %vm331_vm3, %v324_v12, -inf }
  0xf4   : > { %333 = vmax.xlane.f32.xlu0 %v332_v15 }
 0x17d   : > { %v330_v16 = vpop.xlane.xlu0 %329 }
 0x17e   : > { %v335_v17 = vsub.f32 %v321_v9, %v330_v16  ;;  %v1042_v9 = vld [vmem:[%s1259_s26 + $0x1c] sm:$0x3] }
 0x180   : > { %v337_v18 = vmul.f32 1.442695, %v335_v17 }
 0x181   : > { %v334_v19 = vpop.xlane.xlu0 %333 }
 0x182   : > { %1153 = vpow2.f32 %v337_v18  ;;  %v336_v20 = vsub.f32 %v324_v12, %v334_v19  ;;  %v744_v12 = vunpack.c.l.bf16 %v1042_v9 }
 0x184   : > { %v339_v21 = vmul.f32 1.442695, %v336_v20 }
 0x186   : > { %1155 = vpow2.f32 %v339_v21 }
 0x18c   : > { %v1154_v22 = vpop.eup %1153 }
 0x18d   : > { %v341_v23 = vsel %vm327_vm2, %v1154_v22, 0.0 }
 0x18e   : > { %342 = vadd.xlane.f32.xlu1 %v341_v23 }
 0x190   : > { %v1156_v24 = vpop.eup %1155 }
 0x191   : > { %v344_v25 = vsel %vm331_vm3, %v1156_v24, 0.0 }
 0x192   : > { %345 = vadd.xlane.f32.xlu1 %v344_v25 }
 0x21b   : > { %v343_v28 = vpop.xlane.xlu1 %342 }
 0x21c   : > { %1157 = vrcp.f32 %v343_v28 }
 0x21f   : > { %v346_v29 = vpop.xlane.xlu1 %345 }
 0x220   : > { %1159 = vrcp.f32 %v346_v29 }
 0x226   : > { %v1158_v30 = vpop.eup %1157 }
 0x227   : > { %v349_v33 = vmul.f32 %v1158_v30, %v1154_v22 }
 0x22a   : > { %v1160_v32 = vpop.eup %1159 }
 0x22b   : > { %v350_v34 = vmul.f32 %v1160_v32, %v1156_v24 }
 0x22d   : > { %v351_v35 = vpack.c.bf16 %v350_v34, %v349_v33 }
 0x22f   : > { %1092 = vmatmul.mubr.msk.bf16.vlgmr.msra.gmra.mrb[0].mxu1 %vm327_vm2, %v351_v35 }
 0x230   : > { %1096 = vmatpush3.bf16.xpose.msra.mxu1 %v445_v36  ;;  %1097 = vmatprep.mubr.msk.bf16.mxu1 %vm1194_vm0, %v1193_v0 }
 0x231   : > { %1107 = vmatprep.subr.bf16.mxu1 %v1193_v0 }
 0x237   : > { %1098 = vmatmul.mubr.msk.bf16.vlgmr.msra.gmra.mrb[4].mxu1 %vm279_vm1, %v1145_v38 }
 0x238   : > { %1108 = vmatpush3.bf16.xpose.msra.mxu1 %v602_v39  ;;  %1109 = vmatprep.mubr.msk.bf16.mxu1 %vm1194_vm0, %v1193_v0 }
 0x239   : > { %1119 = vmatprep.subr.bf16.mxu1 %v1193_v0 }
 0x23f   : > { %1110 = vmatmul.mubr.msk.bf16.vlgmr.msra.gmra.mrb[8].mxu1 %vm279_vm1, %v1147_v41 }
 0x240   : > { %1120 = vmatpush3.bf16.xpose.msra.mxu1 %v759_v42  ;;  %1121 = vmatprep.mubr.msk.bf16.mxu1 %vm1194_vm0, %v1193_v0 }
 0x247   : > { %1122 = vmatmul.mubr.msk.bf16.vlgmr.msra.gmra.mrb[12].mxu1 %vm279_vm1, %v1149_v43 }
 0x302   : > { %v398_v44 = vpop.f32.mrb[0].mxu1 }
 0x303   : > { %v1059_v45 = vpack.c.bf16 %v398_v44, %v398_v44  ;;  %v1093_v46 = vpop.f32.mrb[1].mxu1 }
 0x304   : > { %v401_v47 = vpop.f32.mrb[2].mxu1 }
 0x305   : > { %414 = vst.msk [vmem:[%s1304_s6] sm:$0xf] %vm413_vm5, %v1059_v45  ;;  %v1060_v48 = vpack.c.bf16 %v401_v47, %v401_v47  ;;  %v1094_v49 = vpop.f32.mrb[3].mxu1 }
 0x307   : > { %416 = vst.msk [vmem:[%s1304_s6 + $0x4] sm:$0x3] %vm415_vm6, %v1060_v48 }
 0x30a   : > { %v481_v53 = vpop.f32.mrb[4].mxu1 }
 0x30b   : > { %v482_v54 = vadd.f32 %v481_v53, %v429_v51  ;;  %v1099_v55 = vpop.f32.mrb[5].mxu1  ;;  %v1150_v51 = vld [vmem:[%s1274_s29 + $0x8] sm:$0x3f]  }
 0x30c   : > { %v484_v56 = vpop.f32.mrb[6].mxu1 }
 0x30d   : > { %v485_v58 = vadd.f32 %v484_v56, %v430_v52  ;;  %v1100_v59 = vpop.f32.mrb[7].mxu1  ;;  %v488_v60 = vsel %vm327_vm2, %v482_v54, -inf  ;;  %v520_v52 = vsel %vm360_vm4, %v1150_v51, 0 }
 0x30e   : > { %489 = vmax.xlane.f32.xlu0 %v488_v60  ;;  %1102 = vmatpush3.bf16.msra.mxu0 %v520_v52 }
 0x30f   : > { %v491_v62 = vsel %vm331_vm3, %v485_v58, -inf  ;;  %1113 = vmatprep.subr.bf16.mxu0 %v1193_v0 }
 0x310   : > { %492 = vmax.xlane.f32.xlu1 %v491_v62 }
 0x312   : > { %v638_v2 = vpop.f32.mrb[8].mxu1 }
 0x313   : > { %v639_v3 = vadd.f32 %v638_v2, %v586_v63  ;;  %v1111_v4 = vpop.f32.mrb[9].mxu1 }
 0x314   : > { %v641_v5 = vpop.f32.mrb[10].mxu1  ;;  %v1152_v4 = vld [vmem:[%s1274_s29 + $0x18] sm:$0x3f]  }
 0x315   : > { %v642_v6 = vadd.f32 %v641_v5, %v587_v1  ;;  %v1112_v7 = vpop.f32.mrb[11].mxu1  ;;  %v645_v8 = vsel %vm327_vm2, %v639_v3, -inf  ;;  %v834_v9 = vsel %vm360_vm4, %v1152_v4, 0 }
 0x316   : > { %646 = vmax.xlane.f32.xlu0 %v645_v8 }
 0x317   : > { %v648_v10 = vsel %vm331_vm3, %v642_v6, -inf }
 0x318   : > { %649 = vmax.xlane.f32.xlu1 %v648_v10 }
 0x31a   : > { %v795_v13 = vpop.f32.mrb[12].mxu1 }
 0x31b   : > { %v796_v14 = vadd.f32 %v795_v13, %v743_v11  ;;  %v1123_v15 = vpop.f32.mrb[13].mxu1 }
 0x31c   : > { %v798_v16 = vpop.f32.mrb[14].mxu1 }
 0x31d   : > { %v799_v17 = vadd.f32 %v798_v16, %v744_v12  ;;  %v1124_v18 = vpop.f32.mrb[15].mxu1  ;;  %v802_v19 = vsel %vm327_vm2, %v796_v14, -inf }
 0x31e   : > { %803 = vmax.xlane.f32.xlu0 %v802_v19 }
 0x31f   : > { %v805_v20 = vsel %vm331_vm3, %v799_v17, -inf }
 0x320   : > { %806 = vmax.xlane.f32.xlu1 %v805_v20 }
 0x39b   : > { %v490_v21 = vpop.xlane.xlu0 %489 }
 0x39c   : > { %v494_v22 = vsub.f32 %v482_v54, %v490_v21 }
 0x39d   : > { %v493_v23 = vpop.xlane.xlu1 %492 }
 0x39e   : > { %v496_v24 = vmul.f32 1.442695, %v494_v22  ;;  %v495_v25 = vsub.f32 %v485_v58, %v493_v23  ;;  %v1151_v58 = vld [vmem:[%s1274_s29 + $0x10] sm:$0x3f]  }
 0x39f   : > { %v677_v1 = vsel %vm360_vm4, %v1151_v58, 0 }
 0x3a0   : > { %1161 = vpow2.f32 %v496_v24  ;;  %v498_v26 = vmul.f32 1.442695, %v495_v25 }
 0x3a2   : > { %1163 = vpow2.f32 %v498_v26 }
 0x3a3   : > { %v647_v27 = vpop.xlane.xlu0 %646 }
 0x3a4   : > { %v651_v28 = vsub.f32 %v639_v3, %v647_v27 }
 0x3a5   : > { %v650_v29 = vpop.xlane.xlu1 %649 }
 0x3a6   : > { %v653_v30 = vmul.f32 1.442695, %v651_v28  ;;  %v652_v31 = vsub.f32 %v642_v6, %v650_v29 }
 0x3a8   : > { %1165 = vpow2.f32 %v653_v30  ;;  %v655_v32 = vmul.f32 1.442695, %v652_v31 }
 0x3aa   : > { %v1162_v33 = vpop.eup %1161  ;;  %1167 = vpow2.f32 %v655_v32 }
 0x3ab   : > { %v804_v34 = vpop.xlane.xlu0 %803  ;;  %v500_v35 = vsel %vm327_vm2, %v1162_v33, 0.0 }
 0x3ac   : > { %v1164_v36 = vpop.eup %1163  ;;  %v808_v37 = vsub.f32 %v796_v14, %v804_v34  ;;  %501 = vadd.xlane.f32.xlu0 %v500_v35 }
 0x3ad   : > { %v807_v38 = vpop.xlane.xlu1 %806  ;;  %v503_v39 = vsel %vm331_vm3, %v1164_v36, 0.0 }
 0x3ae   : > { %v810_v40 = vmul.f32 1.442695, %v808_v37  ;;  %v809_v41 = vsub.f32 %v799_v17, %v807_v38  ;;  %504 = vadd.xlane.f32.xlu1 %v503_v39 }
 0x3b0   : > { %1169 = vpow2.f32 %v810_v40  ;;  %v812_v42 = vmul.f32 1.442695, %v809_v41 }
 0x3b2   : > { %v1166_v43 = vpop.eup %1165  ;;  %1171 = vpow2.f32 %v812_v42 }
 0x3b3   : > { %v657_v44 = vsel %vm327_vm2, %v1166_v43, 0.0 }
 0x3b4   : > { %v1168_v45 = vpop.eup %1167  ;;  %658 = vadd.xlane.f32.xlu0 %v657_v44 }
 0x3b5   : > { %v660_v46 = vsel %vm331_vm3, %v1168_v45, 0.0 }
 0x3b6   : > { %661 = vadd.xlane.f32.xlu1 %v660_v46 }
 0x3ba   : > { %v1170_v47 = vpop.eup %1169 }
 0x3bb   : > { %v814_v48 = vsel %vm327_vm2, %v1170_v47, 0.0 }
 0x3bc   : > { %v1172_v49 = vpop.eup %1171  ;;  %815 = vadd.xlane.f32.xlu0 %v814_v48 }
 0x3bd   : > { %v817_v50 = vsel %vm331_vm3, %v1172_v49, 0.0 }
 0x3be   : > { %818 = vadd.xlane.f32.xlu1 %v817_v50 }
 0x439   : > { %v502_v53 = vpop.xlane.xlu0 %501 }
 0x43a   : > { %1173 = vrcp.f32 %v502_v53 }
 0x43b   : > { %v505_v54 = vpop.xlane.xlu1 %504 }
 0x43c   : > { %1175 = vrcp.f32 %v505_v54 }
 0x441   : > { %v659_v55 = vpop.xlane.xlu0 %658 }
 0x442   : > { %1177 = vrcp.f32 %v659_v55 }
 0x443   : > { %v662_v56 = vpop.xlane.xlu1 %661 }
 0x444   : > { %v1174_v57 = vpop.eup %1173  ;;  %1179 = vrcp.f32 %v662_v56 }
 0x445   : > { %v508_v60 = vmul.f32 %v1174_v57, %v1162_v33 }
 0x446   : > { %v1176_v59 = vpop.eup %1175 }
 0x447   : > { %v509_v61 = vmul.f32 %v1176_v59, %v1164_v36 }
 0x449   : > { %v816_v62 = vpop.xlane.xlu0 %815  ;;  %v510_v63 = vpack.c.bf16 %v509_v61, %v508_v60 }
 0x44a   : > { %1181 = vrcp.f32 %v816_v62 }
 0x44b   : > { %1104 = vmatmul.mubr.msk.bf16.vlgmr.msra.gmra.mrb[4].mxu0 %vm327_vm2, %v510_v63  ;;  %v819_v2 = vpop.xlane.xlu1 %818 }
 0x44c   : > { %v1178_v3 = vpop.eup %1177  ;;  %1114 = vmatpush3.bf16.msra.mxu0 %v677_v1  ;;  %1183 = vrcp.f32 %v819_v2  ;;  %1115 = vmatprep.mubr.msk.bf16.mxu0 %vm1194_vm0, %v1193_v0 }
 0x44d   : > { %1125 = vmatprep.subr.bf16.mxu0 %v1193_v0  ;;  %v665_v6 = vmul.f32 %v1178_v3, %v1166_v43 }
 0x44e   : > { %v1180_v5 = vpop.eup %1179 }
 0x44f   : > { %v666_v7 = vmul.f32 %v1180_v5, %v1168_v45 }
 0x451   : > { %v667_v8 = vpack.c.bf16 %v666_v7, %v665_v6 }
 0x453   : > { %1116 = vmatmul.mubr.msk.bf16.vlgmr.msra.gmra.mrb[8].mxu0 %vm327_vm2, %v667_v8 }
 0x454   : > { %v1182_v10 = vpop.eup %1181  ;;  %1126 = vmatpush3.bf16.msra.mxu0 %v834_v9  ;;  %1127 = vmatprep.mubr.msk.bf16.mxu0 %vm1194_vm0, %v1193_v0 }
 0x455   : > { %v822_v12 = vmul.f32 %v1182_v10, %v1170_v47 }
 0x456   : > { %v1184_v11 = vpop.eup %1183 }
 0x457   : > { %v823_v13 = vmul.f32 %v1184_v11, %v1172_v49 }
 0x459   : > { %v824_v14 = vpack.c.bf16 %v823_v13, %v822_v12 }
 0x45b   : > { %1128 = vmatmul.mubr.msk.bf16.vlgmr.msra.gmra.mrb[12].mxu0 %vm327_vm2, %v824_v14 }
 0x51e   : > { %v556_v15 = vpop.f32.mrb[4].mxu0 }
 0x51f   : > { %v1061_v16 = vpack.c.bf16 %v556_v15, %v556_v15  ;;  %v1105_v17 = vpop.f32.mrb[5].mxu0 }
 0x520   : > { %v559_v18 = vpop.f32.mrb[6].mxu0 }
 0x521   : > { %1016 = vst.msk [vmem:[%s1304_s6 + $0x8] sm:$0xf] %vm413_vm5, %v1061_v16  ;;  %v1062_v19 = vpack.c.bf16 %v559_v18, %v559_v18  ;;  %v1106_v20 = vpop.f32.mrb[7].mxu0 }
 0x523   : > { %1017 = vst.msk [vmem:[%s1304_s6 + $0xc] sm:$0x3] %vm415_vm6, %v1062_v19 }
 0x526   : > { %v713_v0 = vpop.f32.mrb[8].mxu0 }
 0x527   : > { %v1063_v21 = vpack.c.bf16 %v713_v0, %v713_v0  ;;  %v1117_v22 = vpop.f32.mrb[9].mxu0 }
 0x528   : > { %v716_v23 = vpop.f32.mrb[10].mxu0 }
 0x529   : > { %1033 = vst.msk [vmem:[%s1304_s6 + $0x10] sm:$0xf] %vm413_vm5, %v1063_v21  ;;  %v1064_v24 = vpack.c.bf16 %v716_v23, %v716_v23  ;;  %v1118_v25 = vpop.f32.mrb[11].mxu0 }
 0x52b   : > { %1034 = vst.msk [vmem:[%s1304_s6 + $0x14] sm:$0x3] %vm415_vm6, %v1064_v24 }
 0x52e   : > { %v870_v26 = vpop.f32.mrb[12].mxu0 }
 0x52f   : > { %v1065_v27 = vpack.c.bf16 %v870_v26, %v870_v26  ;;  %v1129_v28 = vpop.f32.mrb[13].mxu0 }
 0x530   : > { %v873_v29 = vpop.f32.mrb[14].mxu0 }
 0x531   : > { %1050 = vst.msk [vmem:[%s1304_s6 + $0x18] sm:$0xf] %vm413_vm5, %v1065_v27  ;;  %v1066_v30 = vpack.c.bf16 %v873_v29, %v873_v29  ;;  %v1130_v31 = vpop.f32.mrb[15].mxu0 }
 0x533   : > { %1051 = vst.msk [vmem:[%s1304_s6 + $0x1c] sm:$0x3] %vm415_vm6, %v1066_v30 }
 0x534 PF: > { %s14_s15 = sadd.s32 1, %s1191_s15  }
 0x535   : > { %p11_p4 = scmp.ge.s32.totalorder %s14_s15, 4  }
 0x537   :  { %13 = sbr.rel (!%p11_p4) target bundleno = 1 (0x1), region = 90 }

// kernel: _lambda_.53
= control target key start
LH: loop header
LB: loop body
LE: loop exit
PB: predicated region body
PF: predicated region fallthrough
CT: control target
= control target key end

     0   :  { %v192_v1 = vmov 0.0   ;;  %vm52_vm0 = vcmask 261120   ;;  %vm20_vm1 = vcmask 523264   ;;  %vm193_vm2 = vmmov 0   ;;  %s253_s0 = inlined_call_operand.vmem [shape: bf16[8,32], index: 0, kind: input, shape index: {}]   ;;  %s254_s1 = inlined_call_operand.vmem [shape: bf16[64,32], index: 1, kind: input, shape index: {}]   ;;  %s255_s2 = inlined_call_operand.vmem [shape: f32[1,64], index: 2, kind: input, shape index: {}]   ;;  %s256_s3 = inlined_call_operand.hbm [shape: f32[8,64], index: 3, kind: output, shape index: {}]  }
   0x1   :  { %v164_v0 = vld [vmem:[%s254_s1] sm:$0xff]   ;;  %149 = vmatprep.subr.bf16.mxu0 %v192_v1  ;;  %v165_v3 = vld [vmem:[%s254_s1 + $0x8] sm:$0xff]   ;;  %157 = vmatprep.mubr.msk.bf16.mxu0 %vm193_vm2, %v192_v1  ;;  %21 = vst.msk [vmem:[#allocation2] sm:$0xff] %vm20_vm1, %v192_v1 }
   0x2   :  { %v57_v2 = vsel %vm52_vm0, %v164_v0, 0 }
   0x3   :  { %150 = vmatpush3.bf16.xpose.msra.mxu0 %v57_v2 }
   0x4   :  { %151 = vmatprep.subr.bf16.mxu0 %v192_v1 }
   0x5   :  { %8 = vsyncpa [#allocation4], 0  ;;  %v60_v4 = vsel %vm52_vm0, %v165_v3, 0  ;;  %v166_v5 = vld [vmem:[%s254_s1 + $0x10] sm:$0xff]   ;;  %v167_v7 = vld [vmem:[%s254_s1 + $0x18] sm:$0xff]   ;;  %s194_s1 = smov [#allocation3]  }
   0x6   :  { %v63_v6 = vsel %vm52_vm0, %v166_v5, 0  ;;  %v66_v8 = vsel %vm52_vm0, %v167_v7, 0  ;;  %v22_v9 = vld [vmem:[%s253_s0] sm:$0xf]  ;;  %s130_s24 = sshll.u32 %s194_s1, 4  ;;  %s131_s24 = int_to_ptr.vmem [resolvable:$true] %s130_s24 }
   0x7   :  { %v143_v16 = vld [vmem:[%s255_s2] ss:$0 sm:$0xff]  ;;  %s168_s0 = scalar_lea.vmem %s131_s24, 128  ;;  %p173_p1 = scmp.lt.s32.totalorder %s131_s24, %s131_s24 }
   0x8   :  { %v31_v10 = vld [vmem:[#allocation2] sm:$0xff]  ;;  %p169_p0 = scmp.ne.s32.totalorder %s131_s24, %s168_s0  ;;  %p174_p2 = scmp.lt.s32.totalorder %s168_s0, %s168_s0 }
   0xa   :  { %p175_p3 = por %p174_p2, %p173_p1 }
   0xb   :  { %152 = vmatpush3.bf16.xpose.msra.mxu0 %v60_v4 }
   0xc   :  { %153 = vmatprep.subr.bf16.mxu0 %v192_v1  ;;  %p176_p4 = pnand %p175_p3, %p169_p0 }
  0x13   :  { %154 = vmatpush3.bf16.xpose.msra.mxu0 %v63_v6 }
  0x14   :  { %155 = vmatprep.subr.bf16.mxu0 %v192_v1 }
  0x1b   :  { %156 = vmatpush3.bf16.xpose.msra.mxu0 %v66_v8 }
  0x22   :  { %158 = vmatmul.mubr.msk.bf16.vlgmr.msra.gmra.mrb[0].mxu0 %vm52_vm0, %v22_v9 }
  0xf5   :  { %v102_v11 = vpop.f32.mrb[0].mxu0 }
  0xf6   :  { %v108_v12 = vadd.f32 %v102_v11, %v31_v10  ;;  %v159_v13 = vpop.f32.mrb[1].mxu0 }
  0xf7   :  { %v105_v14 = vpop.f32.mrb[2].mxu0 }
  0xf8   :  { %110 = vst.msk [vmem:[#allocation2] sm:$0xff] %vm20_vm1, %v108_v12  ;;  %v160_v15 = vpop.f32.mrb[3].mxu0 }
  0xff   :  { %v114_v17 = vld [vmem:[#allocation2] sm:$0xff] }
 0x100   :  { %v122_v18 = vadd.f32 %v143_v16, %v114_v17 }
 0x102   :  { %123 = vst.msk [vmem:[#allocation3] sm:$0xff] %vm20_vm1, %v122_v18 }
 0x103   :  { %179 = shalt.err (!%p176_p4)
}
 0x104   :  { %s180_s27 = scalar_lea.hbm %s256_s3, 128 }
 0x105   :  { %p181_p5 = scmp.ne.s32.totalorder %s256_s3, %s180_s27  ;;  %p184_p6 = scmp.lt.u32.totalorder %s180_s27, %s256_s3 }
 0x107   :  { %p186_p7 = pnand %p184_p6, %p181_p5 }
 0x109   :  { %189 = shalt.err (!%p186_p7)
}
 0x10a   :  { %133 = dma.vmem_to_hbm [thread:$0]  %s131_s24, 128, %s256_s3, [#allocation4]  }
 0x10b   :  { %190 = dma.done.wait [#allocation4], 128  }
 0x10c   :  { %191 = vsyncadd [#allocation4], 4294967168 }
 0x10d   :  { %137 = vsyncpa [#allocation4], 1 }

// kernel: _lambda_.51
= control target key start
LH: loop header
LB: loop body
LE: loop exit
PB: predicated region body
PF: predicated region fallthrough
CT: control target
= control target key end

     0   :  { %vm19_vm0 = vcmask 261120   ;;  %v155_v0 = vmov 0.0   ;;  %vm156_vm1 = vmmov 0   ;;  %v157_v33 = vmov 1.0   ;;  %s196_s1 = inlined_call_operand.vmem [shape: bf16[32,32], index: 1, kind: input, shape index: {}]   ;;  %s197_s0 = inlined_call_operand.vmem [shape: bf16[8,32], index: 0, kind: input, shape index: {}]   ;;  %s198_s2 = inlined_call_operand.vmem [shape: f32[1,32], index: 2, kind: input, shape index: {}]   ;;  %s199_s3 = inlined_call_operand.vmem [shape: bf16[8,32], index: 3, kind: output, shape index: {}]  }
   0x1   :  { %138 = vmatprep.subr.bf16.mxu0 %v155_v0  ;;  %v149_v1 = vld [vmem:[%s196_s1] sm:$0xff]   ;;  %142 = vmatprep.mubr.msk.bf16.mxu0 %vm156_vm1, %v155_v0  ;;  %20 = vst.msk [vmem:[#allocation2] sm:$0xff] %vm19_vm0, %v155_v0  ;;  %v150_v2 = vld [vmem:[%s196_s1 + $0x8] sm:$0xff]   ;;  %vm125_vm3 = vcmask 257024  }
   0x2   :  { %139 = vmatpush3.bf16.msra.mxu0 %v149_v1  ;;  %v21_v3 = vld [vmem:[%s197_s0] sm:$0xf] }
   0x3   :  { %140 = vmatprep.subr.bf16.mxu0 %v155_v0  ;;  %v134_v10 = vld [vmem:[%s198_s2] ss:$0 sm:$0xff] }
   0x6   :  { %141 = vmatpush3.bf16.msra.mxu0 %v150_v2 }
   0x8   :  { %v26_v4 = vld [vmem:[#allocation2] sm:$0xff] }
   0x9   :  { %143 = vmatmul.mubr.msk.bf16.vlgmr.msra.gmra.mrb[0].mxu0 %vm19_vm0, %v21_v3 }
  0xdc   :  { %v77_v5 = vpop.f32.mrb[0].mxu0 }
  0xdd   :  { %v83_v6 = vadd.f32 %v77_v5, %v26_v4  ;;  %v144_v7 = vpop.f32.mrb[1].mxu0 }
  0xde   :  { %v80_v8 = vpop.f32.mrb[2].mxu0 }
  0xdf   :  { %84 = vst.msk [vmem:[#allocation2] sm:$0xff] %vm19_vm0, %v83_v6  ;;  %v145_v9 = vpop.f32.mrb[3].mxu0 }
  0xe6   :  { %v88_v11 = vld [vmem:[#allocation2] sm:$0xff] }
  0xe7   :  { %v96_v12 = vadd.f32 %v134_v10, %v88_v11 }
  0xe9   :  { %v98_v13 = vmul.f32 0.70710677, %v96_v12  ;;  %v97_v36 = vmul.f32 0.5, %v96_v12 }
  0xeb   :  { %v101_v14 = vand.u32 2147483647, %v98_v13  ;;  %vm99_vm2 = vcmp.lt.f32.partialorder %v98_v13, 0.0 }
  0xec   :  { %v100_v34 = vsel %vm99_vm2, -1.0, %v157_v33 }
  0xed   :  { %v102_v15 = vmul.f32 0.3275911, %v101_v14  ;;  %v115_v17 = vsub.f32 0.0, %v101_v14 }
  0xef   :  { %v103_v16 = vadd.f32 1.0, %v102_v15  ;;  %v116_v19 = vmul.f32 %v115_v17, %v101_v14 }
  0xf1   :  { %151 = vrcp.f32 %v103_v16  ;;  %v117_v22 = vmul.f32 1.442695, %v116_v19 }
  0xf3   :  { %153 = vpow2.f32 %v117_v22 }
  0xfb   :  { %v152_v18 = vpop.eup %151 }
  0xfc   :  { %v106_v20 = vmul.f32 1.0614054, %v152_v18 }
  0xfd   :  { %v154_v30 = vpop.eup %153 }
  0xfe   :  { %v107_v21 = vadd.f32 -1.4531521, %v106_v20 }
 0x100   :  { %v108_v23 = vmul.f32 %v152_v18, %v107_v21 }
 0x102   :  { %v109_v24 = vadd.f32 1.4214138, %v108_v23 }
 0x104   :  { %v110_v25 = vmul.f32 %v152_v18, %v109_v24 }
 0x106   :  { %v111_v26 = vadd.f32 -0.28449672, %v110_v25 }
 0x108   :  { %v112_v27 = vmul.f32 %v152_v18, %v111_v26 }
 0x10a   :  { %v113_v28 = vadd.f32 0.2548296, %v112_v27 }
 0x10c   :  { %v114_v29 = vmul.f32 %v152_v18, %v113_v28 }
 0x10e   :  { %v119_v31 = vmul.f32 %v154_v30, %v114_v29 }
 0x110   :  { %v120_v32 = vsub.f32 1.0, %v119_v31 }
 0x112   :  { %v121_v35 = vmul.f32 %v120_v32, %v100_v34 }
 0x114   :  { %v122_v37 = vadd.f32 1.0, %v121_v35 }
 0x116   :  { %v123_v38 = vmul.f32 %v122_v37, %v97_v36 }
 0x118   :  { %v124_v39 = vpack.c.bf16 %v123_v38, %v123_v38 }
 0x11a   :  { %126 = vst.msk [vmem:[%s199_s3] sm:$0xf] %vm125_vm3, %v124_v39 }

</bundles_post_ra>
